<compile_context>
chip_gen: v5e
topology: v5e:2x2
jax: 0.10.0
libtpu: 0.0.40
codegen_flags: <defaults>
</compile_context>

<pallas_src>
import math

import jax
import jax.numpy as jnp
from jax.experimental import pallas as pl
from jax.experimental.pallas import tpu as pltpu

LANE = 128  # TPU lane width; padded feature dims use this.


# ---------------------------------------------------------------------------
# In-kernel building blocks (pure jnp, traced inside the Pallas kernels)
# ---------------------------------------------------------------------------

def _wavefront_lstm(gx_fn, wave, b_all, L, H, T, Bp, store_fn=None):
    """Run an L-layer LSTM stack as a single fused wavefront recurrence.

    gx_fn(s)  -> (Bp, G) layer-0 input-projection term for wavefront step s
                 (nonzero only in layer-0's gate columns), or None.
    wave      : (L*H, G) fused recurrent weight (block bi-diagonal, see packer)
    b_all     : (1, G)   packed biases (b_ih + b_hh per layer)
    store_fn(t, h_all): called right after the step that produced the LAST
                 layer's hidden for time t (h_all[:, (L-1)*H:] == h_last(t)).
    Returns the final packed hidden h_all (Bp, L*H); its last H lanes are the
    last layer's final hidden state.

    Gate layout is gate-major / layer-minor: [i_all | f_all | g_all | o_all],
    each block L*H wide and ordered like h_all, so the cell update is packed
    element-wise math with no per-layer slicing.
    """
    G = 4 * L * H
    LH = L * H
    h_all = jnp.zeros((Bp, LH), jnp.float32)
    c_all = jnp.zeros((Bp, LH), jnp.float32)
    for s in range(T + L - 1):        # fully unrolled: T, L are small & static
        # One MXU matmul drives every layer's recurrence + inter-layer input.
        gates = jnp.dot(h_all, wave, preferred_element_type=jnp.float32) + b_all
        gx = gx_fn(s)
        if gx is not None:
            gates = gates + gx
        sg = jax.nn.sigmoid(gates)    # one full-width EUP pass (all gates/layers)
        th = jnp.tanh(gates)          # one full-width EUP pass
        i_a = sg[:, 0 * LH:1 * LH]
        f_a = sg[:, 1 * LH:2 * LH]
        g_a = th[:, 2 * LH:3 * LH]
        o_a = sg[:, 3 * LH:4 * LH]
        c_new = f_a * c_all + i_a * g_a
        h_new = o_a * jnp.tanh(c_new)
        if s < L - 1:
            # Leading edge of the wavefront: layers j > s have not started yet;
            # keep their (h, c) at zero (static lane mask, only first L-1 steps).
            lane = jax.lax.broadcasted_iota(jnp.int32, (Bp, LH), 1)
            keep = lane < (s + 1) * H
            h_all = jnp.where(keep, h_new, h_all)
            c_all = jnp.where(keep, c_new, c_all)
        else:
            # Trailing edge is self-consistent: a finished layer's stale value
            # is read by its consumer BEFORE the (discarded) spurious update.
            h_all, c_all = h_new, c_new
        t_last = s - (L - 1)
        if store_fn is not None and t_last >= 0:
            store_fn(t_last, h_all)
    return h_all


def _run_encoder(x_ref, w_in, wave, b_all, gx_scr, L, H, T, Bp):
    """Encoder stack: hoisted layer-0 input projection + wavefront recurrence.

    Returns the packed final hidden h_all (Bp, L*H)."""
    # Hoisted layer-0 input projection over the whole padded sequence:
    # one lane-dense MXU matmul, parked in a VMEM scratch (bounds vreg pressure).
    gx_scr[...] = jnp.dot(x_ref[...], w_in, preferred_element_type=jnp.float32)

    def gx_fn(s):
        if s < T:
            return gx_scr[pl.ds(s * Bp, Bp), :]
        return None                    # layer 0 inactive past the input length

    return _wavefront_lstm(gx_fn, wave, b_all, L, H, T, Bp)


# ---------------------------------------------------------------------------
# Fused Pallas kernels (one pallas_call per forward path)
# ---------------------------------------------------------------------------

def _make_ae_kernel(L, T_past, T_fut, H, Bp):
    """Fused encoder -> latent -> decoder -> TimeDistributed output."""

    def kernel(x_ref, rnn_w_in_ref, rnn_wave_ref, rnn_b_ref,
               head_w_ref, head_b_ref,
               dec_out_ref, lat_out_ref,
               gx_scr, seq_scr):
        # ---- encoder (wavefront-fused LSTM stack) ----
        h_enc = _run_encoder(x_ref, rnn_w_in_ref[0], rnn_wave_ref[0],
                             rnn_b_ref[0], gx_scr, L, H, T_past, Bp)

        # ---- latent Linear (weight rows for non-last layers are zero) ----
        latent = (jnp.dot(h_enc, head_w_ref[0],
                          preferred_element_type=jnp.float32)
                  + head_b_ref[0])                       # (Bp, LANE)
        lat_out_ref[...] = latent

        # ---- decoder (input = latent repeated num_future times) ----
        # Layer-0 input projection is computed ONCE and reused every step.
        gx_dec = jnp.dot(latent, rnn_w_in_ref[1],
                         preferred_element_type=jnp.float32)  # (Bp, G)

        def store(t, h_all):
            # Per-step write of the packed hidden into VMEM scratch
            # (static, sublane-aligned offsets; no concatenate / value lists).
            seq_scr[pl.ds(t * Bp, Bp), :] = h_all

        _wavefront_lstm(lambda s: gx_dec, rnn_wave_ref[1], rnn_b_ref[1],
                        L, H, T_fut, Bp, store_fn=store)

        # ---- fused TimeDistributed output Linear: one lane-dense matmul ----
        # head_w[1] has zero rows for non-last layers, so the packed sequence
        # can be consumed directly.
        dec_out_ref[...] = (jnp.dot(seq_scr[...], head_w_ref[1],
                                    preferred_element_type=jnp.float32)
                            + head_b_ref[1])

    return kernel


def _make_classifier_kernel(L, T_past, H, Bp, n_cls_layers):
    """Fused encoder -> latent -> MLP classifier."""

    def kernel(x_ref, rnn_w_in_ref, rnn_wave_ref, rnn_b_ref,
               head_w_ref, head_b_ref, cls_w_ref, cls_b_ref,
               out_ref, gx_scr):
        h_enc = _run_encoder(x_ref, rnn_w_in_ref[0], rnn_wave_ref[0],
                             rnn_b_ref[0], gx_scr, L, H, T_past, Bp)
        z = (jnp.dot(h_enc, head_w_ref[0], preferred_element_type=jnp.float32)
             + head_b_ref[0])                            # (Bp, LANE) latent
        # MLP classifier: the reference applies a plain stack of Linears with
        # NO activations; Dropout before the output Linear is identity (eval).
        for k in range(n_cls_layers):
            z = (jnp.dot(z, cls_w_ref[k], preferred_element_type=jnp.float32)
                 + cls_b_ref[k])
        out_ref[...] = z

    return kernel


# ---------------------------------------------------------------------------
# Parameter construction & packing.
# Raw weights mirror the nn.Module shapes (and feed the pure-JAX reference);
# the packed/padded copies are what the kernels consume.  All padding is
# zero-filled, so the padded regions are mathematically inert.
# ---------------------------------------------------------------------------

def _uniform(key, shape, bound):
    return jax.random.uniform(key, shape, jnp.float32, -bound, bound)


def init_raw_lstm_stack(key, input_size, hidden_size, num_layers):
    layers = []
    bound = 1.0 / math.sqrt(hidden_size)
    for layer in range(num_layers):
        din = input_size if layer == 0 else hidden_size
        key, k1, k2, k3, k4 = jax.random.split(key, 5)
        layers.append({
            "w_ih": _uniform(k1, (din, 4 * hidden_size), bound),   # PyTorch W_ih^T
            "w_hh": _uniform(k2, (hidden_size, 4 * hidden_size), bound),
            "b": (_uniform(k3, (1, 4 * hidden_size), bound)        # b_ih + b_hh
                  + _uniform(k4, (1, 4 * hidden_size), bound)),
        })
    return layers, key


def init_raw_linear(key, fan_in, fan_out):
    bound = 1.0 / math.sqrt(fan_in)
    key, k1, k2 = jax.random.split(key, 3)
    return {"w": _uniform(k1, (fan_in, fan_out), bound),
            "b": _uniform(k2, (1, fan_out), bound)}, key


def _permute_gates(w, layer, L, H):
    """Map (din, 4H) PyTorch [i|f|g|o] gate columns of `layer` into the fused
    gate-major / layer-minor layout (din, 4*L*H)."""
    out = jnp.zeros((w.shape[0], 4 * L * H), jnp.float32)
    for g in range(4):
        out = out.at[:, g * L * H + layer * H:
                        g * L * H + (layer + 1) * H].set(w[:, g * H:(g + 1) * H])
    return out


def _pack_lstm_stack(layers, H):
    """-> (w_in_full (LANE, G), wave (L*H, G), b_all (1, G)).

    wave row-block j carries W_hh_j (into column-block j) and W_ih_{j+1}
    (into column-block j+1), so  [h_0|...|h_{L-1}] @ wave  produces every
    layer's recurrent + inter-layer-input gate contribution in one matmul."""
    L = len(layers)
    G = 4 * L * H
    din0 = layers[0]["w_ih"].shape[0]
    w_in = jnp.zeros((LANE, G), jnp.float32)
    w_in = w_in.at[:din0, :].set(_permute_gates(layers[0]["w_ih"], 0, L, H))
    wave = jnp.zeros((L * H, G), jnp.float32)
    b_all = jnp.zeros((1, G), jnp.float32)
    for j in range(L):
        wave = wave.at[j * H:(j + 1) * H, :].add(
            _permute_gates(layers[j]["w_hh"], j, L, H))
        if j + 1 < L:
            wave = wave.at[j * H:(j + 1) * H, :].add(
                _permute_gates(layers[j + 1]["w_ih"], j + 1, L, H))
        b_all = b_all + _permute_gates(layers[j]["b"], j, L, H)
    return w_in, wave, b_all


def _pack_head(lin, L, H):
    """Linear that consumes the LAST LSTM layer's hidden -> (L*H, LANE) weight
    consuming the packed h_all directly (other layers' rows are zero)."""
    w = jnp.zeros((L * H, LANE), jnp.float32)
    w = w.at[(L - 1) * H:L * H, :lin["w"].shape[1]].set(lin["w"])
    b = jnp.zeros((1, LANE), jnp.float32).at[:, :lin["b"].shape[1]].set(lin["b"])
    return w, b


def _pack_square(lin):
    w = jnp.zeros((LANE, LANE), jnp.float32)
    w = w.at[:lin["w"].shape[0], :lin["w"].shape[1]].set(lin["w"])
    b = jnp.zeros((1, LANE), jnp.float32).at[:, :lin["b"].shape[1]].set(lin["b"])
    return w, b


def init_multimodel_ae(key, cfg):
    H, L = cfg["lstm_hidden_size"], cfg["num_lstm_layers"]
    raw = {}
    raw["encoder"], key = init_raw_lstm_stack(key, cfg["input_size"], H, L)
    raw["latent"], key = init_raw_linear(key, H, cfg["latent_size"])
    raw["decoder"], key = init_raw_lstm_stack(key, cfg["latent_size"], H, L)
    raw["output"], key = init_raw_linear(key, H, cfg["output_size"])

    enc_w_in, enc_wave, enc_b = _pack_lstm_stack(raw["encoder"], H)
    dec_w_in, dec_wave, dec_b = _pack_lstm_stack(raw["decoder"], H)
    lat_w, lat_b = _pack_head(raw["latent"], L, H)
    out_w, out_b = _pack_head(raw["output"], L, H)
    packed = {
        "rnn_w_in": jnp.stack([enc_w_in, dec_w_in]),   # (2, LANE, G)
        "rnn_wave": jnp.stack([enc_wave, dec_wave]),   # (2, L*H, G)
        "rnn_b":    jnp.stack([enc_b, dec_b]),         # (2, 1, G)
        "head_w":   jnp.stack([lat_w, out_w]),         # (2, L*H, LANE)
        "head_b":   jnp.stack([lat_b, out_b]),         # (2, 1, LANE)
    }

    if cfg.get("num_classes") is not None:
        hidden = []
        lin, key = init_raw_linear(key, cfg["latent_size"],
                                   cfg["classifier_hidden_size"])
        hidden.append(lin)
        for _ in range(1, cfg["num_classifier_layers"] - 1):
            lin, key = init_raw_linear(key, cfg["classifier_hidden_size"],
                                       cfg["classifier_hidden_size"])
            hidden.append(lin)
        cls_out, key = init_raw_linear(key, cfg["classifier_hidden_size"],
                                       cfg["num_classes"])
        raw["classifier_hidden"] = hidden
        raw["classifier_out"] = cls_out
        mats = [_pack_square(l) for l in hidden + [cls_out]]
        packed["cls_w"] = jnp.stack([m[0] for m in mats])  # (C, LANE, LANE)
        packed["cls_b"] = jnp.stack([m[1] for m in mats])  # (C, 1, LANE)

    return {"raw": raw, "packed": packed}


# ---------------------------------------------------------------------------
# Forward pass (MultiModelAE.forward) -- one fused pallas_call per path
# ---------------------------------------------------------------------------

def _round_up(x, m):
    return ((x + m - 1) // m) * m


def _vmem_spec():
    return pl.BlockSpec(memory_space=pltpu.MemorySpace.VMEM)


def multimodel_ae_forward(params, cfg, data, classify=False):
    """data: (B, num_past, input_size) batch-first float32 (as in PyTorch)."""
    B, T_past, Din = data.shape
    H = cfg["lstm_hidden_size"]
    L = cfg["num_lstm_layers"]
    T_fut = cfg["num_future"]
    G = 4 * L * H
    LH = L * H
    Bp = _round_up(max(B, 8), 8)        # pad batch to a full sublane tile

    # Single pad+transpose into the kernel's time-major lane-dense layout
    # (the reshape is layout-preserving / free for a row-major HBM array).
    x_pad = jnp.zeros((T_past, Bp, LANE), jnp.float32).at[:, :B, :Din].set(
        jnp.transpose(data.astype(jnp.float32), (1, 0, 2)))
    x_flat = x_pad.reshape(T_past * Bp, LANE)

    pk = params["packed"]

    if not classify:
        args = [x_flat, pk["rnn_w_in"], pk["rnn_wave"], pk["rnn_b"],
                pk["head_w"], pk["head_b"]]
        dec_flat, lat_pad = pl.pallas_call(
            _make_ae_kernel(L, T_past, T_fut, H, Bp),
            out_shape=(jax.ShapeDtypeStruct((T_fut * Bp, LANE), jnp.float32),
                       jax.ShapeDtypeStruct((Bp, LANE), jnp.float32)),
            in_specs=[_vmem_spec()] * len(args),
            out_specs=(_vmem_spec(), _vmem_spec()),
            scratch_shapes=[pltpu.VMEM((T_past * Bp, G), jnp.float32),   # gx
                            pltpu.VMEM((T_fut * Bp, LH), jnp.float32)],  # dec seq
        )(*args)

        dec_out = jnp.transpose(dec_flat.reshape(T_fut, Bp, LANE),
                                (1, 0, 2))[:B, :, :cfg["output_size"]]
        latent_out = lat_pad[:B, :cfg["latent_size"]]
        return dec_out, latent_out
    else:
        n_cls_layers = cfg["num_classifier_layers"]
        args = [x_flat, pk["rnn_w_in"], pk["rnn_wave"], pk["rnn_b"],
                pk["head_w"], pk["head_b"], pk["cls_w"], pk["cls_b"]]
        out_pad = pl.pallas_call(
            _make_classifier_kernel(L, T_past, H, Bp, n_cls_layers),
            out_shape=jax.ShapeDtypeStruct((Bp, LANE), jnp.float32),
            in_specs=[_vmem_spec()] * len(args),
            out_specs=_vmem_spec(),
            scratch_shapes=[pltpu.VMEM((T_past * Bp, G), jnp.float32)],
        )(*args)
        return out_pad[:B, :cfg["num_classes"]]


# ---------------------------------------------------------------------------
# Pure-JAX reference (layer-by-layer LSTM, same raw weights) for verification
# ---------------------------------------------------------------------------

def _ref_dot(a, b):
    return jnp.dot(a, b, precision=jax.lax.Precision.HIGHEST)


def _ref_lstm_stack(x, layers, H):
    B, T, _ = x.shape
    seq = x
    for lyr in layers:
        h = jnp.zeros((B, H), jnp.float32)
        c = jnp.zeros((B, H), jnp.float32)
        outs = []
        for t in range(T):
            g = (_ref_dot(seq[:, t, :], lyr["w_ih"])
                 + _ref_dot(h, lyr["w_hh"]) + lyr["b"])
            i = jax.nn.sigmoid(g[:, 0 * H:1 * H])
            f = jax.nn.sigmoid(g[:, 1 * H:2 * H])
            gg = jnp.tanh(g[:, 2 * H:3 * H])
            o = jax.nn.sigmoid(g[:, 3 * H:4 * H])
            c = f * c + i * gg
            h = o * jnp.tanh(c)
            outs.append(h)
        seq = jnp.stack(outs, axis=1)
    return seq


def multimodel_ae_reference(params, cfg, data, classify=False):
    raw = params["raw"]
    H = cfg["lstm_hidden_size"]
    enc_seq = _ref_lstm_stack(data.astype(jnp.float32), raw["encoder"], H)
    latent = _ref_dot(enc_seq[:, -1, :], raw["latent"]["w"]) + raw["latent"]["b"]
    if not classify:
        dec_in = jnp.repeat(latent[:, None, :], cfg["num_future"], axis=1)
        dec_seq = _ref_lstm_stack(dec_in, raw["decoder"], H)
        dec_out = (jnp.einsum("bth,ho->bto", dec_seq, raw["output"]["w"],
                              precision=jax.lax.Precision.HIGHEST)
                   + raw["output"]["b"])
        return dec_out, latent
    z = latent
    for lyr in raw["classifier_hidden"]:
        z = _ref_dot(z, lyr["w"]) + lyr["b"]
    return _ref_dot(z, raw["classifier_out"]["w"]) + raw["classifier_out"]["b"]


# ---------------------------------------------------------------------------
# Demo
# ---------------------------------------------------------------------------

if __name__ == "__main__":
    cfg = dict(
        input_size=3,
        num_past=8,
        batch_size=2,
        num_future=8,
        lstm_hidden_size=32,
        num_lstm_layers=2,
        output_size=3,
        latent_size=16,
        num_classifier_layers=2,
        classifier_hidden_size=32,
        num_classes=5,
    )

    key = jax.random.PRNGKey(0)
    key, pkey, dkey = jax.random.split(key, 3)
    params = init_multimodel_ae(pkey, cfg)
    data = jax.random.normal(
        dkey, (cfg["batch_size"], cfg["num_past"], cfg["input_size"]),
        dtype=jnp.float32)

    ae_fwd = jax.jit(lambda p, d: multimodel_ae_forward(p, cfg, d, classify=False))
    cls_fwd = jax.jit(lambda p, d: multimodel_ae_forward(p, cfg, d, classify=True))

    # Autoencoder path (classify=False): returns (decoder_out, latent_out)
    decoder_out, latent_out = jax.block_until_ready(ae_fwd(params, data))
    assert decoder_out.shape == (cfg["batch_size"], cfg["num_future"],
                                 cfg["output_size"])
    assert latent_out.shape == (cfg["batch_size"], cfg["latent_size"])
    assert bool(jnp.all(jnp.isfinite(decoder_out)))
    assert bool(jnp.all(jnp.isfinite(latent_out)))

    # Classifier path (classify=True): returns classifier_out
    classifier_out = jax.block_until_ready(cls_fwd(params, data))
    assert classifier_out.shape == (cfg["batch_size"], cfg["num_classes"])
    assert bool(jnp.all(jnp.isfinite(classifier_out)))

    # Verify the wavefront-fused kernels against a plain layer-by-layer
    # pure-JAX reference built from the same raw weights.
    ref_dec, ref_lat = multimodel_ae_reference(params, cfg, data, classify=False)
    ref_cls = multimodel_ae_reference(params, cfg, data, classify=True)
    assert bool(jnp.allclose(decoder_out, ref_dec, rtol=2e-2, atol=2e-2))
    assert bool(jnp.allclose(latent_out, ref_lat, rtol=2e-2, atol=2e-2))
    assert bool(jnp.allclose(classifier_out, ref_cls, rtol=2e-2, atol=2e-2))

    print("KERNEL_OK")
</pallas_src>

<mosaic_0001>
module attributes {stable_mosaic.version = 11 : i64} {
  func.func @kernel(%arg0: memref<64x128xf32, #tpu.memory_space<vmem>>, %arg1: memref<2x128x256xf32, #tpu.memory_space<vmem>>, %arg2: memref<2x64x256xf32, #tpu.memory_space<vmem>>, %arg3: memref<2x1x256xf32, #tpu.memory_space<vmem>>, %arg4: memref<2x64x128xf32, #tpu.memory_space<vmem>>, %arg5: memref<2x1x128xf32, #tpu.memory_space<vmem>>, %arg6: memref<64x128xf32, #tpu.memory_space<vmem>>, %arg7: memref<8x128xf32, #tpu.memory_space<vmem>>, %arg8: memref<64x256xf32, #tpu.memory_space<vmem>>, %arg9: memref<64x64xf32, #tpu.memory_space<vmem>>) attributes {dimension_semantics = [], scalar_prefetch = 0 : i64, scratch_operands = 2 : i64, tpu.core_type = #tpu.core_type<tc>} {
    %c0 = arith.constant 0 : index
    %c0_0 = arith.constant 0 : index
    %c0_1 = arith.constant 0 : index
    %0 = vector.load %arg1[%c0, %c0_0, %c0_1] : memref<2x128x256xf32, #tpu.memory_space<vmem>>, vector<1x128x256xf32>
    %1 = vector.shape_cast %0 : vector<1x128x256xf32> to vector<128x256xf32>
    %c0_2 = arith.constant 0 : index
    %c0_3 = arith.constant 0 : index
    %c0_4 = arith.constant 0 : index
    %2 = vector.load %arg2[%c0_2, %c0_3, %c0_4] : memref<2x64x256xf32, #tpu.memory_space<vmem>>, vector<1x64x256xf32>
    %3 = vector.shape_cast %2 : vector<1x64x256xf32> to vector<64x256xf32>
    %c0_5 = arith.constant 0 : index
    %c0_6 = arith.constant 0 : index
    %c0_7 = arith.constant 0 : index
    %4 = vector.load %arg3[%c0_5, %c0_6, %c0_7] : memref<2x1x256xf32, #tpu.memory_space<vmem>>, vector<1x1x256xf32>
    %5 = vector.shape_cast %4 : vector<1x1x256xf32> to vector<1x256xf32>
    %c0_8 = arith.constant 0 : index
    %c0_9 = arith.constant 0 : index
    %6 = vector.load %arg0[%c0_8, %c0_9] : memref<64x128xf32, #tpu.memory_space<vmem>>, vector<64x128xf32>
    %cst = arith.constant dense<0.000000e+00> : vector<64x256xf32>
    %7 = tpu.matmul %6, %1, %cst {dimension_numbers = #tpu.dot_dimension_numbers<[1], [0], [0], [1], [0, 0, 1, 1], [], []>} : vector<64x128xf32>, vector<128x256xf32>, vector<64x256xf32> -> vector<64x256xf32>
    %c0_10 = arith.constant 0 : index
    %c0_11 = arith.constant 0 : index
    %8 = vector.load %arg8[%c0_10, %c0_11] : memref<64x256xf32, #tpu.memory_space<vmem>>, vector<64x256xf32>
    tpu.vector_store %arg8[%c0_10, %c0_11], %7 {strides = array<i32>} : memref<64x256xf32, #tpu.memory_space<vmem>>, vector<64x256xf32>,
    %cst_12 = arith.constant 0.000000e+00 : f32
    %9 = vector.broadcast %cst_12 : f32 to vector<8x64xf32>
    %cst_13 = arith.constant 0.000000e+00 : f32
    %10 = vector.broadcast %cst_13 : f32 to vector<8x64xf32>
    %cst_14 = arith.constant dense<0.000000e+00> : vector<8x256xf32>
    %11 = tpu.matmul %9, %3, %cst_14 {dimension_numbers = #tpu.dot_dimension_numbers<[1], [0], [0], [1], [0, 0, 1, 1], [], []>} : vector<8x64xf32>, vector<64x256xf32>, vector<8x256xf32> -> vector<8x256xf32>
    %12 = vector.broadcast %5 : vector<1x256xf32> to vector<8x256xf32>
    %13 = arith.addf %11, %12 : vector<8x256xf32>
    %c0_15 = arith.constant 0 : index
    %c0_16 = arith.constant 0 : index
    %14 = vector.load %arg8[%c0_15, %c0_16] : memref<64x256xf32, #tpu.memory_space<vmem>>, vector<8x256xf32>
    %15 = arith.addf %13, %14 : vector<8x256xf32>
    %16 = arith.negf %15 : vector<8x256xf32>
    %17 = math.exp %16 : vector<8x256xf32>
    %cst_17 = arith.constant 1.000000e+00 : f32
    %18 = vector.broadcast %cst_17 : f32 to vector<8x256xf32>
    %19 = arith.addf %18, %17 : vector<8x256xf32>
    %20 = arith.divf %18, %19 : vector<8x256xf32>
    %21 = math.tanh %15 : vector<8x256xf32>
    %22 = vector.extract_strided_slice %20 {offsets = [0, 0], sizes = [8, 64], strides = [1, 1]} : vector<8x256xf32> to vector<8x64xf32>
    %23 = vector.extract_strided_slice %20 {offsets = [0, 64], sizes = [8, 64], strides = [1, 1]} : vector<8x256xf32> to vector<8x64xf32>
    %24 = vector.extract_strided_slice %21 {offsets = [0, 128], sizes = [8, 64], strides = [1, 1]} : vector<8x256xf32> to vector<8x64xf32>
    %25 = vector.extract_strided_slice %20 {offsets = [0, 192], sizes = [8, 64], strides = [1, 1]} : vector<8x256xf32> to vector<8x64xf32>
    %26 = arith.mulf %23, %10 : vector<8x64xf32>
    %27 = arith.mulf %22, %24 : vector<8x64xf32>
    %28 = arith.addf %26, %27 : vector<8x64xf32>
    %29 = math.tanh %28 : vector<8x64xf32>
    %30 = arith.mulf %25, %29 : vector<8x64xf32>
    %31 = tpu.iota {dimensions = array<i32: 1>} : vector<8x64xi32>
    %c32_i32 = arith.constant 32 : i32
    %32 = vector.broadcast %c32_i32 : i32 to vector<8x64xi32>
    %33 = arith.cmpi slt, %31, %32 : vector<8x64xi32>
    %34 = arith.select %33, %30, %9 : vector<8x64xi1>, vector<8x64xf32>
    %35 = arith.select %33, %28, %10 : vector<8x64xi1>, vector<8x64xf32>
    %cst_18 = arith.constant dense<0.000000e+00> : vector<8x256xf32>
    %36 = tpu.matmul %34, %3, %cst_18 {dimension_numbers = #tpu.dot_dimension_numbers<[1], [0], [0], [1], [0, 0, 1, 1], [], []>} : vector<8x64xf32>, vector<64x256xf32>, vector<8x256xf32> -> vector<8x256xf32>
    %37 = vector.broadcast %5 : vector<1x256xf32> to vector<8x256xf32>
    %38 = arith.addf %36, %37 : vector<8x256xf32>
    %c8 = arith.constant 8 : index
    %c0_19 = arith.constant 0 : index
    %39 = vector.load %arg8[%c8, %c0_19] : memref<64x256xf32, #tpu.memory_space<vmem>>, vector<8x256xf32>
    %40 = arith.addf %38, %39 : vector<8x256xf32>
    %41 = arith.negf %40 : vector<8x256xf32>
    %42 = math.exp %41 : vector<8x256xf32>
    %cst_20 = arith.constant 1.000000e+00 : f32
    %43 = vector.broadcast %cst_20 : f32 to vector<8x256xf32>
    %44 = arith.addf %43, %42 : vector<8x256xf32>
    %45 = arith.divf %43, %44 : vector<8x256xf32>
    %46 = math.tanh %40 : vector<8x256xf32>
    %47 = vector.extract_strided_slice %45 {offsets = [0, 0], sizes = [8, 64], strides = [1, 1]} : vector<8x256xf32> to vector<8x64xf32>
    %48 = vector.extract_strided_slice %45 {offsets = [0, 64], sizes = [8, 64], strides = [1, 1]} : vector<8x256xf32> to vector<8x64xf32>
    %49 = vector.extract_strided_slice %46 {offsets = [0, 128], sizes = [8, 64], strides = [1, 1]} : vector<8x256xf32> to vector<8x64xf32>
    %50 = vector.extract_strided_slice %45 {offsets = [0, 192], sizes = [8, 64], strides = [1, 1]} : vector<8x256xf32> to vector<8x64xf32>
    %51 = arith.mulf %48, %35 : vector<8x64xf32>
    %52 = arith.mulf %47, %49 : vector<8x64xf32>
    %53 = arith.addf %51, %52 : vector<8x64xf32>
    %54 = math.tanh %53 : vector<8x64xf32>
    %55 = arith.mulf %50, %54 : vector<8x64xf32>
    %cst_21 = arith.constant dense<0.000000e+00> : vector<8x256xf32>
    %56 = tpu.matmul %55, %3, %cst_21 {dimension_numbers = #tpu.dot_dimension_numbers<[1], [0], [0], [1], [0, 0, 1, 1], [], []>} : vector<8x64xf32>, vector<64x256xf32>, vector<8x256xf32> -> vector<8x256xf32>
    %57 = vector.broadcast %5 : vector<1x256xf32> to vector<8x256xf32>
    %58 = arith.addf %56, %57 : vector<8x256xf32>
    %c16 = arith.constant 16 : index
    %c0_22 = arith.constant 0 : index
    %59 = vector.load %arg8[%c16, %c0_22] : memref<64x256xf32, #tpu.memory_space<vmem>>, vector<8x256xf32>
    %60 = arith.addf %58, %59 : vector<8x256xf32>
    %61 = arith.negf %60 : vector<8x256xf32>
    %62 = math.exp %61 : vector<8x256xf32>
    %cst_23 = arith.constant 1.000000e+00 : f32
    %63 = vector.broadcast %cst_23 : f32 to vector<8x256xf32>
    %64 = arith.addf %63, %62 : vector<8x256xf32>
    %65 = arith.divf %63, %64 : vector<8x256xf32>
    %66 = math.tanh %60 : vector<8x256xf32>
    %67 = vector.extract_strided_slice %65 {offsets = [0, 0], sizes = [8, 64], strides = [1, 1]} : vector<8x256xf32> to vector<8x64xf32>
    %68 = vector.extract_strided_slice %65 {offsets = [0, 64], sizes = [8, 64], strides = [1, 1]} : vector<8x256xf32> to vector<8x64xf32>
    %69 = vector.extract_strided_slice %66 {offsets = [0, 128], sizes = [8, 64], strides = [1, 1]} : vector<8x256xf32> to vector<8x64xf32>
    %70 = vector.extract_strided_slice %65 {offsets = [0, 192], sizes = [8, 64], strides = [1, 1]} : vector<8x256xf32> to vector<8x64xf32>
    %71 = arith.mulf %68, %53 : vector<8x64xf32>
    %72 = arith.mulf %67, %69 : vector<8x64xf32>
    %73 = arith.addf %71, %72 : vector<8x64xf32>
    %74 = math.tanh %73 : vector<8x64xf32>
    %75 = arith.mulf %70, %74 : vector<8x64xf32>
    %cst_24 = arith.constant dense<0.000000e+00> : vector<8x256xf32>
    %76 = tpu.matmul %75, %3, %cst_24 {dimension_numbers = #tpu.dot_dimension_numbers<[1], [0], [0], [1], [0, 0, 1, 1], [], []>} : vector<8x64xf32>, vector<64x256xf32>, vector<8x256xf32> -> vector<8x256xf32>
    %77 = vector.broadcast %5 : vector<1x256xf32> to vector<8x256xf32>
    %78 = arith.addf %76, %77 : vector<8x256xf32>
    %c24 = arith.constant 24 : index
    %c0_25 = arith.constant 0 : index
    %79 = vector.load %arg8[%c24, %c0_25] : memref<64x256xf32, #tpu.memory_space<vmem>>, vector<8x256xf32>
    %80 = arith.addf %78, %79 : vector<8x256xf32>
    %81 = arith.negf %80 : vector<8x256xf32>
    %82 = math.exp %81 : vector<8x256xf32>
    %cst_26 = arith.constant 1.000000e+00 : f32
    %83 = vector.broadcast %cst_26 : f32 to vector<8x256xf32>
    %84 = arith.addf %83, %82 : vector<8x256xf32>
    %85 = arith.divf %83, %84 : vector<8x256xf32>
    %86 = math.tanh %80 : vector<8x256xf32>
    %87 = vector.extract_strided_slice %85 {offsets = [0, 0], sizes = [8, 64], strides = [1, 1]} : vector<8x256xf32> to vector<8x64xf32>
    %88 = vector.extract_strided_slice %85 {offsets = [0, 64], sizes = [8, 64], strides = [1, 1]} : vector<8x256xf32> to vector<8x64xf32>
    %89 = vector.extract_strided_slice %86 {offsets = [0, 128], sizes = [8, 64], strides = [1, 1]} : vector<8x256xf32> to vector<8x64xf32>
    %90 = vector.extract_strided_slice %85 {offsets = [0, 192], sizes = [8, 64], strides = [1, 1]} : vector<8x256xf32> to vector<8x64xf32>
    %91 = arith.mulf %88, %73 : vector<8x64xf32>
    %92 = arith.mulf %87, %89 : vector<8x64xf32>
    %93 = arith.addf %91, %92 : vector<8x64xf32>
    %94 = math.tanh %93 : vector<8x64xf32>
    %95 = arith.mulf %90, %94 : vector<8x64xf32>
    %cst_27 = arith.constant dense<0.000000e+00> : vector<8x256xf32>
    %96 = tpu.matmul %95, %3, %cst_27 {dimension_numbers = #tpu.dot_dimension_numbers<[1], [0], [0], [1], [0, 0, 1, 1], [], []>} : vector<8x64xf32>, vector<64x256xf32>, vector<8x256xf32> -> vector<8x256xf32>
    %97 = vector.broadcast %5 : vector<1x256xf32> to vector<8x256xf32>
    %98 = arith.addf %96, %97 : vector<8x256xf32>
    %c32 = arith.constant 32 : index
    %c0_28 = arith.constant 0 : index
    %99 = vector.load %arg8[%c32, %c0_28] : memref<64x256xf32, #tpu.memory_space<vmem>>, vector<8x256xf32>
    %100 = arith.addf %98, %99 : vector<8x256xf32>
    %101 = arith.negf %100 : vector<8x256xf32>
    %102 = math.exp %101 : vector<8x256xf32>
    %cst_29 = arith.constant 1.000000e+00 : f32
    %103 = vector.broadcast %cst_29 : f32 to vector<8x256xf32>
    %104 = arith.addf %103, %102 : vector<8x256xf32>
    %105 = arith.divf %103, %104 : vector<8x256xf32>
    %106 = math.tanh %100 : vector<8x256xf32>
    %107 = vector.extract_strided_slice %105 {offsets = [0, 0], sizes = [8, 64], strides = [1, 1]} : vector<8x256xf32> to vector<8x64xf32>
    %108 = vector.extract_strided_slice %105 {offsets = [0, 64], sizes = [8, 64], strides = [1, 1]} : vector<8x256xf32> to vector<8x64xf32>
    %109 = vector.extract_strided_slice %106 {offsets = [0, 128], sizes = [8, 64], strides = [1, 1]} : vector<8x256xf32> to vector<8x64xf32>
    %110 = vector.extract_strided_slice %105 {offsets = [0, 192], sizes = [8, 64], strides = [1, 1]} : vector<8x256xf32> to vector<8x64xf32>
    %111 = arith.mulf %108, %93 : vector<8x64xf32>
    %112 = arith.mulf %107, %109 : vector<8x64xf32>
    %113 = arith.addf %111, %112 : vector<8x64xf32>
    %114 = math.tanh %113 : vector<8x64xf32>
    %115 = arith.mulf %110, %114 : vector<8x64xf32>
    %cst_30 = arith.constant dense<0.000000e+00> : vector<8x256xf32>
    %116 = tpu.matmul %115, %3, %cst_30 {dimension_numbers = #tpu.dot_dimension_numbers<[1], [0], [0], [1], [0, 0, 1, 1], [], []>} : vector<8x64xf32>, vector<64x256xf32>, vector<8x256xf32> -> vector<8x256xf32>
    %117 = vector.broadcast %5 : vector<1x256xf32> to vector<8x256xf32>
    %118 = arith.addf %116, %117 : vector<8x256xf32>
    %c40 = arith.constant 40 : index
    %c0_31 = arith.constant 0 : index
    %119 = vector.load %arg8[%c40, %c0_31] : memref<64x256xf32, #tpu.memory_space<vmem>>, vector<8x256xf32>
    %120 = arith.addf %118, %119 : vector<8x256xf32>
    %121 = arith.negf %120 : vector<8x256xf32>
    %122 = math.exp %121 : vector<8x256xf32>
    %cst_32 = arith.constant 1.000000e+00 : f32
    %123 = vector.broadcast %cst_32 : f32 to vector<8x256xf32>
    %124 = arith.addf %123, %122 : vector<8x256xf32>
    %125 = arith.divf %123, %124 : vector<8x256xf32>
    %126 = math.tanh %120 : vector<8x256xf32>
    %127 = vector.extract_strided_slice %125 {offsets = [0, 0], sizes = [8, 64], strides = [1, 1]} : vector<8x256xf32> to vector<8x64xf32>
    %128 = vector.extract_strided_slice %125 {offsets = [0, 64], sizes = [8, 64], strides = [1, 1]} : vector<8x256xf32> to vector<8x64xf32>
    %129 = vector.extract_strided_slice %126 {offsets = [0, 128], sizes = [8, 64], strides = [1, 1]} : vector<8x256xf32> to vector<8x64xf32>
    %130 = vector.extract_strided_slice %125 {offsets = [0, 192], sizes = [8, 64], strides = [1, 1]} : vector<8x256xf32> to vector<8x64xf32>
    %131 = arith.mulf %128, %113 : vector<8x64xf32>
    %132 = arith.mulf %127, %129 : vector<8x64xf32>
    %133 = arith.addf %131, %132 : vector<8x64xf32>
    %134 = math.tanh %133 : vector<8x64xf32>
    %135 = arith.mulf %130, %134 : vector<8x64xf32>
    %cst_33 = arith.constant dense<0.000000e+00> : vector<8x256xf32>
    %136 = tpu.matmul %135, %3, %cst_33 {dimension_numbers = #tpu.dot_dimension_numbers<[1], [0], [0], [1], [0, 0, 1, 1], [], []>} : vector<8x64xf32>, vector<64x256xf32>, vector<8x256xf32> -> vector<8x256xf32>
    %137 = vector.broadcast %5 : vector<1x256xf32> to vector<8x256xf32>
    %138 = arith.addf %136, %137 : vector<8x256xf32>
    %c48 = arith.constant 48 : index
    %c0_34 = arith.constant 0 : index
    %139 = vector.load %arg8[%c48, %c0_34] : memref<64x256xf32, #tpu.memory_space<vmem>>, vector<8x256xf32>
    %140 = arith.addf %138, %139 : vector<8x256xf32>
    %141 = arith.negf %140 : vector<8x256xf32>
    %142 = math.exp %141 : vector<8x256xf32>
    %cst_35 = arith.constant 1.000000e+00 : f32
    %143 = vector.broadcast %cst_35 : f32 to vector<8x256xf32>
    %144 = arith.addf %143, %142 : vector<8x256xf32>
    %145 = arith.divf %143, %144 : vector<8x256xf32>
    %146 = math.tanh %140 : vector<8x256xf32>
    %147 = vector.extract_strided_slice %145 {offsets = [0, 0], sizes = [8, 64], strides = [1, 1]} : vector<8x256xf32> to vector<8x64xf32>
    %148 = vector.extract_strided_slice %145 {offsets = [0, 64], sizes = [8, 64], strides = [1, 1]} : vector<8x256xf32> to vector<8x64xf32>
    %149 = vector.extract_strided_slice %146 {offsets = [0, 128], sizes = [8, 64], strides = [1, 1]} : vector<8x256xf32> to vector<8x64xf32>
    %150 = vector.extract_strided_slice %145 {offsets = [0, 192], sizes = [8, 64], strides = [1, 1]} : vector<8x256xf32> to vector<8x64xf32>
    %151 = arith.mulf %148, %133 : vector<8x64xf32>
    %152 = arith.mulf %147, %149 : vector<8x64xf32>
    %153 = arith.addf %151, %152 : vector<8x64xf32>
    %154 = math.tanh %153 : vector<8x64xf32>
    %155 = arith.mulf %150, %154 : vector<8x64xf32>
    %cst_36 = arith.constant dense<0.000000e+00> : vector<8x256xf32>
    %156 = tpu.matmul %155, %3, %cst_36 {dimension_numbers = #tpu.dot_dimension_numbers<[1], [0], [0], [1], [0, 0, 1, 1], [], []>} : vector<8x64xf32>, vector<64x256xf32>, vector<8x256xf32> -> vector<8x256xf32>
    %157 = vector.broadcast %5 : vector<1x256xf32> to vector<8x256xf32>
    %158 = arith.addf %156, %157 : vector<8x256xf32>
    %c56 = arith.constant 56 : index
    %c0_37 = arith.constant 0 : index
    %159 = vector.load %arg8[%c56, %c0_37] : memref<64x256xf32, #tpu.memory_space<vmem>>, vector<8x256xf32>
    %160 = arith.addf %158, %159 : vector<8x256xf32>
    %161 = arith.negf %160 : vector<8x256xf32>
    %162 = math.exp %161 : vector<8x256xf32>
    %cst_38 = arith.constant 1.000000e+00 : f32
    %163 = vector.broadcast %cst_38 : f32 to vector<8x256xf32>
    %164 = arith.addf %163, %162 : vector<8x256xf32>
    %165 = arith.divf %163, %164 : vector<8x256xf32>
    %166 = math.tanh %160 : vector<8x256xf32>
    %167 = vector.extract_strided_slice %165 {offsets = [0, 0], sizes = [8, 64], strides = [1, 1]} : vector<8x256xf32> to vector<8x64xf32>
    %168 = vector.extract_strided_slice %165 {offsets = [0, 64], sizes = [8, 64], strides = [1, 1]} : vector<8x256xf32> to vector<8x64xf32>
    %169 = vector.extract_strided_slice %166 {offsets = [0, 128], sizes = [8, 64], strides = [1, 1]} : vector<8x256xf32> to vector<8x64xf32>
    %170 = vector.extract_strided_slice %165 {offsets = [0, 192], sizes = [8, 64], strides = [1, 1]} : vector<8x256xf32> to vector<8x64xf32>
    %171 = arith.mulf %168, %153 : vector<8x64xf32>
    %172 = arith.mulf %167, %169 : vector<8x64xf32>
    %173 = arith.addf %171, %172 : vector<8x64xf32>
    %174 = math.tanh %173 : vector<8x64xf32>
    %175 = arith.mulf %170, %174 : vector<8x64xf32>
    %cst_39 = arith.constant dense<0.000000e+00> : vector<8x256xf32>
    %176 = tpu.matmul %175, %3, %cst_39 {dimension_numbers = #tpu.dot_dimension_numbers<[1], [0], [0], [1], [0, 0, 1, 1], [], []>} : vector<8x64xf32>, vector<64x256xf32>, vector<8x256xf32> -> vector<8x256xf32>
    %177 = vector.broadcast %5 : vector<1x256xf32> to vector<8x256xf32>
    %178 = arith.addf %176, %177 : vector<8x256xf32>
    %179 = arith.negf %178 : vector<8x256xf32>
    %180 = math.exp %179 : vector<8x256xf32>
    %cst_40 = arith.constant 1.000000e+00 : f32
    %181 = vector.broadcast %cst_40 : f32 to vector<8x256xf32>
    %182 = arith.addf %181, %180 : vector<8x256xf32>
    %183 = arith.divf %181, %182 : vector<8x256xf32>
    %184 = math.tanh %178 : vector<8x256xf32>
    %185 = vector.extract_strided_slice %183 {offsets = [0, 0], sizes = [8, 64], strides = [1, 1]} : vector<8x256xf32> to vector<8x64xf32>
    %186 = vector.extract_strided_slice %183 {offsets = [0, 64], sizes = [8, 64], strides = [1, 1]} : vector<8x256xf32> to vector<8x64xf32>
    %187 = vector.extract_strided_slice %184 {offsets = [0, 128], sizes = [8, 64], strides = [1, 1]} : vector<8x256xf32> to vector<8x64xf32>
    %188 = vector.extract_strided_slice %183 {offsets = [0, 192], sizes = [8, 64], strides = [1, 1]} : vector<8x256xf32> to vector<8x64xf32>
    %189 = arith.mulf %186, %173 : vector<8x64xf32>
    %190 = arith.mulf %185, %187 : vector<8x64xf32>
    %191 = arith.addf %189, %190 : vector<8x64xf32>
    %192 = math.tanh %191 : vector<8x64xf32>
    %193 = arith.mulf %188, %192 : vector<8x64xf32>
    %c0_41 = arith.constant 0 : index
    %c0_42 = arith.constant 0 : index
    %c0_43 = arith.constant 0 : index
    %194 = vector.load %arg4[%c0_41, %c0_42, %c0_43] : memref<2x64x128xf32, #tpu.memory_space<vmem>>, vector<1x64x128xf32>
    %195 = vector.shape_cast %194 : vector<1x64x128xf32> to vector<64x128xf32>
    %cst_44 = arith.constant dense<0.000000e+00> : vector<8x128xf32>
    %196 = tpu.matmul %193, %195, %cst_44 {dimension_numbers = #tpu.dot_dimension_numbers<[1], [0], [0], [1], [0, 0, 1, 1], [], []>} : vector<8x64xf32>, vector<64x128xf32>, vector<8x128xf32> -> vector<8x128xf32>
    %c0_45 = arith.constant 0 : index
    %c0_46 = arith.constant 0 : index
    %c0_47 = arith.constant 0 : index
    %197 = vector.load %arg5[%c0_45, %c0_46, %c0_47] : memref<2x1x128xf32, #tpu.memory_space<vmem>>, vector<1x1x128xf32>
    %198 = vector.shape_cast %197 : vector<1x1x128xf32> to vector<1x128xf32>
    %199 = vector.broadcast %198 : vector<1x128xf32> to vector<8x128xf32>
    %200 = arith.addf %196, %199 : vector<8x128xf32>
    %c0_48 = arith.constant 0 : index
    %c0_49 = arith.constant 0 : index
    %201 = vector.load %arg7[%c0_48, %c0_49] : memref<8x128xf32, #tpu.memory_space<vmem>>, vector<8x128xf32>
    tpu.vector_store %arg7[%c0_48, %c0_49], %200 {strides = array<i32>} : memref<8x128xf32, #tpu.memory_space<vmem>>, vector<8x128xf32>,
    %c1 = arith.constant 1 : index
    %c0_50 = arith.constant 0 : index
    %c0_51 = arith.constant 0 : index
    %202 = vector.load %arg1[%c1, %c0_50, %c0_51] : memref<2x128x256xf32, #tpu.memory_space<vmem>>, vector<1x128x256xf32>
    %203 = vector.shape_cast %202 : vector<1x128x256xf32> to vector<128x256xf32>
    %cst_52 = arith.constant dense<0.000000e+00> : vector<8x256xf32>
    %204 = tpu.matmul %200, %203, %cst_52 {dimension_numbers = #tpu.dot_dimension_numbers<[1], [0], [0], [1], [0, 0, 1, 1], [], []>} : vector<8x128xf32>, vector<128x256xf32>, vector<8x256xf32> -> vector<8x256xf32>
    %c1_53 = arith.constant 1 : index
    %c0_54 = arith.constant 0 : index
    %c0_55 = arith.constant 0 : index
    %205 = vector.load %arg2[%c1_53, %c0_54, %c0_55] : memref<2x64x256xf32, #tpu.memory_space<vmem>>, vector<1x64x256xf32>
    %206 = vector.shape_cast %205 : vector<1x64x256xf32> to vector<64x256xf32>
    %c1_56 = arith.constant 1 : index
    %c0_57 = arith.constant 0 : index
    %c0_58 = arith.constant 0 : index
    %207 = vector.load %arg3[%c1_56, %c0_57, %c0_58] : memref<2x1x256xf32, #tpu.memory_space<vmem>>, vector<1x1x256xf32>
    %208 = vector.shape_cast %207 : vector<1x1x256xf32> to vector<1x256xf32>
    %cst_59 = arith.constant 0.000000e+00 : f32
    %209 = vector.broadcast %cst_59 : f32 to vector<8x64xf32>
    %cst_60 = arith.constant 0.000000e+00 : f32
    %210 = vector.broadcast %cst_60 : f32 to vector<8x64xf32>
    %cst_61 = arith.constant dense<0.000000e+00> : vector<8x256xf32>
    %211 = tpu.matmul %209, %206, %cst_61 {dimension_numbers = #tpu.dot_dimension_numbers<[1], [0], [0], [1], [0, 0, 1, 1], [], []>} : vector<8x64xf32>, vector<64x256xf32>, vector<8x256xf32> -> vector<8x256xf32>
    %212 = vector.broadcast %208 : vector<1x256xf32> to vector<8x256xf32>
    %213 = arith.addf %211, %212 : vector<8x256xf32>
    %214 = arith.addf %213, %204 : vector<8x256xf32>
    %215 = arith.negf %214 : vector<8x256xf32>
    %216 = math.exp %215 : vector<8x256xf32>
    %cst_62 = arith.constant 1.000000e+00 : f32
    %217 = vector.broadcast %cst_62 : f32 to vector<8x256xf32>
    %218 = arith.addf %217, %216 : vector<8x256xf32>
    %219 = arith.divf %217, %218 : vector<8x256xf32>
    %220 = math.tanh %214 : vector<8x256xf32>
    %221 = vector.extract_strided_slice %219 {offsets = [0, 0], sizes = [8, 64], strides = [1, 1]} : vector<8x256xf32> to vector<8x64xf32>
    %222 = vector.extract_strided_slice %219 {offsets = [0, 64], sizes = [8, 64], strides = [1, 1]} : vector<8x256xf32> to vector<8x64xf32>
    %223 = vector.extract_strided_slice %220 {offsets = [0, 128], sizes = [8, 64], strides = [1, 1]} : vector<8x256xf32> to vector<8x64xf32>
    %224 = vector.extract_strided_slice %219 {offsets = [0, 192], sizes = [8, 64], strides = [1, 1]} : vector<8x256xf32> to vector<8x64xf32>
    %225 = arith.mulf %222, %210 : vector<8x64xf32>
    %226 = arith.mulf %221, %223 : vector<8x64xf32>
    %227 = arith.addf %225, %226 : vector<8x64xf32>
    %228 = math.tanh %227 : vector<8x64xf32>
    %229 = arith.mulf %224, %228 : vector<8x64xf32>
    %230 = tpu.iota {dimensions = array<i32: 1>} : vector<8x64xi32>
    %c32_i32_63 = arith.constant 32 : i32
    %231 = vector.broadcast %c32_i32_63 : i32 to vector<8x64xi32>
    %232 = arith.cmpi slt, %230, %231 : vector<8x64xi32>
    %233 = arith.select %232, %229, %209 : vector<8x64xi1>, vector<8x64xf32>
    %234 = arith.select %232, %227, %210 : vector<8x64xi1>, vector<8x64xf32>
    %cst_64 = arith.constant dense<0.000000e+00> : vector<8x256xf32>
    %235 = tpu.matmul %233, %206, %cst_64 {dimension_numbers = #tpu.dot_dimension_numbers<[1], [0], [0], [1], [0, 0, 1, 1], [], []>} : vector<8x64xf32>, vector<64x256xf32>, vector<8x256xf32> -> vector<8x256xf32>
    %236 = vector.broadcast %208 : vector<1x256xf32> to vector<8x256xf32>
    %237 = arith.addf %235, %236 : vector<8x256xf32>
    %238 = arith.addf %237, %204 : vector<8x256xf32>
    %239 = arith.negf %238 : vector<8x256xf32>
    %240 = math.exp %239 : vector<8x256xf32>
    %cst_65 = arith.constant 1.000000e+00 : f32
    %241 = vector.broadcast %cst_65 : f32 to vector<8x256xf32>
    %242 = arith.addf %241, %240 : vector<8x256xf32>
    %243 = arith.divf %241, %242 : vector<8x256xf32>
    %244 = math.tanh %238 : vector<8x256xf32>
    %245 = vector.extract_strided_slice %243 {offsets = [0, 0], sizes = [8, 64], strides = [1, 1]} : vector<8x256xf32> to vector<8x64xf32>
    %246 = vector.extract_strided_slice %243 {offsets = [0, 64], sizes = [8, 64], strides = [1, 1]} : vector<8x256xf32> to vector<8x64xf32>
    %247 = vector.extract_strided_slice %244 {offsets = [0, 128], sizes = [8, 64], strides = [1, 1]} : vector<8x256xf32> to vector<8x64xf32>
    %248 = vector.extract_strided_slice %243 {offsets = [0, 192], sizes = [8, 64], strides = [1, 1]} : vector<8x256xf32> to vector<8x64xf32>
    %249 = arith.mulf %246, %234 : vector<8x64xf32>
    %250 = arith.mulf %245, %247 : vector<8x64xf32>
    %251 = arith.addf %249, %250 : vector<8x64xf32>
    %252 = math.tanh %251 : vector<8x64xf32>
    %253 = arith.mulf %248, %252 : vector<8x64xf32>
    %c0_66 = arith.constant 0 : index
    %c0_67 = arith.constant 0 : index
    %254 = vector.load %arg9[%c0_66, %c0_67] : memref<64x64xf32, #tpu.memory_space<vmem>>, vector<8x64xf32>
    tpu.vector_store %arg9[%c0_66, %c0_67], %253 {strides = array<i32>} : memref<64x64xf32, #tpu.memory_space<vmem>>, vector<8x64xf32>,
    %cst_68 = arith.constant dense<0.000000e+00> : vector<8x256xf32>
    %255 = tpu.matmul %253, %206, %cst_68 {dimension_numbers = #tpu.dot_dimension_numbers<[1], [0], [0], [1], [0, 0, 1, 1], [], []>} : vector<8x64xf32>, vector<64x256xf32>, vector<8x256xf32> -> vector<8x256xf32>
    %256 = vector.broadcast %208 : vector<1x256xf32> to vector<8x256xf32>
    %257 = arith.addf %255, %256 : vector<8x256xf32>
    %258 = arith.addf %257, %204 : vector<8x256xf32>
    %259 = arith.negf %258 : vector<8x256xf32>
    %260 = math.exp %259 : vector<8x256xf32>
    %cst_69 = arith.constant 1.000000e+00 : f32
    %261 = vector.broadcast %cst_69 : f32 to vector<8x256xf32>
    %262 = arith.addf %261, %260 : vector<8x256xf32>
    %263 = arith.divf %261, %262 : vector<8x256xf32>
    %264 = math.tanh %258 : vector<8x256xf32>
    %265 = vector.extract_strided_slice %263 {offsets = [0, 0], sizes = [8, 64], strides = [1, 1]} : vector<8x256xf32> to vector<8x64xf32>
    %266 = vector.extract_strided_slice %263 {offsets = [0, 64], sizes = [8, 64], strides = [1, 1]} : vector<8x256xf32> to vector<8x64xf32>
    %267 = vector.extract_strided_slice %264 {offsets = [0, 128], sizes = [8, 64], strides = [1, 1]} : vector<8x256xf32> to vector<8x64xf32>
    %268 = vector.extract_strided_slice %263 {offsets = [0, 192], sizes = [8, 64], strides = [1, 1]} : vector<8x256xf32> to vector<8x64xf32>
    %269 = arith.mulf %266, %251 : vector<8x64xf32>
    %270 = arith.mulf %265, %267 : vector<8x64xf32>
    %271 = arith.addf %269, %270 : vector<8x64xf32>
    %272 = math.tanh %271 : vector<8x64xf32>
    %273 = arith.mulf %268, %272 : vector<8x64xf32>
    %c8_70 = arith.constant 8 : index
    %c0_71 = arith.constant 0 : index
    %274 = vector.load %arg9[%c8_70, %c0_71] : memref<64x64xf32, #tpu.memory_space<vmem>>, vector<8x64xf32>
    tpu.vector_store %arg9[%c8_70, %c0_71], %273 {strides = array<i32>} : memref<64x64xf32, #tpu.memory_space<vmem>>, vector<8x64xf32>,
    %cst_72 = arith.constant dense<0.000000e+00> : vector<8x256xf32>
    %275 = tpu.matmul %273, %206, %cst_72 {dimension_numbers = #tpu.dot_dimension_numbers<[1], [0], [0], [1], [0, 0, 1, 1], [], []>} : vector<8x64xf32>, vector<64x256xf32>, vector<8x256xf32> -> vector<8x256xf32>
    %276 = vector.broadcast %208 : vector<1x256xf32> to vector<8x256xf32>
    %277 = arith.addf %275, %276 : vector<8x256xf32>
    %278 = arith.addf %277, %204 : vector<8x256xf32>
    %279 = arith.negf %278 : vector<8x256xf32>
    %280 = math.exp %279 : vector<8x256xf32>
    %cst_73 = arith.constant 1.000000e+00 : f32
    %281 = vector.broadcast %cst_73 : f32 to vector<8x256xf32>
    %282 = arith.addf %281, %280 : vector<8x256xf32>
    %283 = arith.divf %281, %282 : vector<8x256xf32>
    %284 = math.tanh %278 : vector<8x256xf32>
    %285 = vector.extract_strided_slice %283 {offsets = [0, 0], sizes = [8, 64], strides = [1, 1]} : vector<8x256xf32> to vector<8x64xf32>
    %286 = vector.extract_strided_slice %283 {offsets = [0, 64], sizes = [8, 64], strides = [1, 1]} : vector<8x256xf32> to vector<8x64xf32>
    %287 = vector.extract_strided_slice %284 {offsets = [0, 128], sizes = [8, 64], strides = [1, 1]} : vector<8x256xf32> to vector<8x64xf32>
    %288 = vector.extract_strided_slice %283 {offsets = [0, 192], sizes = [8, 64], strides = [1, 1]} : vector<8x256xf32> to vector<8x64xf32>
    %289 = arith.mulf %286, %271 : vector<8x64xf32>
    %290 = arith.mulf %285, %287 : vector<8x64xf32>
    %291 = arith.addf %289, %290 : vector<8x64xf32>
    %292 = math.tanh %291 : vector<8x64xf32>
    %293 = arith.mulf %288, %292 : vector<8x64xf32>
    %c16_74 = arith.constant 16 : index
    %c0_75 = arith.constant 0 : index
    %294 = vector.load %arg9[%c16_74, %c0_75] : memref<64x64xf32, #tpu.memory_space<vmem>>, vector<8x64xf32>
    tpu.vector_store %arg9[%c16_74, %c0_75], %293 {strides = array<i32>} : memref<64x64xf32, #tpu.memory_space<vmem>>, vector<8x64xf32>,
    %cst_76 = arith.constant dense<0.000000e+00> : vector<8x256xf32>
    %295 = tpu.matmul %293, %206, %cst_76 {dimension_numbers = #tpu.dot_dimension_numbers<[1], [0], [0], [1], [0, 0, 1, 1], [], []>} : vector<8x64xf32>, vector<64x256xf32>, vector<8x256xf32> -> vector<8x256xf32>
    %296 = vector.broadcast %208 : vector<1x256xf32> to vector<8x256xf32>
    %297 = arith.addf %295, %296 : vector<8x256xf32>
    %298 = arith.addf %297, %204 : vector<8x256xf32>
    %299 = arith.negf %298 : vector<8x256xf32>
    %300 = math.exp %299 : vector<8x256xf32>
    %cst_77 = arith.constant 1.000000e+00 : f32
    %301 = vector.broadcast %cst_77 : f32 to vector<8x256xf32>
    %302 = arith.addf %301, %300 : vector<8x256xf32>
    %303 = arith.divf %301, %302 : vector<8x256xf32>
    %304 = math.tanh %298 : vector<8x256xf32>
    %305 = vector.extract_strided_slice %303 {offsets = [0, 0], sizes = [8, 64], strides = [1, 1]} : vector<8x256xf32> to vector<8x64xf32>
    %306 = vector.extract_strided_slice %303 {offsets = [0, 64], sizes = [8, 64], strides = [1, 1]} : vector<8x256xf32> to vector<8x64xf32>
    %307 = vector.extract_strided_slice %304 {offsets = [0, 128], sizes = [8, 64], strides = [1, 1]} : vector<8x256xf32> to vector<8x64xf32>
    %308 = vector.extract_strided_slice %303 {offsets = [0, 192], sizes = [8, 64], strides = [1, 1]} : vector<8x256xf32> to vector<8x64xf32>
    %309 = arith.mulf %306, %291 : vector<8x64xf32>
    %310 = arith.mulf %305, %307 : vector<8x64xf32>
    %311 = arith.addf %309, %310 : vector<8x64xf32>
    %312 = math.tanh %311 : vector<8x64xf32>
    %313 = arith.mulf %308, %312 : vector<8x64xf32>
    %c24_78 = arith.constant 24 : index
    %c0_79 = arith.constant 0 : index
    %314 = vector.load %arg9[%c24_78, %c0_79] : memref<64x64xf32, #tpu.memory_space<vmem>>, vector<8x64xf32>
    tpu.vector_store %arg9[%c24_78, %c0_79], %313 {strides = array<i32>} : memref<64x64xf32, #tpu.memory_space<vmem>>, vector<8x64xf32>,
    %cst_80 = arith.constant dense<0.000000e+00> : vector<8x256xf32>
    %315 = tpu.matmul %313, %206, %cst_80 {dimension_numbers = #tpu.dot_dimension_numbers<[1], [0], [0], [1], [0, 0, 1, 1], [], []>} : vector<8x64xf32>, vector<64x256xf32>, vector<8x256xf32> -> vector<8x256xf32>
    %316 = vector.broadcast %208 : vector<1x256xf32> to vector<8x256xf32>
    %317 = arith.addf %315, %316 : vector<8x256xf32>
    %318 = arith.addf %317, %204 : vector<8x256xf32>
    %319 = arith.negf %318 : vector<8x256xf32>
    %320 = math.exp %319 : vector<8x256xf32>
    %cst_81 = arith.constant 1.000000e+00 : f32
    %321 = vector.broadcast %cst_81 : f32 to vector<8x256xf32>
    %322 = arith.addf %321, %320 : vector<8x256xf32>
    %323 = arith.divf %321, %322 : vector<8x256xf32>
    %324 = math.tanh %318 : vector<8x256xf32>
    %325 = vector.extract_strided_slice %323 {offsets = [0, 0], sizes = [8, 64], strides = [1, 1]} : vector<8x256xf32> to vector<8x64xf32>
    %326 = vector.extract_strided_slice %323 {offsets = [0, 64], sizes = [8, 64], strides = [1, 1]} : vector<8x256xf32> to vector<8x64xf32>
    %327 = vector.extract_strided_slice %324 {offsets = [0, 128], sizes = [8, 64], strides = [1, 1]} : vector<8x256xf32> to vector<8x64xf32>
    %328 = vector.extract_strided_slice %323 {offsets = [0, 192], sizes = [8, 64], strides = [1, 1]} : vector<8x256xf32> to vector<8x64xf32>
    %329 = arith.mulf %326, %311 : vector<8x64xf32>
    %330 = arith.mulf %325, %327 : vector<8x64xf32>
    %331 = arith.addf %329, %330 : vector<8x64xf32>
    %332 = math.tanh %331 : vector<8x64xf32>
    %333 = arith.mulf %328, %332 : vector<8x64xf32>
    %c32_82 = arith.constant 32 : index
    %c0_83 = arith.constant 0 : index
    %334 = vector.load %arg9[%c32_82, %c0_83] : memref<64x64xf32, #tpu.memory_space<vmem>>, vector<8x64xf32>
    tpu.vector_store %arg9[%c32_82, %c0_83], %333 {strides = array<i32>} : memref<64x64xf32, #tpu.memory_space<vmem>>, vector<8x64xf32>,
    %cst_84 = arith.constant dense<0.000000e+00> : vector<8x256xf32>
    %335 = tpu.matmul %333, %206, %cst_84 {dimension_numbers = #tpu.dot_dimension_numbers<[1], [0], [0], [1], [0, 0, 1, 1], [], []>} : vector<8x64xf32>, vector<64x256xf32>, vector<8x256xf32> -> vector<8x256xf32>
    %336 = vector.broadcast %208 : vector<1x256xf32> to vector<8x256xf32>
    %337 = arith.addf %335, %336 : vector<8x256xf32>
    %338 = arith.addf %337, %204 : vector<8x256xf32>
    %339 = arith.negf %338 : vector<8x256xf32>
    %340 = math.exp %339 : vector<8x256xf32>
    %cst_85 = arith.constant 1.000000e+00 : f32
    %341 = vector.broadcast %cst_85 : f32 to vector<8x256xf32>
    %342 = arith.addf %341, %340 : vector<8x256xf32>
    %343 = arith.divf %341, %342 : vector<8x256xf32>
    %344 = math.tanh %338 : vector<8x256xf32>
    %345 = vector.extract_strided_slice %343 {offsets = [0, 0], sizes = [8, 64], strides = [1, 1]} : vector<8x256xf32> to vector<8x64xf32>
    %346 = vector.extract_strided_slice %343 {offsets = [0, 64], sizes = [8, 64], strides = [1, 1]} : vector<8x256xf32> to vector<8x64xf32>
    %347 = vector.extract_strided_slice %344 {offsets = [0, 128], sizes = [8, 64], strides = [1, 1]} : vector<8x256xf32> to vector<8x64xf32>
    %348 = vector.extract_strided_slice %343 {offsets = [0, 192], sizes = [8, 64], strides = [1, 1]} : vector<8x256xf32> to vector<8x64xf32>
    %349 = arith.mulf %346, %331 : vector<8x64xf32>
    %350 = arith.mulf %345, %347 : vector<8x64xf32>
    %351 = arith.addf %349, %350 : vector<8x64xf32>
    %352 = math.tanh %351 : vector<8x64xf32>
    %353 = arith.mulf %348, %352 : vector<8x64xf32>
    %c40_86 = arith.constant 40 : index
    %c0_87 = arith.constant 0 : index
    %354 = vector.load %arg9[%c40_86, %c0_87] : memref<64x64xf32, #tpu.memory_space<vmem>>, vector<8x64xf32>
    tpu.vector_store %arg9[%c40_86, %c0_87], %353 {strides = array<i32>} : memref<64x64xf32, #tpu.memory_space<vmem>>, vector<8x64xf32>,
    %cst_88 = arith.constant dense<0.000000e+00> : vector<8x256xf32>
    %355 = tpu.matmul %353, %206, %cst_88 {dimension_numbers = #tpu.dot_dimension_numbers<[1], [0], [0], [1], [0, 0, 1, 1], [], []>} : vector<8x64xf32>, vector<64x256xf32>, vector<8x256xf32> -> vector<8x256xf32>
    %356 = vector.broadcast %208 : vector<1x256xf32> to vector<8x256xf32>
    %357 = arith.addf %355, %356 : vector<8x256xf32>
    %358 = arith.addf %357, %204 : vector<8x256xf32>
    %359 = arith.negf %358 : vector<8x256xf32>
    %360 = math.exp %359 : vector<8x256xf32>
    %cst_89 = arith.constant 1.000000e+00 : f32
    %361 = vector.broadcast %cst_89 : f32 to vector<8x256xf32>
    %362 = arith.addf %361, %360 : vector<8x256xf32>
    %363 = arith.divf %361, %362 : vector<8x256xf32>
    %364 = math.tanh %358 : vector<8x256xf32>
    %365 = vector.extract_strided_slice %363 {offsets = [0, 0], sizes = [8, 64], strides = [1, 1]} : vector<8x256xf32> to vector<8x64xf32>
    %366 = vector.extract_strided_slice %363 {offsets = [0, 64], sizes = [8, 64], strides = [1, 1]} : vector<8x256xf32> to vector<8x64xf32>
    %367 = vector.extract_strided_slice %364 {offsets = [0, 128], sizes = [8, 64], strides = [1, 1]} : vector<8x256xf32> to vector<8x64xf32>
    %368 = vector.extract_strided_slice %363 {offsets = [0, 192], sizes = [8, 64], strides = [1, 1]} : vector<8x256xf32> to vector<8x64xf32>
    %369 = arith.mulf %366, %351 : vector<8x64xf32>
    %370 = arith.mulf %365, %367 : vector<8x64xf32>
    %371 = arith.addf %369, %370 : vector<8x64xf32>
    %372 = math.tanh %371 : vector<8x64xf32>
    %373 = arith.mulf %368, %372 : vector<8x64xf32>
    %c48_90 = arith.constant 48 : index
    %c0_91 = arith.constant 0 : index
    %374 = vector.load %arg9[%c48_90, %c0_91] : memref<64x64xf32, #tpu.memory_space<vmem>>, vector<8x64xf32>
    tpu.vector_store %arg9[%c48_90, %c0_91], %373 {strides = array<i32>} : memref<64x64xf32, #tpu.memory_space<vmem>>, vector<8x64xf32>,
    %cst_92 = arith.constant dense<0.000000e+00> : vector<8x256xf32>
    %375 = tpu.matmul %373, %206, %cst_92 {dimension_numbers = #tpu.dot_dimension_numbers<[1], [0], [0], [1], [0, 0, 1, 1], [], []>} : vector<8x64xf32>, vector<64x256xf32>, vector<8x256xf32> -> vector<8x256xf32>
    %376 = vector.broadcast %208 : vector<1x256xf32> to vector<8x256xf32>
    %377 = arith.addf %375, %376 : vector<8x256xf32>
    %378 = arith.addf %377, %204 : vector<8x256xf32>
    %379 = arith.negf %378 : vector<8x256xf32>
    %380 = math.exp %379 : vector<8x256xf32>
    %cst_93 = arith.constant 1.000000e+00 : f32
    %381 = vector.broadcast %cst_93 : f32 to vector<8x256xf32>
    %382 = arith.addf %381, %380 : vector<8x256xf32>
    %383 = arith.divf %381, %382 : vector<8x256xf32>
    %384 = math.tanh %378 : vector<8x256xf32>
    %385 = vector.extract_strided_slice %383 {offsets = [0, 0], sizes = [8, 64], strides = [1, 1]} : vector<8x256xf32> to vector<8x64xf32>
    %386 = vector.extract_strided_slice %383 {offsets = [0, 64], sizes = [8, 64], strides = [1, 1]} : vector<8x256xf32> to vector<8x64xf32>
    %387 = vector.extract_strided_slice %384 {offsets = [0, 128], sizes = [8, 64], strides = [1, 1]} : vector<8x256xf32> to vector<8x64xf32>
    %388 = vector.extract_strided_slice %383 {offsets = [0, 192], sizes = [8, 64], strides = [1, 1]} : vector<8x256xf32> to vector<8x64xf32>
    %389 = arith.mulf %386, %371 : vector<8x64xf32>
    %390 = arith.mulf %385, %387 : vector<8x64xf32>
    %391 = arith.addf %389, %390 : vector<8x64xf32>
    %392 = math.tanh %391 : vector<8x64xf32>
    %393 = arith.mulf %388, %392 : vector<8x64xf32>
    %c56_94 = arith.constant 56 : index
    %c0_95 = arith.constant 0 : index
    %394 = vector.load %arg9[%c56_94, %c0_95] : memref<64x64xf32, #tpu.memory_space<vmem>>, vector<8x64xf32>
    tpu.vector_store %arg9[%c56_94, %c0_95], %393 {strides = array<i32>} : memref<64x64xf32, #tpu.memory_space<vmem>>, vector<8x64xf32>,
    %c0_96 = arith.constant 0 : index
    %c0_97 = arith.constant 0 : index
    %395 = vector.load %arg9[%c0_96, %c0_97] : memref<64x64xf32, #tpu.memory_space<vmem>>, vector<64x64xf32>
    %c1_98 = arith.constant 1 : index
    %c0_99 = arith.constant 0 : index
    %c0_100 = arith.constant 0 : index
    %396 = vector.load %arg4[%c1_98, %c0_99, %c0_100] : memref<2x64x128xf32, #tpu.memory_space<vmem>>, vector<1x64x128xf32>
    %397 = vector.shape_cast %396 : vector<1x64x128xf32> to vector<64x128xf32>
    %cst_101 = arith.constant dense<0.000000e+00> : vector<64x128xf32>
    %398 = tpu.matmul %395, %397, %cst_101 {dimension_numbers = #tpu.dot_dimension_numbers<[1], [0], [0], [1], [0, 0, 1, 1], [], []>} : vector<64x64xf32>, vector<64x128xf32>, vector<64x128xf32> -> vector<64x128xf32>
    %c1_102 = arith.constant 1 : index
    %c0_103 = arith.constant 0 : index
    %c0_104 = arith.constant 0 : index
    %399 = vector.load %arg5[%c1_102, %c0_103, %c0_104] : memref<2x1x128xf32, #tpu.memory_space<vmem>>, vector<1x1x128xf32>
    %400 = vector.shape_cast %399 : vector<1x1x128xf32> to vector<1x128xf32>
    %401 = vector.broadcast %400 : vector<1x128xf32> to vector<64x128xf32>
    %402 = arith.addf %398, %401 : vector<64x128xf32>
    %c0_105 = arith.constant 0 : index
    %c0_106 = arith.constant 0 : index
    %403 = vector.load %arg6[%c0_105, %c0_106] : memref<64x128xf32, #tpu.memory_space<vmem>>, vector<64x128xf32>
    tpu.vector_store %arg6[%c0_105, %c0_106], %402 {strides = array<i32>} : memref<64x128xf32, #tpu.memory_space<vmem>>, vector<64x128xf32>,
    return
  }
}

</mosaic_0001>

<bundles_post_ra>
// kernel: _lambda_.1
= control target key start
LH: loop header
LB: loop body
LE: loop exit
PB: predicated region body
PF: predicated region fallthrough
CT: control target
= control target key end

     0   :  { %13 = vsyncpa [#allocation5], 0  ;;  %s3358_s0 = inlined_call_operand.vmem [shape: f32[64,128], index: 0, kind: input, shape index: {}]   ;;  %s3359_s1 = inlined_call_operand.hbm [shape: f32[2,128,256], index: 1, kind: input, shape index: {}]   ;;  %s3360_s2 = inlined_call_operand.hbm [shape: f32[2,64,256], index: 2, kind: input, shape index: {}]   ;;  %s3361_s3 = inlined_call_operand.vmem [shape: f32[2,1,256], index: 3, kind: input, shape index: {}]   ;;  %s3362_s4 = inlined_call_operand.hbm [shape: f32[2,64,128], index: 4, kind: input, shape index: {}]   ;;  %s3363_s5 = inlined_call_operand.vmem [shape: f32[2,1,128], index: 5, kind: input, shape index: {}]   ;;  %s3364_s6 = inlined_call_operand.vmem [shape: f32[64,128], index: 6, kind: output, shape index: {0}]   ;;  %s3365_s7 = inlined_call_operand.vmem [shape: f32[8,128], index: 7, kind: output, shape index: {1}]  }
   0x1   :  { %14 = vsyncpa [#allocation7], 0  ;;  %s34_s26 = sshll.u32 %s3360_s2, 4  ;;  %s2618_s27 = smov [#allocation6]   ;;  %s35_s26 = int_to_ptr.hbm [resolvable:$true] %s34_s26 }
   0x2   :  { %s36_s28 = sshll.u32 %s2618_s27, 4  ;;  %s21_s8 = sshll.u32 %s3359_s1, 4  ;;  %s37_s28 = int_to_ptr.vmem [resolvable:$true] %s36_s28  ;;  %s22_s8 = int_to_ptr.hbm [resolvable:$true] %s21_s8 }
   0x3   :  { %s2619_s9 = smov 256   ;;  %s2620_s10 = smov 16  }
   0x4   :  { %42 = dma.hbm_to_vmem [thread:$0]  %s35_s26, 4096, %s37_s28, [#allocation7], %s2619_s9, %s2619_s9, %s2620_s10  }
   0x5   :  { %s2621_s11 = smov [#allocation4]   ;;  %s49_s15 = sshll.u32 %s3362_s4, 4  ;;  %s50_s15 = int_to_ptr.hbm [resolvable:$true] %s49_s15 }
   0x6   :  { %s23_s12 = sshll.u32 %s2621_s11, 4  ;;  %s2622_s2 = smov [#allocation8]   ;;  %s24_s12 = int_to_ptr.vmem [resolvable:$true] %s23_s12 }
   0x7   :  { %29 = dma.hbm_to_vmem [thread:$0]  %s22_s8, 8192, %s24_s12, [#allocation5], %s2619_s9, %s2619_s9, %s2620_s10  }
   0x8   :  { %s51_s16 = sshll.u32 %s2622_s2, 4  ;;  %s2623_s17 = smov 128   ;;  %s52_s16 = int_to_ptr.vmem [resolvable:$true] %s51_s16 }
   0x9   :  { %s2624_s18 = smov 8  }
   0xa   :  { %57 = dma.hbm_to_vmem [thread:$0]  %s50_s15, 2048, %s52_s16, [#allocation7], %s2623_s17, %s2623_s17, %s2624_s18  }
   0xb   :  { %2614 = dma.done.wait [#allocation5], 8192  }
   0xc   :  { %2615 = vsyncadd [#allocation5], 4294959104 }
   0xd   :  { %2616 = dma.done.wait [#allocation7], 6144  }
   0xe   :  { %2617 = vsyncadd [#allocation7], 4294961152  ;;  %v102_v0 = vld [vmem:[#allocation4 + $0xf0] sm:$0xff]  ;;  %v100_v1 = vld [vmem:[#allocation4 + $0xe0] sm:$0xff]  ;;  %v2625_v20 = vmov 0.0   ;;  %s2626_s11 = smov 64  }
   0xf   :  { %129 = vmatpush.msra.mxu0 %v102_v0  ;;  %v2676_v2 = vld [vmem:[#allocation6 + $0x70] sm:$0xff]  ;;  %v2679_v4 = vld [vmem:[#allocation6 + $0x60] sm:$0xff]  ;;  %v2690_v11 = vld [vmem:[#allocation6 + $0x78] sm:$0xff]  ;;  %vm232_vm9 = vcmask 523264  }
  0x10   :  { %v98_v3 = vld [vmem:[#allocation4 + $0xd0] sm:$0xff]  ;;  %244 = vmatpush.msra.mxu2 %v2676_v2  ;;  %v96_v6 = vld [vmem:[#allocation4 + $0xc0] sm:$0xff]  ;;  %570 = vmatpush.msra.mxu3 %v2690_v11  ;;  %v2696_v14 = vld [vmem:[#allocation6 + $0x68] sm:$0xff] }
  0x11   :  { %130 = vmatpush.msra.mxu0 %v100_v1  ;;  %v2681_v5 = vld [vmem:[#allocation6 + $0x50] sm:$0xff]  ;;  %v2684_v7 = vld [vmem:[#allocation6 + $0x40] sm:$0xff]  ;;  %v2707_v21 = vld [vmem:[#allocation6 + $0x58] sm:$0xff] }
  0x12   :  { %245 = vmatpush.msra.mxu2 %v2679_v4  ;;  %v94_v8 = vld [vmem:[#allocation4 + $0xb0] sm:$0xff]  ;;  %v92_v10 = vld [vmem:[#allocation4 + $0xa0] sm:$0xff]  ;;  %571 = vmatpush.msra.mxu3 %v2696_v14  ;;  %v2713_v26 = vld [vmem:[#allocation6 + $0x48] sm:$0xff] }
  0x13   :  { %131 = vmatpush.msra.mxu0 %v98_v3  ;;  %v2687_v9 = vld [vmem:[#allocation6 + $0x30] sm:$0xff]  ;;  %v2692_v12 = vld [vmem:[#allocation6 + $0x20] sm:$0xff]  ;;  %v103_v30 = vld [vmem:[#allocation4 + $0xf8] sm:$0xff] }
  0x14   :  { %246 = vmatpush.msra.mxu2 %v2681_v5  ;;  %v90_v13 = vld [vmem:[#allocation4 + $0x90] sm:$0xff]  ;;  %v88_v16 = vld [vmem:[#allocation4 + $0x80] sm:$0xff]  ;;  %572 = vmatpush.msra.mxu3 %v2707_v21  ;;  %v101_v31 = vld [vmem:[#allocation4 + $0xe8] sm:$0xff] }
  0x15   :  { %132 = vmatpush.msra.mxu0 %v96_v6  ;;  %v2698_v15 = vld [vmem:[#allocation6 + $0x10] sm:$0xff]  ;;  %v2702_v17 = vld [vmem:[#allocation6] sm:$0xff]  ;;  %v2728_v32 = vld [vmem:[#allocation6 + $0x38] sm:$0xff]  ;;  %170 = vmatpush.msra.mxu1 %v103_v30 }
  0x16   :  { %247 = vmatpush.msra.mxu2 %v2684_v7  ;;  %v86_v18 = vld [vmem:[#allocation4 + $0x70] sm:$0xff]  ;;  %v84_v19 = vld [vmem:[#allocation4 + $0x60] sm:$0xff]  ;;  %573 = vmatpush.msra.mxu3 %v2713_v26  ;;  %v99_v33 = vld [vmem:[#allocation4 + $0xd8] sm:$0xff] }
  0x17   :  { %133 = vmatpush.msra.mxu0 %v94_v8  ;;  %v82_v22 = vld [vmem:[#allocation4 + $0x50] sm:$0xff]  ;;  %v80_v23 = vld [vmem:[#allocation4 + $0x40] sm:$0xff]  ;;  %171 = vmatpush.msra.mxu1 %v101_v31  ;;  %v2737_v34 = vld [vmem:[%s3358_s0 + $0x8] sm:$0xff] }
  0x18   :  { %248 = vmatpush.msra.mxu2 %v2687_v9  ;;  %v78_v24 = vld [vmem:[#allocation4 + $0x30] sm:$0xff]  ;;  %v76_v25 = vld [vmem:[#allocation4 + $0x20] sm:$0xff]  ;;  %574 = vmatpush.msra.mxu3 %v2728_v32  ;;  %v2743_v35 = vld [vmem:[#allocation6 + $0x28] sm:$0xff] }
  0x19   :  { %134 = vmatpush.msra.mxu0 %v92_v10  ;;  %v74_v27 = vld [vmem:[#allocation4 + $0x10] sm:$0xff]  ;;  %v72_v28 = vld [vmem:[#allocation4] sm:$0xff]  ;;  %172 = vmatpush.msra.mxu1 %v99_v33  ;;  %v97_v36 = vld [vmem:[#allocation4 + $0xc8] sm:$0xff] }
  0x1a   :  { %249 = vmatpush.msra.mxu2 %v2692_v12  ;;  %v2722_v29 = vld [vmem:[%s3358_s0] sm:$0xff]  ;;  %v95_v37 = vld [vmem:[#allocation4 + $0xb8] sm:$0xff]  ;;  %v93_v38 = vld [vmem:[#allocation4 + $0xa8] sm:$0xff]  ;;  %575 = vmatpush.msra.mxu3 %v2743_v35 }
  0x1b   :  { %135 = vmatpush.msra.mxu0 %v90_v13  ;;  %173 = vmatpush.msra.mxu1 %v97_v36  ;;  %v91_v39 = vld [vmem:[#allocation4 + $0x98] sm:$0xff]  ;;  %v2754_v40 = vld [vmem:[%s3358_s0 + $0x10] sm:$0xff]  ;;  %v89_v42 = vld [vmem:[#allocation4 + $0x88] sm:$0xff] }
  0x1c   :  { %250 = vmatpush.msra.mxu2 %v2698_v15  ;;  %v2758_v41 = vld [vmem:[#allocation6 + $0x18] sm:$0xff]  ;;  %v85_v44 = vld [vmem:[#allocation4 + $0x68] sm:$0xff]  ;;  %v125_v52 = vld [vmem:[%s3358_s0 + $0x20] sm:$0xff] }
  0x1d   :  { %136 = vmatpush.msra.mxu0 %v88_v16  ;;  %174 = vmatpush.msra.mxu1 %v95_v37  ;;  %v87_v43 = vld [vmem:[#allocation4 + $0x78] sm:$0xff]  ;;  %v2766_v47 = vld [vmem:[#allocation6 + $0x8] sm:$0xff]  ;;  %v127_v55 = vld [vmem:[%s3358_s0 + $0x30] sm:$0xff] }
  0x1e   :  { %251 = vmatpush.msra.mxu2 %v2702_v17  ;;  %576 = vmatpush.msra.mxu3 %v2758_v41  ;;  %v83_v45 = vld [vmem:[#allocation4 + $0x58] sm:$0xff]  ;;  %v81_v48 = vld [vmem:[#allocation4 + $0x48] sm:$0xff]  ;;  %v120_v59 = vld [vmem:[%s3361_s3] sm:$0x3] }
  0x1f   :  { %137 = vmatpush.msra.mxu0 %v86_v18  ;;  %252 = vmatmul.f32.vlgmr.msra.gmra.mxu2 %v2625_v20  ;;  %v124_v46 = vld [vmem:[%s3358_s0 + $0x18] sm:$0xff]  ;;  %v77_v50 = vld [vmem:[#allocation4 + $0x28] sm:$0xff]  ;;  %v2833_v61 = vperm.slane %v120_v59, 0 }
  0x20   :  { %352 = vmatpush.msrb.mxu2 %v2676_v2  ;;  %175 = vmatpush.msra.mxu1 %v93_v38  ;;  %v79_v49 = vld [vmem:[#allocation4 + $0x38] sm:$0xff]  ;;  %v73_v53 = vld [vmem:[#allocation4 + $0x8] sm:$0xff] }
  0x21   :  { %138 = vmatpush.msra.mxu0 %v84_v19  ;;  %577 = vmatpush.msra.mxu3 %v2766_v47  ;;  %v75_v51 = vld [vmem:[#allocation4 + $0x18] sm:$0xff]  ;;  %v126_v54 = vld [vmem:[%s3358_s0 + $0x28] sm:$0xff] }
  0x22   :  { %353 = vmatpush.msrb.mxu2 %v2679_v4  ;;  %176 = vmatpush.msra.mxu1 %v91_v39  ;;  %v128_v56 = vld [vmem:[%s3358_s0 + $0x38] sm:$0xff] }
  0x23   :  { %139 = vmatpush.msra.mxu0 %v82_v22  ;;  %667 = vmatpush.msrb.mxu3 %v2690_v11 }
  0x24   :  { %354 = vmatpush.msrb.mxu2 %v2681_v5  ;;  %177 = vmatpush.msra.mxu1 %v89_v42 }
  0x25   :  { %140 = vmatpush.msra.mxu0 %v80_v23  ;;  %668 = vmatpush.msrb.mxu3 %v2696_v14 }
  0x26   :  { %355 = vmatpush.msrb.mxu2 %v2684_v7  ;;  %178 = vmatpush.msra.mxu1 %v87_v43 }
  0x27   :  { %141 = vmatpush.msra.mxu0 %v78_v24  ;;  %669 = vmatpush.msrb.mxu3 %v2707_v21  ;;  %v2846_v24 = vperm.slane %v120_v59, 1 }
  0x28   :  { %356 = vmatpush.msrb.mxu2 %v2687_v9  ;;  %179 = vmatpush.msra.mxu1 %v85_v44 }
  0x29   :  { %142 = vmatpush.msra.mxu0 %v76_v25  ;;  %670 = vmatpush.msrb.mxu3 %v2713_v26 }
  0x2a   :  { %357 = vmatpush.msrb.mxu2 %v2692_v12  ;;  %180 = vmatpush.msra.mxu1 %v83_v45 }
  0x2b   :  { %143 = vmatpush.msra.mxu0 %v74_v27  ;;  %671 = vmatpush.msrb.mxu3 %v2728_v32 }
  0x2c   :  { %358 = vmatpush.msrb.mxu2 %v2698_v15  ;;  %181 = vmatpush.msra.mxu1 %v81_v48 }
  0x2d   :  { %144 = vmatpush.msra.mxu0 %v72_v28  ;;  %672 = vmatpush.msrb.mxu3 %v2743_v35 }
  0x2e   :  { %145 = vmatmul.f32.vlgmr.msra.gmra.mxu0 %v2722_v29  ;;  %359 = vmatpush.msrb.mxu2 %v2702_v17 }
  0x2f   :  { %264 = vmatpush.msrb.mxu0 %v2690_v11  ;;  %182 = vmatpush.msra.mxu1 %v79_v49 }
  0x30   :  { %453 = vmatpush.msra.mxu2 %v2676_v2  ;;  %673 = vmatpush.msrb.mxu3 %v2758_v41 }
  0x31   :  { %265 = vmatpush.msrb.mxu0 %v2696_v14  ;;  %183 = vmatpush.msra.mxu1 %v77_v50 }
  0x32   :  { %454 = vmatpush.msra.mxu2 %v2679_v4  ;;  %674 = vmatpush.msrb.mxu3 %v2766_v47 }
  0x33   :  { %266 = vmatpush.msrb.mxu0 %v2707_v21  ;;  %184 = vmatpush.msra.mxu1 %v75_v51 }
  0x34   :  { %455 = vmatpush.msra.mxu2 %v2681_v5 }
  0x35   :  { %267 = vmatpush.msrb.mxu0 %v2713_v26  ;;  %185 = vmatpush.msra.mxu1 %v73_v53 }
  0x36   :  { %148 = vmatmul.f32.gmra.mxu0 %v2737_v34  ;;  %456 = vmatpush.msra.mxu2 %v2684_v7 }
  0x37   :  { %268 = vmatpush.msrb.mxu0 %v2728_v32  ;;  %186 = vmatmul.f32.vlgmr.msra.gmra.mxu1 %v2722_v29 }
  0x38   :  { %457 = vmatpush.msra.mxu2 %v2687_v9  ;;  %372 = vmatpush.msrb.mxu1 %v2690_v11 }
  0x39   :  { %269 = vmatpush.msrb.mxu0 %v2743_v35 }
  0x3a   :  { %458 = vmatpush.msra.mxu2 %v2692_v12  ;;  %373 = vmatpush.msrb.mxu1 %v2696_v14 }
  0x3b   :  { %270 = vmatpush.msrb.mxu0 %v2758_v41 }
  0x3c   :  { %459 = vmatpush.msra.mxu2 %v2698_v15  ;;  %374 = vmatpush.msrb.mxu1 %v2707_v21 }
  0x3d   :  { %271 = vmatpush.msrb.mxu0 %v2766_v47 }
  0x3e   :  { %151 = vmatmul.f32.gmra.mxu0 %v2754_v40  ;;  %460 = vmatpush.msra.mxu2 %v2702_v17 }
  0x3f   :  { %744 = vmatpush.msra.mxu0 %v2676_v2  ;;  %375 = vmatpush.msrb.mxu1 %v2713_v26 }
  0x40   :  { %189 = vmatmul.f32.gmra.mxu1 %v2737_v34 }
  0x41   :  { %745 = vmatpush.msra.mxu0 %v2679_v4  ;;  %376 = vmatpush.msrb.mxu1 %v2728_v32 }
  0x43   :  { %746 = vmatpush.msra.mxu0 %v2681_v5  ;;  %377 = vmatpush.msrb.mxu1 %v2743_v35 }
  0x45   :  { %747 = vmatpush.msra.mxu0 %v2684_v7  ;;  %378 = vmatpush.msrb.mxu1 %v2758_v41 }
  0x46   :  { %154 = vmatmul.f32.gmra.mxu0 %v124_v46 }
  0x47   :  { %748 = vmatpush.msra.mxu0 %v2687_v9  ;;  %379 = vmatpush.msrb.mxu1 %v2766_v47 }
  0x48   :  { %192 = vmatmul.f32.gmra.mxu1 %v2754_v40 }
  0x49   :  { %749 = vmatpush.msra.mxu0 %v2692_v12  ;;  %764 = vmatpush.msra.mxu1 %v2690_v11 }
  0x4b   :  { %750 = vmatpush.msra.mxu0 %v2698_v15  ;;  %765 = vmatpush.msra.mxu1 %v2696_v14 }
  0x4d   :  { %751 = vmatpush.msra.mxu0 %v2702_v17  ;;  %766 = vmatpush.msra.mxu1 %v2707_v21 }
  0x4e   :  { %157 = vmatmul.f32.gmra.mxu0 %v125_v52 }
  0x4f   :  { %767 = vmatpush.msra.mxu1 %v2713_v26 }
  0x50   :  { %195 = vmatmul.f32.gmra.mxu1 %v124_v46 }
  0x51   :  { %768 = vmatpush.msra.mxu1 %v2728_v32 }
  0x53   :  { %769 = vmatpush.msra.mxu1 %v2743_v35 }
  0x55   :  { %770 = vmatpush.msra.mxu1 %v2758_v41 }
  0x56   :  { %160 = vmatmul.f32.gmra.mxu0 %v126_v54 }
  0x57   :  { %771 = vmatpush.msra.mxu1 %v2766_v47 }
  0x58   :  { %198 = vmatmul.f32.gmra.mxu1 %v125_v52 }
  0x5e   :  { %163 = vmatmul.f32.gmra.mxu0 %v127_v55 }
  0x60   :  { %201 = vmatmul.f32.gmra.mxu1 %v126_v54 }
  0x66   :  { %166 = vmatmul.f32.gmra.mxu0 %v128_v56 }
  0x68   :  { %204 = vmatmul.f32.gmra.mxu1 %v127_v55 }
  0x6e   :  { %272 = vmatmul.f32.vlgmr.msrb.gmra.mxu0 %v2625_v20 }
  0x6f   :  { %938 = vmatpush.msrb.mxu0 %v2676_v2 }
  0x70   :  { %207 = vmatmul.f32.gmra.mxu1 %v128_v56 }
  0x71   :  { %939 = vmatpush.msrb.mxu0 %v2679_v4 }
  0x73   :  { %940 = vmatpush.msrb.mxu0 %v2681_v5 }
  0x75   :  { %941 = vmatpush.msrb.mxu0 %v2684_v7 }
  0x77   :  { %942 = vmatpush.msrb.mxu0 %v2687_v9 }
  0x79   :  { %943 = vmatpush.msrb.mxu0 %v2692_v12 }
  0x7b   :  { %944 = vmatpush.msrb.mxu0 %v2698_v15 }
  0x7d   :  { %945 = vmatpush.msrb.mxu0 %v2702_v17 }
  0xa2   :  { %v253_v62 = vpop.f32.mrf.mxu2 }
  0xa3   :  { %v254_v63 = vadd.f32 %v253_v62, %v2833_v61 }
  0xab   :  { %v146_v57 = vpop.f32.mrf.mxu0 }
  0xac   :  { %v278_v1 = vadd.f32 %v254_v63, %v146_v57 }
  0xae   :  { %v2236_v3 = vmul.f32 -1.442695, %v278_v1  ;;  %v328_v1 = vlaneseq }
  0xb0   :  { %2326 = vpow2.f32 %v2236_v3  ;;  %v2852_v3 = vand.u32 127, %v328_v1 }
  0xb2   :  { %vm330_vm8 = vcmp.lt.s32.totalorder %v2852_v3, 32 }
  0xb3   :  { %v2826_v58 = vpop.f32.mrf.mxu0 }
  0xb4   :  { %v187_v27 = vpop.f32.mrf.mxu1 }
  0xb6   :  { %v2327_v8 = vpop.eup %2326 }
  0xb7   :  { %v286_v13 = vadd.f32 1.0, %v2327_v8 }
  0xb9   :  { %2328 = vrcp.f32 %v286_v13  ;;  %v299_v33 = vand.u32 2147483648, %v286_v13  ;;  %vm293_vm1 = vweird.f32 %v286_v13  ;;  %v297_v34 = vand.u32 2147483647, %v286_v13 }
  0xbb   :  { %v2831_v60 = vpop.f32.mrf.mxu0  ;;  %v300_v37 = vor.u32 1.1754944e-38, %v299_v33  ;;  %vm298_vm3 = vcmp.eq.f32.partialorder %v297_v34, 8.507059e+37 }
  0xbf   :  { %v2329_v18 = vpop.eup %2328 }
  0xc0   :  { %v289_v22 = vmul.f32 %v2329_v18, %v286_v13  ;;  %vm294_vm0 = vweird.f32 %v2329_v18 }
  0xc1   :  { %vm295_vm2 = vmor %vm293_vm1, %vm294_vm0 }
  0xc2   :  { %v290_v23 = vsub.f32 1.0, %v289_v22 }
  0xc3   :  { %v2836_v0 = vpop.f32.mrf.mxu0 }
  0xc4   :  { %v291_v28 = vmul.f32 %v2329_v18, %v290_v23  ;;  %v190_v23 = vpop.f32.mrf.mxu1 }
  0xc6   :  { %v292_v31 = vadd.f32 %v2329_v18, %v291_v28 }
  0xc8   :  { %v296_v36 = vsel %vm295_vm2, %v2329_v18, %v292_v31 }
  0xc9   :  { %v301_v39 = vsel %vm298_vm3, %v300_v37, %v296_v36 }
  0xca   :  { %v319_v50 = vmul.f32 0.0, %v301_v39 }
  0xcb   :  { %v2838_v6 = vpop.f32.mrf.mxu0 }
  0xd3   :  { %v2840_v10 = vpop.f32.mrf.mxu0 }
  0xdb   :  { %v2842_v16 = vpop.f32.mrf.mxu0 }
  0xe3   :  { %v2844_v19 = vpop.f32.mrf.mxu0 }
  0xeb   :  { %v273_v25 = vpop.f32.mrf.mxu0 }
  0xec   :  { %v274_v29 = vadd.f32 %v273_v25, %v2846_v24  ;;  %v2878_v25 = vpop.f32.mrf.mxu1 }
  0xee   :  { %v279_v30 = vadd.f32 %v274_v29, %v187_v27 }
  0xf0   :  { %2330 = vtanh.f32 %v279_v30  ;;  %v2237_v42 = vmul.f32 -1.442695, %v279_v30 }
  0xf2   :  { %2332 = vpow2.f32 %v2237_v42 }
  0xf4   :  { %v2880_v27 = vpop.f32.mrf.mxu1 }
  0xf6   :  { %v2331_v38 = vpop.eup %2330 }
  0xf7   :  { %v320_v40 = vmul.f32 %v2331_v38, %v301_v39 }
  0xf8   :  { %v2333_v43 = vpop.eup %2332 }
  0xf9   :  { %322 = vrot.lane.b32.xlu0 %v320_v40, %s2626_s11  ;;  %v287_v44 = vadd.f32 1.0, %v2333_v43 }
  0xfb   :  { %2334 = vrcp.f32 %v287_v44  ;;  %v314_v54 = vand.u32 2147483648, %v287_v44  ;;  %vm308_vm5 = vweird.f32 %v287_v44  ;;  %v312_v55 = vand.u32 2147483647, %v287_v44 }
  0xfc   :  { %v2882_v28 = vpop.f32.mrf.mxu1 }
  0xfd   :  { %v315_v57 = vor.u32 1.1754944e-38, %v314_v54  ;;  %vm313_vm7 = vcmp.eq.f32.partialorder %v312_v55, 8.507059e+37 }
 0x101   :  { %v2335_v45 = vpop.eup %2334 }
 0x102   :  { %v304_v46 = vmul.f32 %v2335_v45, %v287_v44  ;;  %vm309_vm4 = vweird.f32 %v2335_v45 }
 0x103   :  { %vm310_vm6 = vmor %vm308_vm5, %vm309_vm4 }
 0x104   :  { %v305_v48 = vsub.f32 1.0, %v304_v46  ;;  %v2884_v29 = vpop.f32.mrf.mxu1 }
 0x106   :  { %v306_v49 = vmul.f32 %v2335_v45, %v305_v48 }
 0x108   :  { %v307_v53 = vadd.f32 %v2335_v45, %v306_v49 }
 0x10a   :  { %v311_v56 = vsel %vm310_vm6, %v2335_v45, %v307_v53 }
 0x10b   :  { %v316_v62 = vsel %vm313_vm7, %v315_v57, %v311_v56 }
 0x10c   :  { %v2886_v30 = vpop.f32.mrf.mxu1 }
 0x114   :  { %v2890_v36 = vpop.f32.mrf.mxu1 }
 0x16b   :  { %v323_v51 = vpop.permute.xlu0 %322 }
 0x16c   :  { %v325_v52 = vadd.f32 %v323_v51, %v319_v50 }
 0x16e   :  { %2336 = vtanh.f32 %v325_v52  ;;  %337 = vrot.lane.b32.xlu1 %v325_v52, %s2626_s11 }
 0x174   :  { %v2337_v59 = vpop.eup %2336 }
 0x175   :  { %v327_v63 = vmul.f32 %v2337_v59, %v316_v62 }
 0x177   :  { %332 = vrot.lane.b32.xlu0 %v327_v63, %s2626_s11 }
 0x1e0   :  { %v338_v8 = vpop.permute.xlu1 %337 }
 0x1e1   :  { %v340_v13 = vsel %vm330_vm8, %v338_v8, 0.0 }
 0x1e2   :  { %428 = vrot.lane.b32.xlu1 %v340_v13, %s2626_s11 }
 0x1e9   :  { %v333_v18 = vpop.permute.xlu0 %332 }
 0x1ea   :  { %v335_v22 = vsel %vm330_vm8, %v333_v18, 0.0 }
 0x1eb   :  { %2238 = vmatmul.msk.f32.vlgmr.msrb.gmra.mxu2 %vm232_vm9, %v335_v22  ;;  %2239 = vmatmul.msk.f32.vlgmr.msrb.gmra.mxu1 %vm232_vm9, %v335_v22 }
 0x1ec   :  { %473 = vmatpush.msrb.mxu2 %v2690_v11  ;;  %958 = vmatpush.msrb.mxu1 %v2690_v11 }
 0x1ee   :  { %474 = vmatpush.msrb.mxu2 %v2696_v14  ;;  %959 = vmatpush.msrb.mxu1 %v2696_v14 }
 0x1f0   :  { %475 = vmatpush.msrb.mxu2 %v2707_v21  ;;  %960 = vmatpush.msrb.mxu1 %v2707_v21 }
 0x1f2   :  { %476 = vmatpush.msrb.mxu2 %v2713_v26  ;;  %961 = vmatpush.msrb.mxu1 %v2713_v26 }
 0x1f4   :  { %477 = vmatpush.msrb.mxu2 %v2728_v32  ;;  %962 = vmatpush.msrb.mxu1 %v2728_v32 }
 0x1f6   :  { %478 = vmatpush.msrb.mxu2 %v2743_v35  ;;  %963 = vmatpush.msrb.mxu1 %v2743_v35 }
 0x1f8   :  { %479 = vmatpush.msrb.mxu2 %v2758_v41  ;;  %964 = vmatpush.msrb.mxu1 %v2758_v41 }
 0x1fa   :  { %480 = vmatpush.msrb.mxu2 %v2766_v47  ;;  %965 = vmatpush.msrb.mxu1 %v2766_v47 }
 0x254   :  { %v429_v8 = vpop.permute.xlu1 %428 }
 0x268   :  { %v381_v40 = vpop.f32.mrf.mxu1 }
 0x269   :  { %v382_v42 = vadd.f32 %v381_v40, %v2846_v24 }
 0x26b   :  { %v387_v44 = vadd.f32 %v382_v42, %v190_v23 }
 0x26d   :  { %v2241_v56 = vmul.f32 -1.442695, %v387_v44 }
 0x26e   :  { %v361_v31 = vpop.f32.mrf.mxu2 }
 0x26f   :  { %v362_v33 = vadd.f32 %v361_v31, %v2833_v61 }
 0x271   :  { %v386_v34 = vadd.f32 %v362_v33, %v2826_v58 }
 0x273   :  { %v2240_v37 = vmul.f32 -1.442695, %v386_v34 }
 0x275   :  { %2338 = vpow2.f32 %v2240_v37 }
 0x27b   :  { %v2339_v38 = vpop.eup %2338 }
 0x27c   :  { %v394_v39 = vadd.f32 1.0, %v2339_v38 }
 0x27e   :  { %2340 = vrcp.f32 %v394_v39  ;;  %v407_v48 = vand.u32 2147483648, %v394_v39  ;;  %v405_v50 = vand.u32 2147483647, %v394_v39  ;;  %vm401_vm11 = vweird.f32 %v394_v39 }
 0x27f   :  { %2342 = vtanh.f32 %v387_v44 }
 0x280   :  { %v408_v51 = vor.u32 1.1754944e-38, %v407_v48  ;;  %vm406_vm13 = vcmp.eq.f32.partialorder %v405_v50, 8.507059e+37  ;;  %2344 = vpow2.f32 %v2241_v56 }
 0x284   :  { %v2341_v43 = vpop.eup %2340 }
 0x285   :  { %v397_v45 = vmul.f32 %v2341_v43, %v394_v39  ;;  %vm402_vm10 = vweird.f32 %v2341_v43  ;;  %v2343_v53 = vpop.eup %2342 }
 0x286   :  { %vm403_vm12 = vmor %vm401_vm11, %vm402_vm10  ;;  %v2345_v57 = vpop.eup %2344 }
 0x287   :  { %v398_v46 = vsub.f32 1.0, %v397_v45  ;;  %v395_v59 = vadd.f32 1.0, %v2345_v57 }
 0x289   :  { %v399_v49 = vmul.f32 %v2341_v43, %v398_v46  ;;  %2346 = vrcp.f32 %v395_v59  ;;  %v422_v33 = vand.u32 2147483648, %v395_v59  ;;  %vm416_vm15 = vweird.f32 %v395_v59 }
 0x28a   :  { %v420_v34 = vand.u32 2147483647, %v395_v59 }
 0x28b   :  { %v400_v58 = vadd.f32 %v2341_v43, %v399_v49  ;;  %v423_v38 = vor.u32 1.1754944e-38, %v422_v33 }
 0x28c   :  { %vm421_vm1 = vcmp.eq.f32.partialorder %v420_v34, 8.507059e+37 }
 0x28d   :  { %v404_v52 = vsel %vm403_vm12, %v2341_v43, %v400_v58 }
 0x28e   :  { %v409_v54 = vsel %vm406_vm13, %v408_v51, %v404_v52 }
 0x28f   :  { %v432_v55 = vmul.f32 %v2343_v53, %v409_v54  ;;  %v2347_v62 = vpop.eup %2346  ;;  %v431_v18 = vmul.f32 %v429_v8, %v409_v54 }
 0x290   :  { %v412_v63 = vmul.f32 %v2347_v62, %v395_v59  ;;  %vm417_vm14 = vweird.f32 %v2347_v62 }
 0x291   :  { %434 = vrot.lane.b32.xlu2 %v432_v55, %s2626_s11  ;;  %vm418_vm0 = vmor %vm416_vm15, %vm417_vm14 }
 0x292   :  { %v413_v1 = vsub.f32 1.0, %v412_v63 }
 0x294   :  { %v414_v13 = vmul.f32 %v2347_v62, %v413_v1 }
 0x296   :  { %v415_v31 = vadd.f32 %v2347_v62, %v414_v13 }
 0x298   :  { %v419_v37 = vsel %vm418_vm0, %v2347_v62, %v415_v31 }
 0x299   :  { %v424_v40 = vsel %vm421_vm1, %v423_v38, %v419_v37 }
 0x2eb   :  { %v435_v22 = vpop.permute.xlu2 %434 }
 0x2ec   :  { %v2894_v23 = vadd.f32 %v435_v22, %v431_v18 }
 0x2ee   :  { %2348 = vtanh.f32 %v2894_v23 }
 0x2f4   :  { %v2349_v39 = vpop.eup %2348 }
 0x2f5   :  { %v439_v42 = vmul.f32 %v2349_v39, %v424_v40 }
 0x2f7   :  { %441 = vrot.lane.b32.xlu2 %v439_v42, %s2626_s11 }
 0x351   :  { %v442_v43 = vpop.permute.xlu2 %441 }
 0x352   :  { %2242 = vmatmul.msk.f32.vlgmr.msra.gmra.mxu2 %vm232_vm9, %v442_v43 }
 0x353   :  { %550 = vmatpush.msra.mxu2 %v2676_v2 }
 0x355   :  { %551 = vmatpush.msra.mxu2 %v2679_v4 }
 0x357   :  { %552 = vmatpush.msra.mxu2 %v2681_v5 }
 0x359   :  { %553 = vmatpush.msra.mxu2 %v2684_v7 }
 0x35a   :  { %2243 = vmatmul.msk.f32.vlgmr.msrb.gmra.mxu2 %vm232_vm9, %v442_v43 }
 0x35b   :  { %554 = vmatpush.msra.mxu2 %v2687_v9 }
 0x35d   :  { %555 = vmatpush.msra.mxu2 %v2692_v12 }
 0x35f   :  { %556 = vmatpush.msra.mxu2 %v2698_v15 }
 0x361   :  { %557 = vmatpush.msra.mxu2 %v2702_v17 }
 0x363   :  { %647 = vmatpush.msrb.mxu2 %v2676_v2 }
 0x365   :  { %648 = vmatpush.msrb.mxu2 %v2679_v4 }
 0x367   :  { %649 = vmatpush.msrb.mxu2 %v2681_v5 }
 0x369   :  { %650 = vmatpush.msrb.mxu2 %v2684_v7 }
 0x36b   :  { %651 = vmatpush.msrb.mxu2 %v2687_v9 }
 0x36d   :  { %652 = vmatpush.msrb.mxu2 %v2692_v12 }
 0x36f   :  { %653 = vmatpush.msrb.mxu2 %v2698_v15 }
 0x371   :  { %654 = vmatpush.msrb.mxu2 %v2702_v17 }
 0x3d5   :  { %v462_v44 = vpop.f32.mrf.mxu2 }
 0x3d6   :  { %v463_v45 = vadd.f32 %v462_v44, %v2833_v61 }
 0x3d8   :  { %v487_v46 = vadd.f32 %v463_v45, %v2831_v60 }
 0x3da   :  { %v2244_v48 = vmul.f32 -1.442695, %v487_v46 }
 0x3dc   :  { %2350 = vpow2.f32 %v2244_v48 }
 0x3dd   :  { %v482_v58 = vpop.f32.mrf.mxu2 }
 0x3de   :  { %v483_v51 = vadd.f32 %v482_v58, %v2846_v24 }
 0x3e0   :  { %v488_v53 = vadd.f32 %v483_v51, %v2878_v25 }
 0x3e2   :  { %v2351_v49 = vpop.eup %2350  ;;  %v2245_v18 = vmul.f32 -1.442695, %v488_v53 }
 0x3e3   :  { %v495_v50 = vadd.f32 1.0, %v2351_v49 }
 0x3e5   :  { %2352 = vrcp.f32 %v495_v50  ;;  %v508_v56 = vand.u32 2147483648, %v495_v50  ;;  %v506_v59 = vand.u32 2147483647, %v495_v50  ;;  %vm502_vm3 = vweird.f32 %v495_v50 }
 0x3e6   :  { %2354 = vtanh.f32 %v488_v53 }
 0x3e7   :  { %v509_v60 = vor.u32 1.1754944e-38, %v508_v56  ;;  %vm507_vm5 = vcmp.eq.f32.partialorder %v506_v59, 8.507059e+37  ;;  %2356 = vpow2.f32 %v2245_v18 }
 0x3eb   :  { %v2353_v52 = vpop.eup %2352 }
 0x3ec   :  { %v498_v54 = vmul.f32 %v2353_v52, %v495_v50  ;;  %vm503_vm2 = vweird.f32 %v2353_v52  ;;  %v2355_v1 = vpop.eup %2354 }
 0x3ed   :  { %vm504_vm4 = vmor %vm502_vm3, %vm503_vm2  ;;  %v2357_v25 = vpop.eup %2356 }
 0x3ee   :  { %v499_v55 = vsub.f32 1.0, %v498_v54  ;;  %v496_v22 = vadd.f32 1.0, %v2357_v25 }
 0x3f0   :  { %v500_v57 = vmul.f32 %v2353_v52, %v499_v55  ;;  %2358 = vrcp.f32 %v496_v22  ;;  %v523_v43 = vand.u32 2147483648, %v496_v22  ;;  %vm517_vm7 = vweird.f32 %v496_v22 }
 0x3f1   :  { %v521_v44 = vand.u32 2147483647, %v496_v22 }
 0x3f2   :  { %v501_v62 = vadd.f32 %v2353_v52, %v500_v57  ;;  %v524_v46 = vor.u32 1.1754944e-38, %v523_v43 }
 0x3f3   :  { %vm522_vm11 = vcmp.eq.f32.partialorder %v521_v44, 8.507059e+37 }
 0x3f4   :  { %v505_v63 = vsel %vm504_vm4, %v2353_v52, %v501_v62 }
 0x3f5   :  { %v510_v8 = vsel %vm507_vm5, %v509_v60, %v505_v63 }
 0x3f6   :  { %v529_v13 = vmul.f32 %v2355_v1, %v510_v8  ;;  %v2359_v31 = vpop.eup %2358  ;;  %v528_v38 = vmul.f32 %v510_v8, %v2894_v23 }
 0x3f7   :  { %v513_v33 = vmul.f32 %v2359_v31, %v496_v22  ;;  %vm518_vm6 = vweird.f32 %v2359_v31 }
 0x3f8   :  { %531 = vrot.lane.b32.xlu0 %v529_v13, %s2626_s11  ;;  %vm519_vm10 = vmor %vm517_vm7, %vm518_vm6 }
 0x3f9   :  { %v514_v34 = vsub.f32 1.0, %v513_v33 }
 0x3fb   :  { %v515_v37 = vmul.f32 %v2359_v31, %v514_v34 }
 0x3fd   :  { %v516_v42 = vadd.f32 %v2359_v31, %v515_v37 }
 0x3ff   :  { %v520_v45 = vsel %vm519_vm10, %v2359_v31, %v516_v42 }
 0x400   :  { %v525_v49 = vsel %vm522_vm11, %v524_v46, %v520_v45 }
 0x46a   :  { %v532_v39 = vpop.permute.xlu0 %531 }
 0x46b   :  { %v2922_v40 = vadd.f32 %v532_v39, %v528_v38 }
 0x46d   :  { %2360 = vtanh.f32 %v2922_v40 }
 0x473   :  { %v2361_v48 = vpop.eup %2360 }
 0x474   :  { %v536_v50 = vmul.f32 %v2361_v48, %v525_v49 }
 0x476   :  { %538 = vrot.lane.b32.xlu1 %v536_v50, %s2626_s11 }
 0x4e8   :  { %v539_v23 = vpop.permute.xlu1 %538 }
 0x4e9   :  { %2246 = vmatmul.msk.f32.vlgmr.msra.gmra.mxu2 %vm232_vm9, %v539_v23  ;;  %2247 = vmatmul.msk.f32.vlgmr.msra.gmra.mxu3 %vm232_vm9, %v539_v23 }
 0x4ea   :  { %841 = vmatpush.msra.mxu2 %v2676_v2  ;;  %861 = vmatpush.msra.mxu3 %v2690_v11 }
 0x4ec   :  { %842 = vmatpush.msra.mxu2 %v2679_v4  ;;  %862 = vmatpush.msra.mxu3 %v2696_v14 }
 0x4ee   :  { %843 = vmatpush.msra.mxu2 %v2681_v5  ;;  %863 = vmatpush.msra.mxu3 %v2707_v21 }
 0x4f0   :  { %844 = vmatpush.msra.mxu2 %v2684_v7  ;;  %864 = vmatpush.msra.mxu3 %v2713_v26 }
 0x4f2   :  { %845 = vmatpush.msra.mxu2 %v2687_v9  ;;  %865 = vmatpush.msra.mxu3 %v2728_v32 }
 0x4f4   :  { %846 = vmatpush.msra.mxu2 %v2692_v12  ;;  %866 = vmatpush.msra.mxu3 %v2743_v35 }
 0x4f6   :  { %847 = vmatpush.msra.mxu2 %v2698_v15  ;;  %867 = vmatpush.msra.mxu3 %v2758_v41 }
 0x4f8   :  { %848 = vmatpush.msra.mxu2 %v2702_v17  ;;  %868 = vmatpush.msra.mxu3 %v2766_v47 }
 0x56c   :  { %v559_v58 = vpop.f32.mrf.mxu2  ;;  %v579_v56 = vpop.f32.mrf.mxu3 }
 0x56d   :  { %v560_v51 = vadd.f32 %v559_v58, %v2833_v61  ;;  %v580_v57 = vadd.f32 %v579_v56, %v2846_v24 }
 0x56f   :  { %v584_v52 = vadd.f32 %v560_v51, %v2836_v0  ;;  %v585_v62 = vadd.f32 %v580_v57, %v2880_v27 }
 0x571   :  { %v2248_v53 = vmul.f32 -1.442695, %v584_v52  ;;  %v2249_v34 = vmul.f32 -1.442695, %v585_v62 }
 0x573   :  { %2362 = vpow2.f32 %v2248_v53 }
 0x579   :  { %v2363_v54 = vpop.eup %2362 }
 0x57a   :  { %v592_v55 = vadd.f32 1.0, %v2363_v54 }
 0x57c   :  { %2364 = vrcp.f32 %v592_v55  ;;  %v605_v1 = vand.u32 2147483648, %v592_v55  ;;  %v603_v13 = vand.u32 2147483647, %v592_v55  ;;  %vm599_vm13 = vweird.f32 %v592_v55 }
 0x57d   :  { %2366 = vtanh.f32 %v585_v62 }
 0x57e   :  { %v606_v0 = vor.u32 1.1754944e-38, %v605_v1  ;;  %vm604_vm15 = vcmp.eq.f32.partialorder %v603_v13, 8.507059e+37  ;;  %2368 = vpow2.f32 %v2249_v34 }
 0x582   :  { %v2365_v59 = vpop.eup %2364 }
 0x583   :  { %v595_v60 = vmul.f32 %v2365_v59, %v592_v55  ;;  %vm600_vm12 = vweird.f32 %v2365_v59  ;;  %v2367_v22 = vpop.eup %2366 }
 0x584   :  { %vm601_vm14 = vmor %vm599_vm13, %vm600_vm12  ;;  %v2369_v27 = vpop.eup %2368 }
 0x585   :  { %v596_v63 = vsub.f32 1.0, %v595_v60  ;;  %v593_v37 = vadd.f32 1.0, %v2369_v27 }
 0x587   :  { %v597_v8 = vmul.f32 %v2365_v59, %v596_v63  ;;  %2370 = vrcp.f32 %v593_v37  ;;  %v620_v49 = vand.u32 2147483648, %v593_v37  ;;  %vm614_vm1 = vweird.f32 %v593_v37 }
 0x588   :  { %v618_v50 = vand.u32 2147483647, %v593_v37 }
 0x589   :  { %v598_v18 = vadd.f32 %v2365_v59, %v597_v8  ;;  %v621_v58 = vor.u32 1.1754944e-38, %v620_v49 }
 0x58a   :  { %vm619_vm3 = vcmp.eq.f32.partialorder %v618_v50, 8.507059e+37 }
 0x58b   :  { %v602_v25 = vsel %vm601_vm14, %v2365_v59, %v598_v18 }
 0x58c   :  { %v607_v31 = vsel %vm604_vm15, %v606_v0, %v602_v25 }
 0x58d   :  { %v626_v33 = vmul.f32 %v2367_v22, %v607_v31  ;;  %v2371_v38 = vpop.eup %2370  ;;  %v625_v44 = vmul.f32 %v607_v31, %v2922_v40 }
 0x58e   :  { %v610_v39 = vmul.f32 %v2371_v38, %v593_v37  ;;  %vm615_vm0 = vweird.f32 %v2371_v38 }
 0x58f   :  { %628 = vrot.lane.b32.xlu2 %v626_v33, %s2626_s11  ;;  %vm616_vm2 = vmor %vm614_vm1, %vm615_vm0 }
 0x590   :  { %v611_v42 = vsub.f32 1.0, %v610_v39 }
 0x592   :  { %v612_v43 = vmul.f32 %v2371_v38, %v611_v42 }
 0x594   :  { %v613_v48 = vadd.f32 %v2371_v38, %v612_v43 }
 0x596   :  { %v617_v23 = vsel %vm616_vm2, %v2371_v38, %v613_v48 }
 0x597   :  { %v622_v52 = vsel %vm619_vm3, %v621_v58, %v617_v23 }
 0x5e9   :  { %v629_v45 = vpop.permute.xlu2 %628 }
 0x5ea   :  { %v2950_v46 = vadd.f32 %v629_v45, %v625_v44 }
 0x5ec   :  { %2372 = vtanh.f32 %v2950_v46 }
 0x5f2   :  { %v2373_v51 = vpop.eup %2372 }
 0x5f3   :  { %v633_v53 = vmul.f32 %v2373_v51, %v622_v52 }
 0x5f5   :  { %635 = vrot.lane.b32.xlu0 %v633_v53, %s2626_s11 }
 0x667   :  { %v636_v40 = vpop.permute.xlu0 %635 }
 0x668   :  { %2250 = vmatmul.msk.f32.vlgmr.msrb.gmra.mxu2 %vm232_vm9, %v636_v40  ;;  %2251 = vmatmul.msk.f32.vlgmr.msrb.gmra.mxu3 %vm232_vm9, %v636_v40 }
 0x669   :  { %1035 = vmatpush.msrb.mxu2 %v2676_v2  ;;  %1055 = vmatpush.msrb.mxu3 %v2690_v11 }
 0x66b   :  { %1036 = vmatpush.msrb.mxu2 %v2679_v4  ;;  %1056 = vmatpush.msrb.mxu3 %v2696_v14 }
 0x66d   :  { %1037 = vmatpush.msrb.mxu2 %v2681_v5  ;;  %1057 = vmatpush.msrb.mxu3 %v2707_v21 }
 0x66f   :  { %1038 = vmatpush.msrb.mxu2 %v2684_v7  ;;  %1058 = vmatpush.msrb.mxu3 %v2713_v26 }
 0x671   :  { %1039 = vmatpush.msrb.mxu2 %v2687_v9  ;;  %1059 = vmatpush.msrb.mxu3 %v2728_v32 }
 0x673   :  { %1040 = vmatpush.msrb.mxu2 %v2692_v12  ;;  %1060 = vmatpush.msrb.mxu3 %v2743_v35 }
 0x675   :  { %1041 = vmatpush.msrb.mxu2 %v2698_v15  ;;  %1061 = vmatpush.msrb.mxu3 %v2758_v41 }
 0x677   :  { %1042 = vmatpush.msrb.mxu2 %v2702_v17  ;;  %1062 = vmatpush.msrb.mxu3 %v2766_v47 }
 0x6eb   :  { %v656_v2 = vpop.f32.mrf.mxu2  ;;  %v676_v12 = vpop.f32.mrf.mxu3 }
 0x6ec   :  { %v657_v4 = vadd.f32 %v656_v2, %v2833_v61  ;;  %v677_v14 = vadd.f32 %v676_v12, %v2846_v24 }
 0x6ee   :  { %v681_v5 = vadd.f32 %v657_v4, %v2838_v6  ;;  %v682_v21 = vadd.f32 %v677_v14, %v2882_v28 }
 0x6f0   :  { %v2252_v7 = vmul.f32 -1.442695, %v681_v5  ;;  %v2253_v59 = vmul.f32 -1.442695, %v682_v21 }
 0x6f2   :  { %2374 = vpow2.f32 %v2252_v7 }
 0x6f8   :  { %v2375_v9 = vpop.eup %2374 }
 0x6f9   :  { %v689_v11 = vadd.f32 1.0, %v2375_v9 }
 0x6fb   :  { %2376 = vrcp.f32 %v689_v11  ;;  %v702_v32 = vand.u32 2147483648, %v689_v11  ;;  %v700_v41 = vand.u32 2147483647, %v689_v11  ;;  %vm696_vm5 = vweird.f32 %v689_v11 }
 0x6fc   :  { %2378 = vtanh.f32 %v682_v21 }
 0x6fd   :  { %v703_v6 = vor.u32 1.1754944e-38, %v702_v32  ;;  %vm701_vm7 = vcmp.eq.f32.partialorder %v700_v41, 8.507059e+37  ;;  %2380 = vpow2.f32 %v2253_v59 }
 0x701   :  { %v2377_v15 = vpop.eup %2376 }
 0x702   :  { %v692_v26 = vmul.f32 %v2377_v15, %v689_v11  ;;  %vm697_vm4 = vweird.f32 %v2377_v15  ;;  %v2379_v55 = vpop.eup %2378 }
 0x703   :  { %vm698_vm6 = vmor %vm696_vm5, %vm697_vm4  ;;  %v2381_v28 = vpop.eup %2380 }
 0x704   :  { %v693_v17 = vsub.f32 1.0, %v692_v26  ;;  %v690_v62 = vadd.f32 1.0, %v2381_v28 }
 0x706   :  { %v694_v35 = vmul.f32 %v2377_v15, %v693_v17  ;;  %2382 = vrcp.f32 %v690_v62  ;;  %v717_v22 = vand.u32 2147483648, %v690_v62  ;;  %vm711_vm11 = vweird.f32 %v690_v62 }
 0x707   :  { %v715_v31 = vand.u32 2147483647, %v690_v62 }
 0x708   :  { %v695_v47 = vadd.f32 %v2377_v15, %v694_v35  ;;  %v718_v34 = vor.u32 1.1754944e-38, %v717_v22 }
 0x709   :  { %vm716_vm13 = vcmp.eq.f32.partialorder %v715_v31, 8.507059e+37 }
 0x70a   :  { %v699_v54 = vsel %vm698_vm6, %v2377_v15, %v695_v47 }
 0x70b   :  { %v704_v56 = vsel %vm701_vm7, %v703_v6, %v699_v54 }
 0x70c   :  { %v723_v57 = vmul.f32 %v2379_v55, %v704_v56  ;;  %v2383_v60 = vpop.eup %2382  ;;  %v722_v13 = vmul.f32 %v704_v56, %v2950_v46 }
 0x70d   :  { %v707_v63 = vmul.f32 %v2383_v60, %v690_v62  ;;  %vm712_vm10 = vweird.f32 %v2383_v60 }
 0x70e   :  { %725 = vrot.lane.b32.xlu1 %v723_v57, %s2626_s11  ;;  %vm713_vm12 = vmor %vm711_vm11, %vm712_vm10 }
 0x70f   :  { %v708_v1 = vsub.f32 1.0, %v707_v63 }
 0x711   :  { %v709_v8 = vmul.f32 %v2383_v60, %v708_v1 }
 0x713   :  { %v710_v25 = vadd.f32 %v2383_v60, %v709_v8 }
 0x715   :  { %v714_v33 = vsel %vm713_vm12, %v2383_v60, %v710_v25 }
 0x716   :  { %v719_v37 = vsel %vm716_vm13, %v718_v34, %v714_v33 }
 0x780   :  { %v726_v18 = vpop.permute.xlu1 %725 }
 0x781   :  { %v728_v0 = vadd.f32 %v726_v18, %v722_v13 }
 0x783   :  { %2384 = vtanh.f32 %v728_v0 }
 0x789   :  { %v2385_v27 = vpop.eup %2384 }
 0x78a   :  { %v730_v38 = vmul.f32 %v2385_v27, %v719_v37 }
 0x78c   :  { %732 = vrot.lane.b32.xlu2 %v730_v38, %s2626_s11 }
 0x7e6   :  { %v733_v39 = vpop.permute.xlu2 %732 }
 0x7e7   :  { %2254 = vmatmul.msk.f32.vlgmr.msra.gmra.mxu0 %vm232_vm9, %v733_v39  ;;  %2255 = vmatmul.msk.f32.vlgmr.msra.gmra.mxu1 %vm232_vm9, %v733_v39 }
 0x864   :  { %v753_v42 = vpop.f32.mrf.mxu0  ;;  %v773_v49 = vpop.f32.mrf.mxu1 }
 0x865   :  { %v754_v43 = vadd.f32 %v753_v42, %v2833_v61  ;;  %v774_v50 = vadd.f32 %v773_v49, %v2846_v24 }
 0x867   :  { %v778_v44 = vadd.f32 %v754_v43, %v2840_v10  ;;  %v779_v58 = vadd.f32 %v774_v50, %v2884_v29 }
 0x869   :  { %v2256_v45 = vmul.f32 -1.442695, %v778_v44  ;;  %v2257_v12 = vmul.f32 -1.442695, %v779_v58 }
 0x86b   :  { %2386 = vpow2.f32 %v2256_v45 }
 0x871   :  { %v2387_v46 = vpop.eup %2386 }
 0x872   :  { %v786_v48 = vadd.f32 1.0, %v2387_v46 }
 0x874   :  { %2388 = vrcp.f32 %v786_v48  ;;  %v799_v53 = vand.u32 2147483648, %v786_v48  ;;  %v797_v2 = vand.u32 2147483647, %v786_v48  ;;  %vm793_vm15 = vweird.f32 %v786_v48 }
 0x875   :  { %2390 = vtanh.f32 %v779_v58 }
 0x876   :  { %v800_v10 = vor.u32 1.1754944e-38, %v799_v53  ;;  %vm798_vm1 = vcmp.eq.f32.partialorder %v797_v2, 8.507059e+37  ;;  %2392 = vpow2.f32 %v2257_v12 }
 0x87a   :  { %v2389_v23 = vpop.eup %2388 }
 0x87b   :  { %v789_v51 = vmul.f32 %v2389_v23, %v786_v48  ;;  %vm794_vm14 = vweird.f32 %v2389_v23  ;;  %v2391_v7 = vpop.eup %2390 }
 0x87c   :  { %vm795_vm0 = vmor %vm793_vm15, %vm794_vm14  ;;  %v2393_v29 = vpop.eup %2392 }
 0x87d   :  { %v790_v52 = vsub.f32 1.0, %v789_v51  ;;  %v787_v14 = vadd.f32 1.0, %v2393_v29 }
 0x87f   :  { %v791_v40 = vmul.f32 %v2389_v23, %v790_v52  ;;  %2394 = vrcp.f32 %v787_v14  ;;  %v814_v6 = vand.u32 2147483648, %v787_v14  ;;  %vm808_vm3 = vweird.f32 %v787_v14 }
 0x880   :  { %v812_v54 = vand.u32 2147483647, %v787_v14 }
 0x881   :  { %v792_v4 = vadd.f32 %v2389_v23, %v791_v40  ;;  %v815_v56 = vor.u32 1.1754944e-38, %v814_v6 }
 0x882   :  { %vm813_vm5 = vcmp.eq.f32.partialorder %v812_v54, 8.507059e+37 }
 0x883   :  { %v796_v5 = vsel %vm795_vm0, %v2389_v23, %v792_v4 }
 0x884   :  { %v801_v9 = vsel %vm798_vm1, %v800_v10, %v796_v5 }
 0x885   :  { %v820_v11 = vmul.f32 %v2391_v7, %v801_v9  ;;  %v2395_v15 = vpop.eup %2394  ;;  %v819_v32 = vmul.f32 %v801_v9, %v728_v0 }
 0x886   :  { %v804_v21 = vmul.f32 %v2395_v15, %v787_v14  ;;  %vm809_vm2 = vweird.f32 %v2395_v15 }
 0x887   :  { %822 = vrot.lane.b32.xlu0 %v820_v11, %s2626_s11  ;;  %vm810_vm4 = vmor %vm808_vm3, %vm809_vm2 }
 0x888   :  { %v805_v26 = vsub.f32 1.0, %v804_v21 }
 0x88a   :  { %v806_v17 = vmul.f32 %v2395_v15, %v805_v26 }
 0x88c   :  { %v807_v47 = vadd.f32 %v2395_v15, %v806_v17 }
 0x88e   :  { %v811_v55 = vsel %vm810_vm4, %v2395_v15, %v807_v47 }
 0x88f   :  { %v816_v59 = vsel %vm813_vm5, %v815_v56, %v811_v55 }
 0x8f9   :  { %v823_v35 = vpop.permute.xlu0 %822 }
 0x8fa   :  { %v825_v41 = vadd.f32 %v823_v35, %v819_v32 }
 0x8fc   :  { %2396 = vtanh.f32 %v825_v41 }
 0x902   :  { %v2397_v57 = vpop.eup %2396 }
 0x903   :  { %v827_v28 = vmul.f32 %v2397_v57, %v816_v59 }
 0x905   :  { %829 = vrot.lane.b32.xlu1 %v827_v28, %s2626_s11 }
 0x977   :  { %v830_v62 = vpop.permute.xlu1 %829 }
 0x978   :  { %2258 = vmatmul.msk.f32.vlgmr.msra.gmra.mxu2 %vm232_vm9, %v830_v62  ;;  %2259 = vmatmul.msk.f32.vlgmr.msra.gmra.mxu3 %vm232_vm9, %v830_v62 }
 0x9fb   :  { %v850_v60 = vpop.f32.mrf.mxu2  ;;  %v870_v0 = vpop.f32.mrf.mxu3 }
 0x9fc   :  { %v851_v63 = vadd.f32 %v850_v60, %v2833_v61  ;;  %v871_v25 = vadd.f32 %v870_v0, %v2846_v24 }
 0x9fe   :  { %v875_v1 = vadd.f32 %v851_v63, %v2842_v16  ;;  %v876_v31 = vadd.f32 %v871_v25, %v2886_v30 }
 0xa00   :  { %v2260_v8 = vmul.f32 -1.442695, %v875_v1  ;;  %v2261_v46 = vmul.f32 -1.442695, %v876_v31 }
 0xa02   :  { %2398 = vpow2.f32 %v2260_v8 }
 0xa08   :  { %v2399_v13 = vpop.eup %2398 }
 0xa09   :  { %v883_v18 = vadd.f32 1.0, %v2399_v13 }
 0xa0b   :  { %2400 = vrcp.f32 %v883_v18  ;;  %v896_v27 = vand.u32 2147483648, %v883_v18  ;;  %v894_v38 = vand.u32 2147483647, %v883_v18  ;;  %vm890_vm7 = vweird.f32 %v883_v18 }
 0xa0c   :  { %2402 = vtanh.f32 %v876_v31 }
 0xa0d   :  { %v897_v16 = vor.u32 1.1754944e-38, %v896_v27  ;;  %vm895_vm11 = vcmp.eq.f32.partialorder %v894_v38, 8.507059e+37  ;;  %2404 = vpow2.f32 %v2261_v46 }
 0xa11   :  { %v2401_v22 = vpop.eup %2400 }
 0xa12   :  { %v886_v33 = vmul.f32 %v2401_v22, %v883_v18  ;;  %vm891_vm6 = vweird.f32 %v2401_v22  ;;  %v2403_v43 = vpop.eup %2402 }
 0xa13   :  { %vm892_vm10 = vmor %vm890_vm7, %vm891_vm6  ;;  %v2405_v30 = vpop.eup %2404 }
 0xa14   :  { %v887_v34 = vsub.f32 1.0, %v886_v33  ;;  %v884_v48 = vadd.f32 1.0, %v2405_v30 }
 0xa16   :  { %v888_v37 = vmul.f32 %v2401_v22, %v887_v34  ;;  %2406 = vrcp.f32 %v884_v48  ;;  %v911_v2 = vand.u32 2147483648, %v884_v48  ;;  %vm905_vm13 = vweird.f32 %v884_v48 }
 0xa17   :  { %v909_v4 = vand.u32 2147483647, %v884_v48 }
 0xa18   :  { %v889_v39 = vadd.f32 %v2401_v22, %v888_v37  ;;  %v912_v5 = vor.u32 1.1754944e-38, %v911_v2 }
 0xa19   :  { %vm910_vm15 = vcmp.eq.f32.partialorder %v909_v4, 8.507059e+37 }
 0xa1a   :  { %v893_v42 = vsel %vm892_vm10, %v2401_v22, %v889_v39 }
 0xa1b   :  { %v898_v44 = vsel %vm895_vm11, %v897_v16, %v893_v42 }
 0xa1c   :  { %v917_v45 = vmul.f32 %v2403_v43, %v898_v44  ;;  %v2407_v49 = vpop.eup %2406  ;;  %v916_v51 = vmul.f32 %v898_v44, %v825_v41 }
 0xa1d   :  { %v901_v50 = vmul.f32 %v2407_v49, %v884_v48  ;;  %vm906_vm12 = vweird.f32 %v2407_v49 }
 0xa1e   :  { %919 = vrot.lane.b32.xlu2 %v917_v45, %s2626_s11  ;;  %vm907_vm14 = vmor %vm905_vm13, %vm906_vm12 }
 0xa1f   :  { %v902_v23 = vsub.f32 1.0, %v901_v50 }
 0xa21   :  { %v903_v58 = vmul.f32 %v2407_v49, %v902_v23 }
 0xa23   :  { %v904_v40 = vadd.f32 %v2407_v49, %v903_v58 }
 0xa25   :  { %v908_v10 = vsel %vm907_vm14, %v2407_v49, %v904_v40 }
 0xa26   :  { %v913_v9 = vsel %vm910_vm15, %v912_v5, %v908_v10 }
 0xa78   :  { %v920_v52 = vpop.permute.xlu2 %919 }
 0xa79   :  { %v922_v53 = vadd.f32 %v920_v52, %v916_v51 }
 0xa7b   :  { %2408 = vtanh.f32 %v922_v53 }
 0xa81   :  { %v2409_v7 = vpop.eup %2408 }
 0xa82   :  { %v924_v11 = vmul.f32 %v2409_v7, %v913_v9 }
 0xa84   :  { %926 = vrot.lane.b32.xlu0 %v924_v11, %s2626_s11 }
 0xaf6   :  { %v927_v12 = vpop.permute.xlu0 %926 }
 0xaf7   :  { %2262 = vmatmul.msk.f32.vlgmr.msrb.gmra.mxu0 %vm232_vm9, %v927_v12  ;;  %2263 = vmatmul.msk.f32.vlgmr.msrb.gmra.mxu1 %vm232_vm9, %v927_v12 }
 0xb74   :  { %v947_v29 = vpop.f32.mrf.mxu0  ;;  %v967_v32 = vpop.f32.mrf.mxu1 }
 0xb75   :  { %v948_v14 = vadd.f32 %v947_v29, %v2833_v61  ;;  %v968_v35 = vadd.f32 %v967_v32, %v2846_v24  ;;  %v1122_v29 = vld [vmem:[#allocation8 + $0x38] sm:$0xff]  ;;  %v1117_v32 = vld [vmem:[#allocation8 + $0x10] sm:$0xff] }
 0xb76   :  { %1140 = vmatpush.msra.mxu0 %v1122_v29  ;;  %v1159_v29 = vld [vmem:[#allocation4 + $0x128] sm:$0xff] }
 0xb77   :  { %v972_v15 = vadd.f32 %v948_v14, %v2844_v19  ;;  %v973_v47 = vadd.f32 %v968_v35, %v2890_v36  ;;  %v1121_v14 = vld [vmem:[#allocation8 + $0x30] sm:$0xff] }
 0xb78   :  { %1141 = vmatpush.msra.mxu0 %v1121_v14 }
 0xb79   :  { %v2264_v21 = vmul.f32 -1.442695, %v972_v15  ;;  %v2265_v1 = vmul.f32 -1.442695, %v973_v47  ;;  %v1120_v15 = vld [vmem:[#allocation8 + $0x28] sm:$0xff] }
 0xb7a   :  { %1142 = vmatpush.msra.mxu0 %v1120_v15  ;;  %v1156_v15 = vld [vmem:[#allocation4 + $0x110] sm:$0xff] }
 0xb7b   :  { %2410 = vpow2.f32 %v2264_v21  ;;  %v1119_v21 = vld [vmem:[#allocation8 + $0x20] sm:$0xff] }
 0xb7c   :  { %1143 = vmatpush.msra.mxu0 %v1119_v21  ;;  %v1157_v21 = vld [vmem:[#allocation4 + $0x118] sm:$0xff] }
 0xb81   :  { %v2411_v26 = vpop.eup %2410 }
 0xb82   :  { %v980_v17 = vadd.f32 1.0, %v2411_v26  ;;  %v1118_v26 = vld [vmem:[#allocation8 + $0x18] sm:$0xff] }
 0xb83   :  { %1144 = vmatpush.msra.mxu0 %v1118_v26  ;;  %v3067_v26 = vld [vmem:[#allocation6 + $0xb8] sm:$0xff] }
 0xb84   :  { %2412 = vrcp.f32 %v980_v17  ;;  %v993_v55 = vand.u32 2147483648, %v980_v17  ;;  %v991_v57 = vand.u32 2147483647, %v980_v17  ;;  %vm987_vm1 = vweird.f32 %v980_v17 }
 0xb85   :  { %2414 = vtanh.f32 %v973_v47  ;;  %1145 = vmatpush.msra.mxu0 %v1117_v32  ;;  %v1115_v47 = vld [vmem:[#allocation8] sm:$0xff]  ;;  %v1155_v32 = vld [vmem:[#allocation4 + $0x108] sm:$0xff] }
 0xb86   :  { %v994_v19 = vor.u32 1.1754944e-38, %v993_v55  ;;  %vm992_vm3 = vcmp.eq.f32.partialorder %v991_v57, 8.507059e+37  ;;  %2416 = vpow2.f32 %v2265_v1 }
 0xb8a   :  { %v2413_v41 = vpop.eup %2412 }
 0xb8b   :  { %v983_v6 = vmul.f32 %v2413_v41, %v980_v17  ;;  %vm988_vm0 = vweird.f32 %v2413_v41  ;;  %v2415_v62 = vpop.eup %2414 }
 0xb8c   :  { %vm989_vm2 = vmor %vm987_vm1, %vm988_vm0  ;;  %v2417_v36 = vpop.eup %2416 }
 0xb8d   :  { %v984_v54 = vsub.f32 1.0, %v983_v6  ;;  %v981_v8 = vadd.f32 1.0, %v2417_v36 }
 0xb8f   :  { %v985_v56 = vmul.f32 %v2413_v41, %v984_v54  ;;  %2418 = vrcp.f32 %v981_v8  ;;  %v1008_v27 = vand.u32 2147483648, %v981_v8  ;;  %vm1002_vm5 = vweird.f32 %v981_v8 }
 0xb90   :  { %v1006_v37 = vand.u32 2147483647, %v981_v8 }
 0xb91   :  { %v986_v59 = vadd.f32 %v2413_v41, %v985_v56  ;;  %v1009_v39 = vor.u32 1.1754944e-38, %v1008_v27  ;;  %v3016_v27 = vld [vmem:[#allocation6 + $0xe0] sm:$0xff] }
 0xb92   :  { %vm1007_vm7 = vcmp.eq.f32.partialorder %v1006_v37, 8.507059e+37  ;;  %v3018_v37 = vld [vmem:[#allocation6 + $0xd0] sm:$0xff] }
 0xb93   :  { %v990_v28 = vsel %vm989_vm2, %v2413_v41, %v986_v59  ;;  %v1116_v41 = vld [vmem:[#allocation8 + $0x8] sm:$0xff] }
 0xb94   :  { %v995_v60 = vsel %vm992_vm3, %v994_v19, %v990_v28  ;;  %1146 = vmatpush.msra.mxu0 %v1116_v41  ;;  %v3072_v41 = vld [vmem:[#allocation6 + $0x98] sm:$0xff] }
 0xb95   :  { %v1014_v63 = vmul.f32 %v2415_v62, %v995_v60  ;;  %v2419_v13 = vpop.eup %2418  ;;  %v1013_v22 = vmul.f32 %v995_v60, %v922_v53 }
 0xb96   :  { %v998_v18 = vmul.f32 %v2419_v13, %v981_v8  ;;  %vm1003_vm4 = vweird.f32 %v2419_v13  ;;  %1147 = vmatpush.msra.mxu0 %v1115_v47  ;;  %v1184_v8 = vld [vmem:[#allocation4 + $0x1f0] sm:$0xff]  ;;  %v3076_v47 = vld [vmem:[#allocation6 + $0x88] sm:$0xff] }
 0xb97   :  { %1016 = vrot.lane.b32.xlu1 %v1014_v63, %s2626_s11  ;;  %vm1004_vm6 = vmor %vm1002_vm5, %vm1003_vm4  ;;  %1186 = vmatpush.msra.mxu1 %v1184_v8 }
 0xb98   :  { %v999_v0 = vsub.f32 1.0, %v998_v18  ;;  %v1182_v18 = vld [vmem:[#allocation4 + $0x1e0] sm:$0xff] }
 0xb99   :  { %1187 = vmatpush.msra.mxu1 %v1182_v18 }
 0xb9a   :  { %v1000_v25 = vmul.f32 %v2419_v13, %v999_v0  ;;  %v1183_v0 = vld [vmem:[#allocation4 + $0x1e8] sm:$0xff] }
 0xb9c   :  { %v1001_v34 = vadd.f32 %v2419_v13, %v1000_v25  ;;  %v1180_v25 = vld [vmem:[#allocation4 + $0x1d0] sm:$0xff] }
 0xb9d   :  { %1188 = vmatpush.msra.mxu1 %v1180_v25 }
 0xb9e   :  { %v1005_v38 = vsel %vm1004_vm6, %v2419_v13, %v1001_v34  ;;  %v1185_v13 = vld [vmem:[#allocation4 + $0x1f8] sm:$0xff]  ;;  %v1179_v34 = vld [vmem:[#allocation4 + $0x1c8] sm:$0xff] }
 0xb9f   :  { %v1010_v42 = vsel %vm1007_vm7, %v1009_v39, %v1005_v38  ;;  %1206 = vmatpush.msra.mxu2 %v1185_v13  ;;  %v1176_v38 = vld [vmem:[#allocation4 + $0x1b0] sm:$0xff]  ;;  %v1177_v39 = vld [vmem:[#allocation4 + $0x1b8] sm:$0xff] }
 0xba1   :  { %1207 = vmatpush.msra.mxu2 %v1183_v0 }
 0xc09   :  { %v1017_v31 = vpop.permute.xlu1 %1016 }
 0xc0a   :  { %v3002_v33 = vadd.f32 %v1017_v31, %v1013_v22  ;;  %v1181_v22 = vld [vmem:[#allocation4 + $0x1d8] sm:$0xff]  ;;  %v3013_v31 = vld [vmem:[#allocation6 + $0xf0] sm:$0xff] }
 0xc0b   :  { %1258 = vmatpush.msra.mxu3 %v3013_v31  ;;  %1208 = vmatpush.msra.mxu2 %v1181_v22 }
 0xc0c   :  { %2420 = vtanh.f32 %v3002_v33 }
 0xc0d   :  { %1259 = vmatpush.msra.mxu3 %v3016_v27  ;;  %1209 = vmatpush.msra.mxu2 %v1179_v34 }
 0xc0f   :  { %1260 = vmatpush.msra.mxu3 %v3018_v37  ;;  %1210 = vmatpush.msra.mxu2 %v1177_v39 }
 0xc12   :  { %v2421_v16 = vpop.eup %2420 }
 0xc13   :  { %v1021_v43 = vmul.f32 %v2421_v16, %v1010_v42  ;;  %v3021_v16 = vld [vmem:[#allocation6 + $0xc0] sm:$0xff] }
 0xc14   :  { %v1174_v42 = vld [vmem:[#allocation4 + $0x1a0] sm:$0xff]  ;;  %1261 = vmatpush.msra.mxu3 %v3021_v16 }
 0xc15   :  { %1023 = vrot.lane.b32.xlu2 %v1021_v43, %s2626_s11  ;;  %v1175_v43 = vld [vmem:[#allocation4 + $0x1a8] sm:$0xff] }
 0xc16   :  { %1211 = vmatpush.msra.mxu2 %v1175_v43 }
 0xc6f   :  { %v1024_v44 = vpop.permute.xlu2 %1023 }
 0xc70   :  { %2266 = vmatmul.msk.f32.vlgmr.msrb.gmra.mxu2 %vm232_vm9, %v1024_v44  ;;  %2267 = vmatmul.msk.f32.vlgmr.msrb.gmra.mxu3 %vm232_vm9, %v1024_v44  ;;  %v3024_v44 = vld [vmem:[#allocation6 + $0xb0] sm:$0xff] }
 0xc71   :  { %1262 = vmatpush.msra.mxu3 %v3024_v44 }
 0xcf3   :  { %v1044_v45 = vpop.f32.mrf.mxu2  ;;  %v1064_v50 = vpop.f32.mrf.mxu3 }
 0xcf4   :  { %v1045_v46 = vadd.f32 %v1044_v45, %v2833_v61  ;;  %v1065_v58 = vadd.f32 %v1064_v50, %v2846_v24  ;;  %v3026_v45 = vld [vmem:[#allocation6 + $0xf8] sm:$0xff]  ;;  %v1170_v50 = vld [vmem:[#allocation4 + $0x180] sm:$0xff] }
 0xcf5   :  { %1278 = vmatpush.msrb.mxu0 %v3026_v45 }
 0xcf6   :  { %v2268_v30 = vmul.f32 -1.442695, %v1045_v46  ;;  %v2269_v11 = vmul.f32 -1.442695, %v1065_v58  ;;  %v1172_v46 = vld [vmem:[#allocation4 + $0x190] sm:$0xff] }
 0xcf8   :  { %2422 = vpow2.f32 %v2268_v30  ;;  %v1173_v30 = vld [vmem:[#allocation4 + $0x198] sm:$0xff] }
 0xcf9   :  { %1212 = vmatpush.msra.mxu2 %v1173_v30 }
 0xcfe   :  { %v2423_v48 = vpop.eup %2422 }
 0xcff   :  { %v1073_v49 = vadd.f32 1.0, %v2423_v48  ;;  %v3030_v48 = vld [vmem:[#allocation6 + $0xa0] sm:$0xff] }
 0xd00   :  { %1263 = vmatpush.msra.mxu3 %v3030_v48 }
 0xd01   :  { %2424 = vrcp.f32 %v1073_v49  ;;  %v1086_v53 = vand.u32 2147483648, %v1073_v49  ;;  %v1084_v2 = vand.u32 2147483647, %v1073_v49  ;;  %vm1080_vm11 = vweird.f32 %v1073_v49 }
 0xd02   :  { %2426 = vtanh.f32 %v1065_v58  ;;  %v3036_v58 = vld [vmem:[#allocation6 + $0xd8] sm:$0xff] }
 0xd03   :  { %v1087_v61 = vor.u32 1.1754944e-38, %v1086_v53  ;;  %vm1085_vm13 = vcmp.eq.f32.partialorder %v1084_v2, 8.507059e+37  ;;  %2428 = vpow2.f32 %v2269_v11  ;;  %v1168_v53 = vld [vmem:[#allocation4 + $0x170] sm:$0xff]  ;;  %v3044_v2 = vld [vmem:[#allocation6 + $0x80] sm:$0xff] }
 0xd04   :  { %v1160_v11 = vld [vmem:[#allocation4 + $0x130] sm:$0xff] }
 0xd07   :  { %v2425_v23 = vpop.eup %2424 }
 0xd08   :  { %v1076_v51 = vmul.f32 %v2425_v23, %v1073_v49  ;;  %vm1081_vm10 = vweird.f32 %v2425_v23  ;;  %v2427_v5 = vpop.eup %2426  ;;  %v3032_v49 = vld [vmem:[#allocation6 + $0xe8] sm:$0xff] }
 0xd09   :  { %vm1082_vm12 = vmor %vm1080_vm11, %vm1081_vm10  ;;  %v2429_v24 = vpop.eup %2428  ;;  %1279 = vmatpush.msrb.mxu0 %v3032_v49 }
 0xd0a   :  { %v1077_v52 = vsub.f32 1.0, %v1076_v51  ;;  %v1074_v12 = vadd.f32 1.0, %v2429_v24  ;;  %v3038_v51 = vld [vmem:[#allocation6 + $0x90] sm:$0xff]  ;;  %v1161_v24 = vld [vmem:[#allocation4 + $0x138] sm:$0xff] }
 0xd0b   :  { %1280 = vmatpush.msrb.mxu0 %v3036_v58  ;;  %1264 = vmatpush.msra.mxu3 %v3038_v51 }
 0xd0c   :  { %v1078_v40 = vmul.f32 %v2425_v23, %v1077_v52  ;;  %2430 = vrcp.f32 %v1074_v12  ;;  %v1101_v19 = vand.u32 2147483648, %v1074_v12  ;;  %vm1095_vm15 = vweird.f32 %v1074_v12  ;;  %v3040_v52 = vld [vmem:[#allocation6 + $0xc8] sm:$0xff] }
 0xd0d   :  { %v1099_v28 = vand.u32 2147483647, %v1074_v12  ;;  %1281 = vmatpush.msrb.mxu0 %v3040_v52  ;;  %1265 = vmatpush.msra.mxu3 %v3044_v2 }
 0xd0e   :  { %v1079_v4 = vadd.f32 %v2425_v23, %v1078_v40  ;;  %v1102_v60 = vor.u32 1.1754944e-38, %v1101_v19  ;;  %v1169_v40 = vld [vmem:[#allocation4 + $0x178] sm:$0xff]  ;;  %1266 = vmatmul.f32.vlgmr.msra.gmra.mxu3 %v2625_v20 }
 0xd0f   :  { %vm1100_vm1 = vcmp.eq.f32.partialorder %v1099_v28, 8.507059e+37  ;;  %1361 = vmatpush.msrb.mxu3 %v3013_v31  ;;  %1282 = vmatpush.msrb.mxu0 %v3067_v26 }
 0xd10   :  { %v1083_v10 = vsel %vm1082_vm12, %v2425_v23, %v1079_v4  ;;  %v1171_v23 = vld [vmem:[#allocation4 + $0x188] sm:$0xff]  ;;  %v1166_v4 = vld [vmem:[#allocation4 + $0x160] sm:$0xff] }
 0xd11   :  { %v1088_v7 = vsel %vm1085_vm13, %v1087_v61, %v1083_v10  ;;  %1213 = vmatpush.msra.mxu2 %v1171_v23  ;;  %v1167_v61 = vld [vmem:[#allocation4 + $0x168] sm:$0xff]  ;;  %v1164_v10 = vld [vmem:[#allocation4 + $0x150] sm:$0xff]  ;;  %1362 = vmatpush.msrb.mxu3 %v3016_v27 }
 0xd12   :  { %v1107_v9 = vmul.f32 %v2427_v5, %v1088_v7  ;;  %v2431_v17 = vpop.eup %2430  ;;  %v1106_v55 = vmul.f32 %v1088_v7, %v3002_v33  ;;  %v1178_v33 = vld [vmem:[#allocation4 + $0x1c0] sm:$0xff]  ;;  %v1165_v5 = vld [vmem:[#allocation4 + $0x158] sm:$0xff] }
 0xd13   :  { %v1091_v35 = vmul.f32 %v2431_v17, %v1074_v12  ;;  %vm1096_vm14 = vweird.f32 %v2431_v17  ;;  %1189 = vmatpush.msra.mxu1 %v1178_v33  ;;  %1214 = vmatpush.msra.mxu2 %v1169_v40  ;;  %v1162_v7 = vld [vmem:[#allocation4 + $0x140] sm:$0xff] }
 0xd14   :  { %1109 = vrot.lane.b32.xlu0 %v1107_v9, %s2626_s11  ;;  %vm1097_vm0 = vmor %vm1095_vm15, %vm1096_vm14  ;;  %v1163_v9 = vld [vmem:[#allocation4 + $0x148] sm:$0xff]  ;;  %v1158_v12 = vld [vmem:[#allocation4 + $0x120] sm:$0xff]  ;;  %1363 = vmatpush.msrb.mxu3 %v3018_v37 }
 0xd15   :  { %v1092_v6 = vsub.f32 1.0, %v1091_v35  ;;  %1190 = vmatpush.msra.mxu1 %v1176_v38  ;;  %1215 = vmatpush.msra.mxu2 %v1167_v61  ;;  %v3070_v35 = vld [vmem:[#allocation6 + $0xa8] sm:$0xff] }
 0xd16   :  { %1364 = vmatpush.msrb.mxu3 %v3021_v16  ;;  %1283 = vmatpush.msrb.mxu0 %v3070_v35 }
 0xd17   :  { %v1093_v54 = vmul.f32 %v2431_v17, %v1092_v6  ;;  %1191 = vmatpush.msra.mxu1 %v1174_v42  ;;  %1216 = vmatpush.msra.mxu2 %v1165_v5 }
 0xd18   :  { %1365 = vmatpush.msrb.mxu3 %v3024_v44  ;;  %1284 = vmatpush.msrb.mxu0 %v3072_v41 }
 0xd19   :  { %v1094_v59 = vadd.f32 %v2431_v17, %v1093_v54  ;;  %1192 = vmatpush.msra.mxu1 %v1172_v46  ;;  %1217 = vmatpush.msra.mxu2 %v1163_v9 }
 0xd1a   :  { %1366 = vmatpush.msrb.mxu3 %v3030_v48  ;;  %1285 = vmatpush.msrb.mxu0 %v3076_v47 }
 0xd1b   :  { %v1098_v62 = vsel %vm1097_vm0, %v2431_v17, %v1094_v59  ;;  %1193 = vmatpush.msra.mxu1 %v1170_v50  ;;  %1218 = vmatpush.msra.mxu2 %v1161_v24  ;;  %v1154_v17 = vld [vmem:[#allocation4 + $0x100] sm:$0xff] }
 0xd1c   :  { %v1103_v1 = vsel %vm1100_vm1, %v1102_v60, %v1098_v62  ;;  %1367 = vmatpush.msrb.mxu3 %v3038_v51 }
 0xd1d   :  { %1194 = vmatpush.msra.mxu1 %v1168_v53  ;;  %1219 = vmatpush.msra.mxu2 %v1159_v29 }
 0xd1e   :  { %1368 = vmatpush.msrb.mxu3 %v3044_v2 }
 0xd1f   :  { %1195 = vmatpush.msra.mxu1 %v1166_v4  ;;  %1220 = vmatpush.msra.mxu2 %v1157_v21 }
 0xd20   :  { %1559 = vmatpush.msra.mxu3 %v3013_v31 }
 0xd21   :  { %1196 = vmatpush.msra.mxu1 %v1164_v10  ;;  %1221 = vmatpush.msra.mxu2 %v1155_v32 }
 0xd22   :  { %1560 = vmatpush.msra.mxu3 %v3016_v27 }
 0xd23   :  { %1197 = vmatpush.msra.mxu1 %v1162_v7  ;;  %1482 = vmatpush.msrb.mxu2 %v3026_v45 }
 0xd24   :  { %1561 = vmatpush.msra.mxu3 %v3018_v37 }
 0xd25   :  { %1198 = vmatpush.msra.mxu1 %v1160_v11  ;;  %1483 = vmatpush.msrb.mxu2 %v3032_v49 }
 0xd26   :  { %1562 = vmatpush.msra.mxu3 %v3021_v16 }
 0xd27   :  { %1199 = vmatpush.msra.mxu1 %v1158_v12  ;;  %1484 = vmatpush.msrb.mxu2 %v3036_v58 }
 0xd28   :  { %1563 = vmatpush.msra.mxu3 %v3024_v44 }
 0xd29   :  { %1200 = vmatpush.msra.mxu1 %v1156_v15  ;;  %1485 = vmatpush.msrb.mxu2 %v3040_v52 }
 0xd2a   :  { %1564 = vmatpush.msra.mxu3 %v3030_v48 }
 0xd2b   :  { %1201 = vmatpush.msra.mxu1 %v1154_v17  ;;  %1486 = vmatpush.msrb.mxu2 %v3067_v26 }
 0xd2c   :  { %1565 = vmatpush.msra.mxu3 %v3038_v51 }
 0xd2d   :  { %1462 = vmatpush.msrb.mxu1 %v3013_v31  ;;  %1487 = vmatpush.msrb.mxu2 %v3070_v35 }
 0xd2e   :  { %1566 = vmatpush.msra.mxu3 %v3044_v2 }
 0xd2f   :  { %1463 = vmatpush.msrb.mxu1 %v3016_v27  ;;  %1488 = vmatpush.msrb.mxu2 %v3072_v41 }
 0xd31   :  { %1464 = vmatpush.msrb.mxu1 %v3018_v37  ;;  %1489 = vmatpush.msrb.mxu2 %v3076_v47 }
 0xd33   :  { %1465 = vmatpush.msrb.mxu1 %v3021_v16 }
 0xd35   :  { %1466 = vmatpush.msrb.mxu1 %v3024_v44 }
 0xd37   :  { %1467 = vmatpush.msrb.mxu1 %v3030_v48 }
 0xd39   :  { %1468 = vmatpush.msrb.mxu1 %v3038_v51 }
 0xd3b   :  { %1469 = vmatpush.msrb.mxu1 %v3044_v2 }
 0xd86   :  { %v1110_v56 = vpop.permute.xlu0 %1109 }
 0xd87   :  { %v1112_v57 = vadd.f32 %v1110_v56, %v1106_v55  ;;  %v2271_v55 = vld [vmem:[%s3361_s3 + $0x2] sm:$0x3] }
 0xd88   :  { %v3137_v56 = vperm.slane %v2271_v55, 0 }
 0xd89   :  { %2432 = vtanh.f32 %v1112_v57 }
 0xd8f   :  { %v2433_v63 = vpop.eup %2432 }
 0xd90   :  { %v1114_v36 = vmul.f32 %v2433_v63, %v1103_v1  ;;  %v3143_v63 = vperm.slane %v2271_v55, 1 }
 0xd91   :  { %v1267_v57 = vpop.f32.mrf.mxu3 }
 0xd92   :  { %1128 = vrot.lane.b32.xlu1 %v1114_v36, %s2626_s11  ;;  %v1268_v59 = vadd.f32 %v1267_v57, %v3137_v56 }
 0xe04   :  { %v1129_v14 = vpop.permute.xlu1 %1128 }
 0xe05   :  { %2270 = vmatmul.msk.f32.vlgmr.msra.gmra.mxu0 %vm232_vm9, %v1129_v14 }
 0xe06   :  { %1381 = vmatpush.msra.mxu0 %v3026_v45 }
 0xe08   :  { %1382 = vmatpush.msra.mxu0 %v3032_v49 }
 0xe0a   :  { %1383 = vmatpush.msra.mxu0 %v3036_v58 }
 0xe0c   :  { %1384 = vmatpush.msra.mxu0 %v3040_v52 }
 0xe0d   :  { %1286 = vmatmul.f32.vlgmr.msrb.gmra.mxu0 %v2625_v20  ;;  %v2324_v20 = vld [vmem:[%s3363_s5] ss:$0 sm:$0xff] }
 0xe0e   :  { %1385 = vmatpush.msra.mxu0 %v3067_v26 }
 0xe10   :  { %1386 = vmatpush.msra.mxu0 %v3070_v35 }
 0xe12   :  { %1387 = vmatpush.msra.mxu0 %v3072_v41 }
 0xe14   :  { %1388 = vmatpush.msra.mxu0 %v3076_v47 }
 0xe16   :  { %1579 = vmatpush.msrb.mxu0 %v3026_v45 }
 0xe18   :  { %1580 = vmatpush.msrb.mxu0 %v3032_v49 }
 0xe1a   :  { %1581 = vmatpush.msrb.mxu0 %v3036_v58 }
 0xe1c   :  { %1582 = vmatpush.msrb.mxu0 %v3040_v52 }
 0xe1e   :  { %1583 = vmatpush.msrb.mxu0 %v3067_v26 }
 0xe20   :  { %1584 = vmatpush.msrb.mxu0 %v3070_v35 }
 0xe22   :  { %1585 = vmatpush.msrb.mxu0 %v3072_v41 }
 0xe24   :  { %1586 = vmatpush.msrb.mxu0 %v3076_v47 }
 0xe82   :  { %v1149_v6 = vpop.f32.mrf.mxu0 }
 0xe83   :  { %v1150_v54 = vadd.f32 %v2324_v20, %v1149_v6 }
 0xe85   :  { %1152 = vst [vmem:[%s3365_s7] sm:$0xff] %v1150_v54  ;;  %1202 = vmatmul.f32.vlgmr.msra.gmra.mxu1 %v1150_v54  ;;  %1222 = vmatmul.f32.vlgmr.msra.gmra.mxu2 %v1150_v54 }
 0xe86   :  { %1656 = vmatpush.msra.mxu1 %v3013_v31  ;;  %1676 = vmatpush.msra.mxu2 %v3026_v45 }
 0xe88   :  { %1657 = vmatpush.msra.mxu1 %v3016_v27  ;;  %1677 = vmatpush.msra.mxu2 %v3032_v49 }
 0xe8a   :  { %1658 = vmatpush.msra.mxu1 %v3018_v37  ;;  %1678 = vmatpush.msra.mxu2 %v3036_v58  ;;  %v1287_v36 = vpop.f32.mrf.mxu0 }
 0xe8b   :  { %v1288_v8 = vadd.f32 %v1287_v36, %v3143_v63 }
 0xe8c   :  { %1659 = vmatpush.msra.mxu1 %v3021_v16  ;;  %1679 = vmatpush.msra.mxu2 %v3040_v52 }
 0xe8e   :  { %1660 = vmatpush.msra.mxu1 %v3024_v44  ;;  %1680 = vmatpush.msra.mxu2 %v3067_v26 }
 0xe90   :  { %1661 = vmatpush.msra.mxu1 %v3030_v48  ;;  %1681 = vmatpush.msra.mxu2 %v3070_v35 }
 0xe92   :  { %1662 = vmatpush.msra.mxu1 %v3038_v51  ;;  %1682 = vmatpush.msra.mxu2 %v3072_v41 }
 0xe94   :  { %1663 = vmatpush.msra.mxu1 %v3044_v2  ;;  %1683 = vmatpush.msra.mxu2 %v3076_v47 }
 0xf02   :  { %v3140_v19 = vpop.f32.mrf.mxu1 }
 0xf03   :  { %v1290_v28 = vadd.f32 %v1268_v59, %v3140_v19 }
 0xf05   :  { %v2272_v62 = vmul.f32 -1.442695, %v1290_v28 }
 0xf07   :  { %2434 = vpow2.f32 %v2272_v62 }
 0xf08   :  { %v3146_v13 = vpop.f32.mrf.mxu2 }
 0xf09   :  { %v1291_v0 = vadd.f32 %v1288_v8, %v3146_v13 }
 0xf0b   :  { %v2273_v23 = vmul.f32 -1.442695, %v1291_v0 }
 0xf0d   :  { %v2435_v60 = vpop.eup %2434 }
 0xf0e   :  { %v1298_v1 = vadd.f32 1.0, %v2435_v60 }
 0xf10   :  { %2436 = vrcp.f32 %v1298_v1  ;;  %v1311_v33 = vand.u32 2147483648, %v1298_v1  ;;  %v1309_v38 = vand.u32 2147483647, %v1298_v1  ;;  %vm1305_vm3 = vweird.f32 %v1298_v1 }
 0xf11   :  { %2438 = vtanh.f32 %v1291_v0 }
 0xf12   :  { %v1312_v42 = vor.u32 1.1754944e-38, %v1311_v33  ;;  %vm1310_vm5 = vcmp.eq.f32.partialorder %v1309_v38, 8.507059e+37  ;;  %2440 = vpow2.f32 %v2273_v23 }
 0xf16   :  { %v2437_v18 = vpop.eup %2436 }
 0xf17   :  { %v1301_v25 = vmul.f32 %v2437_v18, %v1298_v1  ;;  %vm1306_vm2 = vweird.f32 %v2437_v18  ;;  %v2439_v46 = vpop.eup %2438 }
 0xf18   :  { %vm1307_vm4 = vmor %vm1305_vm3, %vm1306_vm2  ;;  %v2441_v53 = vpop.eup %2440 }
 0xf19   :  { %v1302_v22 = vsub.f32 1.0, %v1301_v25  ;;  %v1299_v40 = vadd.f32 1.0, %v2441_v53 }
 0xf1b   :  { %v1303_v34 = vmul.f32 %v2437_v18, %v1302_v22  ;;  %2442 = vrcp.f32 %v1299_v40  ;;  %v1326_v12 = vand.u32 2147483648, %v1299_v40  ;;  %vm1320_vm7 = vweird.f32 %v1299_v40 }
 0xf1c   :  { %v1324_v29 = vand.u32 2147483647, %v1299_v40 }
 0xf1d   :  { %v1304_v39 = vadd.f32 %v2437_v18, %v1303_v34  ;;  %v1327_v15 = vor.u32 1.1754944e-38, %v1326_v12 }
 0xf1e   :  { %vm1325_vm11 = vcmp.eq.f32.partialorder %v1324_v29, 8.507059e+37 }
 0xf1f   :  { %v1308_v43 = vsel %vm1307_vm4, %v2437_v18, %v1304_v39 }
 0xf20   :  { %v1313_v30 = vsel %vm1310_vm5, %v1312_v42, %v1308_v43 }
 0xf21   :  { %v1332_v50 = vmul.f32 %v2439_v46, %v1313_v30  ;;  %v2443_v4 = vpop.eup %2442  ;;  %v1331_v7 = vmul.f32 0.0, %v1313_v30 }
 0xf22   :  { %v1316_v61 = vmul.f32 %v2443_v4, %v1299_v40  ;;  %vm1321_vm6 = vweird.f32 %v2443_v4 }
 0xf23   :  { %1334 = vrot.lane.b32.xlu2 %v1332_v50, %s2626_s11  ;;  %vm1322_vm10 = vmor %vm1320_vm7, %vm1321_vm6 }
 0xf24   :  { %v1317_v10 = vsub.f32 1.0, %v1316_v61 }
 0xf26   :  { %v1318_v5 = vmul.f32 %v2443_v4, %v1317_v10 }
 0xf28   :  { %v1319_v24 = vadd.f32 %v2443_v4, %v1318_v5 }
 0xf2a   :  { %v1323_v14 = vsel %vm1322_vm10, %v2443_v4, %v1319_v24 }
 0xf2b   :  { %v1328_v17 = vsel %vm1325_vm11, %v1327_v15, %v1323_v14 }
 0xf7d   :  { %v1335_v9 = vpop.permute.xlu2 %1334 }
 0xf7e   :  { %v1337_v11 = vadd.f32 %v1335_v9, %v1331_v7 }
 0xf80   :  { %2444 = vtanh.f32 %v1337_v11  ;;  %1346 = vrot.lane.b32.xlu1 %v1337_v11, %s2626_s11 }
 0xf86   :  { %v2445_v21 = vpop.eup %2444 }
 0xf87   :  { %v1339_v32 = vmul.f32 %v2445_v21, %v1328_v17 }
 0xf89   :  { %1341 = vrot.lane.b32.xlu0 %v1339_v32, %s2626_s11 }
 0xff2   :  { %v1347_v20 = vpop.permute.xlu1 %1346 }
 0xff3   :  { %v1349_v6 = vsel %vm330_vm8, %v1347_v20, 0.0 }
 0xff4   :  { %1435 = vrot.lane.b32.xlu2 %v1349_v6, %s2626_s11 }
 0xffb   :  { %v1342_v54 = vpop.permute.xlu0 %1341 }
 0xffc   :  { %v1344_v55 = vsel %vm330_vm8, %v1342_v54, 0.0 }
 0xffd   :  { %2274 = vmatmul.msk.f32.vlgmr.msrb.gmra.mxu3 %vm232_vm9, %v1344_v55  ;;  %2275 = vmatmul.msk.f32.vlgmr.msra.gmra.mxu0 %vm232_vm9, %v1344_v55 }
 0xffe   :  { %1753 = vmatpush.msrb.mxu3 %v3013_v31  ;;  %1773 = vmatpush.msra.mxu0 %v3026_v45 }
0x1000   :  { %1754 = vmatpush.msrb.mxu3 %v3016_v27  ;;  %1774 = vmatpush.msra.mxu0 %v3032_v49 }
0x1002   :  { %1755 = vmatpush.msrb.mxu3 %v3018_v37  ;;  %1775 = vmatpush.msra.mxu0 %v3036_v58 }
0x1004   :  { %1756 = vmatpush.msrb.mxu3 %v3021_v16  ;;  %1776 = vmatpush.msra.mxu0 %v3040_v52 }
0x1006   :  { %1757 = vmatpush.msrb.mxu3 %v3024_v44  ;;  %1777 = vmatpush.msra.mxu0 %v3067_v26 }
0x1008   :  { %1758 = vmatpush.msrb.mxu3 %v3030_v48  ;;  %1778 = vmatpush.msra.mxu0 %v3070_v35 }
0x100a   :  { %1759 = vmatpush.msrb.mxu3 %v3038_v51  ;;  %1779 = vmatpush.msra.mxu0 %v3072_v41 }
0x100c   :  { %1760 = vmatpush.msrb.mxu3 %v3044_v2  ;;  %1780 = vmatpush.msra.mxu0 %v3076_v47 }
0x104e   :  { %v1436_v10 = vpop.permute.xlu2 %1435 }
0x107a   :  { %v1390_v1 = vpop.f32.mrf.mxu0 }
0x107b   :  { %v1391_v36 = vadd.f32 %v1390_v1, %v3143_v63 }
0x107d   :  { %v1394_v18 = vadd.f32 %v1391_v36, %v3146_v13 }
0x107f   :  { %v2277_v50 = vmul.f32 -1.442695, %v1394_v18 }
0x1080   :  { %v1370_v3 = vpop.f32.mrf.mxu3 }
0x1081   :  { %v1371_v57 = vadd.f32 %v1370_v3, %v3137_v56 }
0x1083   :  { %v1393_v59 = vadd.f32 %v1371_v57, %v3140_v19 }
0x1085   :  { %v2276_v28 = vmul.f32 -1.442695, %v1393_v59 }
0x1087   :  { %2446 = vpow2.f32 %v2276_v28 }
0x108d   :  { %v2447_v62 = vpop.eup %2446 }
0x108e   :  { %v1401_v60 = vadd.f32 1.0, %v2447_v62 }
0x1090   :  { %2448 = vrcp.f32 %v1401_v60  ;;  %v1414_v22 = vand.u32 2147483648, %v1401_v60  ;;  %v1412_v34 = vand.u32 2147483647, %v1401_v60  ;;  %vm1408_vm12 = vweird.f32 %v1401_v60 }
0x1091   :  { %2450 = vtanh.f32 %v1394_v18 }
0x1092   :  { %v1415_v39 = vor.u32 1.1754944e-38, %v1414_v22  ;;  %vm1413_vm14 = vcmp.eq.f32.partialorder %v1412_v34, 8.507059e+37  ;;  %2452 = vpow2.f32 %v2277_v50 }
0x1096   :  { %v2449_v8 = vpop.eup %2448 }
0x1097   :  { %v1404_v0 = vmul.f32 %v2449_v8, %v1401_v60  ;;  %vm1409_vm8 = vweird.f32 %v2449_v8  ;;  %v2451_v43 = vpop.eup %2450 }
0x1098   :  { %vm1410_vm13 = vmor %vm1408_vm12, %vm1409_vm8  ;;  %v2453_v23 = vpop.eup %2452 }
0x1099   :  { %v1405_v25 = vsub.f32 1.0, %v1404_v0  ;;  %v1402_v53 = vadd.f32 1.0, %v2453_v23 }
0x109b   :  { %v1406_v33 = vmul.f32 %v2449_v8, %v1405_v25  ;;  %2454 = vrcp.f32 %v1402_v53  ;;  %v1429_v12 = vand.u32 2147483648, %v1402_v53  ;;  %vm1423_vm0 = vweird.f32 %v1402_v53 }
0x109c   :  { %v1427_v29 = vand.u32 2147483647, %v1402_v53 }
0x109d   :  { %v1407_v38 = vadd.f32 %v2449_v8, %v1406_v33  ;;  %v1430_v15 = vor.u32 1.1754944e-38, %v1429_v12 }
0x109e   :  { %vm1428_vm2 = vcmp.eq.f32.partialorder %v1427_v29, 8.507059e+37 }
0x109f   :  { %v1411_v42 = vsel %vm1410_vm13, %v2449_v8, %v1407_v38 }
0x10a0   :  { %v1416_v46 = vsel %vm1413_vm14, %v1415_v39, %v1411_v42 }
0x10a1   :  { %v1439_v30 = vmul.f32 %v2451_v43, %v1416_v46  ;;  %v2455_v40 = vpop.eup %2454  ;;  %v1438_v7 = vmul.f32 %v1436_v10, %v1416_v46 }
0x10a2   :  { %v1419_v4 = vmul.f32 %v2455_v40, %v1402_v53  ;;  %vm1424_vm15 = vweird.f32 %v2455_v40 }
0x10a3   :  { %1441 = vrot.lane.b32.xlu0 %v1439_v30, %s2626_s11  ;;  %vm1425_vm1 = vmor %vm1423_vm0, %vm1424_vm15 }
0x10a4   :  { %v1420_v61 = vsub.f32 1.0, %v1419_v4 }
0x10a6   :  { %v1421_v5 = vmul.f32 %v2455_v40, %v1420_v61 }
0x10a8   :  { %v1422_v24 = vadd.f32 %v2455_v40, %v1421_v5 }
0x10aa   :  { %v1426_v14 = vsel %vm1425_vm1, %v2455_v40, %v1422_v24 }
0x10ab   :  { %v1431_v17 = vsel %vm1428_vm2, %v1430_v15, %v1426_v14 }
0x1115   :  { %v1442_v9 = vpop.permute.xlu0 %1441 }
0x1116   :  { %v3180_v11 = vadd.f32 %v1442_v9, %v1438_v7 }
0x1118   :  { %2456 = vtanh.f32 %v3180_v11 }
0x111e   :  { %v2457_v21 = vpop.eup %2456 }
0x111f   :  { %v1446_v32 = vmul.f32 %v2457_v21, %v1431_v17 }
0x1121   :  { %1448 = vrot.lane.b32.xlu1 %v1446_v32, %s2626_s11 }
0x1193   :  { %v1449_v20 = vpop.permute.xlu1 %1448 }
0x1194   :  { %1451 = vst.msk [vmem:[#allocation3] sm:$0xff] %vm232_vm9, %v1449_v20  ;;  %2278 = vmatmul.msk.f32.vlgmr.msrb.gmra.mxu1 %vm232_vm9, %v1449_v20  ;;  %2279 = vmatmul.msk.f32.vlgmr.msrb.gmra.mxu2 %vm232_vm9, %v1449_v20 }
0x1195   :  { %1850 = vmatpush.msrb.mxu1 %v3013_v31  ;;  %1870 = vmatpush.msrb.mxu2 %v3026_v45 }
0x1197   :  { %1851 = vmatpush.msrb.mxu1 %v3016_v27  ;;  %1871 = vmatpush.msrb.mxu2 %v3032_v49 }
0x1199   :  { %1852 = vmatpush.msrb.mxu1 %v3018_v37  ;;  %1872 = vmatpush.msrb.mxu2 %v3036_v58 }
0x119b   :  { %1853 = vmatpush.msrb.mxu1 %v3021_v16  ;;  %1873 = vmatpush.msrb.mxu2 %v3040_v52 }
0x119d   :  { %1854 = vmatpush.msrb.mxu1 %v3024_v44  ;;  %1874 = vmatpush.msrb.mxu2 %v3067_v26 }
0x119f   :  { %1855 = vmatpush.msrb.mxu1 %v3030_v48  ;;  %1875 = vmatpush.msrb.mxu2 %v3070_v35 }
0x11a1   :  { %1856 = vmatpush.msrb.mxu1 %v3038_v51  ;;  %1876 = vmatpush.msrb.mxu2 %v3072_v41 }
0x11a3   :  { %1857 = vmatpush.msrb.mxu1 %v3044_v2  ;;  %1877 = vmatpush.msrb.mxu2 %v3076_v47 }
0x1211   :  { %v1471_v6 = vpop.f32.mrf.mxu1 }
0x1212   :  { %v1472_v54 = vadd.f32 %v1471_v6, %v3137_v56 }
0x1214   :  { %v1494_v55 = vadd.f32 %v1472_v54, %v3140_v19 }
0x1216   :  { %v2280_v3 = vmul.f32 -1.442695, %v1494_v55 }
0x1217   :  { %v1491_v28 = vpop.f32.mrf.mxu2 }
0x1218   :  { %2458 = vpow2.f32 %v2280_v3  ;;  %v1492_v62 = vadd.f32 %v1491_v28, %v3143_v63 }
0x121a   :  { %v1495_v1 = vadd.f32 %v1492_v62, %v3146_v13 }
0x121c   :  { %v2281_v43 = vmul.f32 -1.442695, %v1495_v1 }
0x121e   :  { %v2459_v57 = vpop.eup %2458 }
0x121f   :  { %v1502_v59 = vadd.f32 1.0, %v2459_v57 }
0x1221   :  { %2460 = vrcp.f32 %v1502_v59  ;;  %v1515_v18 = vand.u32 2147483648, %v1502_v59  ;;  %v1513_v25 = vand.u32 2147483647, %v1502_v59  ;;  %vm1509_vm4 = vweird.f32 %v1502_v59 }
0x1222   :  { %2462 = vtanh.f32 %v1495_v1 }
0x1223   :  { %v1516_v33 = vor.u32 1.1754944e-38, %v1515_v18  ;;  %vm1514_vm6 = vcmp.eq.f32.partialorder %v1513_v25, 8.507059e+37  ;;  %2464 = vpow2.f32 %v2281_v43 }
0x1227   :  { %v2461_v60 = vpop.eup %2460 }
0x1228   :  { %v1505_v36 = vmul.f32 %v2461_v60, %v1502_v59  ;;  %vm1510_vm3 = vweird.f32 %v2461_v60  ;;  %v2463_v38 = vpop.eup %2462 }
0x1229   :  { %vm1511_vm5 = vmor %vm1509_vm4, %vm1510_vm3  ;;  %v2465_v46 = vpop.eup %2464 }
0x122a   :  { %v1506_v8 = vsub.f32 1.0, %v1505_v36  ;;  %v1503_v30 = vadd.f32 1.0, %v2465_v46 }
0x122c   :  { %v1507_v0 = vmul.f32 %v2461_v60, %v1506_v8  ;;  %2466 = vrcp.f32 %v1503_v30  ;;  %v1530_v7 = vand.u32 2147483648, %v1503_v30  ;;  %vm1524_vm10 = vweird.f32 %v1503_v30 }
0x122d   :  { %v1528_v9 = vand.u32 2147483647, %v1503_v30 }
0x122e   :  { %v1508_v22 = vadd.f32 %v2461_v60, %v1507_v0  ;;  %v1531_v12 = vor.u32 1.1754944e-38, %v1530_v7 }
0x122f   :  { %vm1529_vm8 = vcmp.eq.f32.partialorder %v1528_v9, 8.507059e+37 }
0x1230   :  { %v1512_v34 = vsel %vm1511_vm5, %v2461_v60, %v1508_v22 }
0x1231   :  { %v1517_v39 = vsel %vm1514_vm6, %v1516_v33, %v1512_v34 }
0x1232   :  { %v1536_v42 = vmul.f32 %v2463_v38, %v1517_v39  ;;  %v2467_v50 = vpop.eup %2466  ;;  %v1535_v4 = vmul.f32 %v1517_v39, %v3180_v11 }
0x1233   :  { %v1520_v23 = vmul.f32 %v2467_v50, %v1503_v30  ;;  %vm1525_vm7 = vweird.f32 %v2467_v50 }
0x1234   :  { %1538 = vrot.lane.b32.xlu2 %v1536_v42, %s2626_s11  ;;  %vm1526_vm11 = vmor %vm1524_vm10, %vm1525_vm7 }
0x1235   :  { %v1521_v53 = vsub.f32 1.0, %v1520_v23 }
0x1237   :  { %v1522_v40 = vmul.f32 %v2467_v50, %v1521_v53 }
0x1239   :  { %v1523_v5 = vadd.f32 %v2467_v50, %v1522_v40 }
0x123b   :  { %v1527_v24 = vsel %vm1526_vm11, %v2467_v50, %v1523_v5 }
0x123c   :  { %v1532_v14 = vsel %vm1529_vm8, %v1531_v12, %v1527_v24 }
0x128e   :  { %v1539_v61 = vpop.permute.xlu2 %1538 }
0x128f   :  { %v3209_v10 = vadd.f32 %v1539_v61, %v1535_v4 }
0x1291   :  { %2468 = vtanh.f32 %v3209_v10 }
0x1297   :  { %v2469_v29 = vpop.eup %2468 }
0x1298   :  { %v1543_v15 = vmul.f32 %v2469_v29, %v1532_v14 }
0x129a   :  { %1545 = vrot.lane.b32.xlu0 %v1543_v15, %s2626_s11 }
0x130c   :  { %v1546_v11 = vpop.permute.xlu0 %1545 }
0x130d   :  { %1548 = vst.msk [vmem:[#allocation3 + $0x8] sm:$0xff] %vm232_vm9, %v1546_v11  ;;  %2282 = vmatmul.msk.f32.vlgmr.msra.gmra.mxu3 %vm232_vm9, %v1546_v11  ;;  %2283 = vmatmul.msk.f32.vlgmr.msrb.gmra.mxu0 %vm232_vm9, %v1546_v11 }
0x130e   :  { %1947 = vmatpush.msra.mxu3 %v3013_v31  ;;  %1967 = vmatpush.msrb.mxu0 %v3026_v45 }
0x1310   :  { %1948 = vmatpush.msra.mxu3 %v3016_v27  ;;  %1968 = vmatpush.msrb.mxu0 %v3032_v49 }
0x1312   :  { %1949 = vmatpush.msra.mxu3 %v3018_v37  ;;  %1969 = vmatpush.msrb.mxu0 %v3036_v58 }
0x1314   :  { %1950 = vmatpush.msra.mxu3 %v3021_v16  ;;  %1970 = vmatpush.msrb.mxu0 %v3040_v52 }
0x1316   :  { %1951 = vmatpush.msra.mxu3 %v3024_v44  ;;  %1971 = vmatpush.msrb.mxu0 %v3067_v26 }
0x1318   :  { %1952 = vmatpush.msra.mxu3 %v3030_v48  ;;  %1972 = vmatpush.msrb.mxu0 %v3070_v35 }
0x131a   :  { %1953 = vmatpush.msra.mxu3 %v3038_v51  ;;  %1973 = vmatpush.msrb.mxu0 %v3072_v41 }
0x131c   :  { %1954 = vmatpush.msra.mxu3 %v3044_v2  ;;  %1974 = vmatpush.msrb.mxu0 %v3076_v47 }
0x138a   :  { %v1588_v55 = vpop.f32.mrf.mxu0 }
0x138b   :  { %v1589_v3 = vadd.f32 %v1588_v55, %v3143_v63 }
0x138d   :  { %v1592_v59 = vadd.f32 %v1589_v3, %v3146_v13 }
0x138f   :  { %v2285_v34 = vmul.f32 -1.442695, %v1592_v59 }
0x1390   :  { %v1568_v21 = vpop.f32.mrf.mxu3 }
0x1391   :  { %v1569_v17 = vadd.f32 %v1568_v21, %v3137_v56 }
0x1393   :  { %v1591_v32 = vadd.f32 %v1569_v17, %v3140_v19 }
0x1395   :  { %v2284_v20 = vmul.f32 -1.442695, %v1591_v32 }
0x1397   :  { %2470 = vpow2.f32 %v2284_v20 }
0x139d   :  { %v2471_v6 = vpop.eup %2470 }
0x139e   :  { %v1599_v54 = vadd.f32 1.0, %v2471_v6 }
0x13a0   :  { %2472 = vrcp.f32 %v1599_v54  ;;  %v1612_v60 = vand.u32 2147483648, %v1599_v54  ;;  %v1610_v36 = vand.u32 2147483647, %v1599_v54  ;;  %vm1606_vm13 = vweird.f32 %v1599_v54 }
0x13a1   :  { %2474 = vtanh.f32 %v1592_v59 }
0x13a2   :  { %v1613_v18 = vor.u32 1.1754944e-38, %v1612_v60  ;;  %vm1611_vm15 = vcmp.eq.f32.partialorder %v1610_v36, 8.507059e+37  ;;  %2476 = vpow2.f32 %v2285_v34 }
0x13a6   :  { %v2473_v57 = vpop.eup %2472 }
0x13a7   :  { %v1602_v28 = vmul.f32 %v2473_v57, %v1599_v54  ;;  %vm1607_vm12 = vweird.f32 %v2473_v57  ;;  %v2475_v25 = vpop.eup %2474 }
0x13a8   :  { %vm1608_vm14 = vmor %vm1606_vm13, %vm1607_vm12  ;;  %v2477_v38 = vpop.eup %2476 }
0x13a9   :  { %v1603_v62 = vsub.f32 1.0, %v1602_v28  ;;  %v1600_v39 = vadd.f32 1.0, %v2477_v38 }
0x13ab   :  { %v1604_v1 = vmul.f32 %v2473_v57, %v1603_v62  ;;  %2478 = vrcp.f32 %v1600_v39  ;;  %v1627_v4 = vand.u32 2147483648, %v1600_v39  ;;  %vm1621_vm1 = vweird.f32 %v1600_v39 }
0x13ac   :  { %v1625_v61 = vand.u32 2147483647, %v1600_v39 }
0x13ad   :  { %v1605_v8 = vadd.f32 %v2473_v57, %v1604_v1  ;;  %v1628_v7 = vor.u32 1.1754944e-38, %v1627_v4 }
0x13ae   :  { %vm1626_vm3 = vcmp.eq.f32.partialorder %v1625_v61, 8.507059e+37 }
0x13af   :  { %v1609_v0 = vsel %vm1608_vm14, %v2473_v57, %v1605_v8 }
0x13b0   :  { %v1614_v22 = vsel %vm1611_vm15, %v1613_v18, %v1609_v0 }
0x13b1   :  { %v1633_v33 = vmul.f32 %v2475_v25, %v1614_v22  ;;  %v2479_v42 = vpop.eup %2478  ;;  %v1632_v50 = vmul.f32 %v1614_v22, %v3209_v10 }
0x13b2   :  { %v1617_v43 = vmul.f32 %v2479_v42, %v1600_v39  ;;  %vm1622_vm0 = vweird.f32 %v2479_v42 }
0x13b3   :  { %1635 = vrot.lane.b32.xlu1 %v1633_v33, %s2626_s11  ;;  %vm1623_vm2 = vmor %vm1621_vm1, %vm1622_vm0 }
0x13b4   :  { %v1618_v46 = vsub.f32 1.0, %v1617_v43 }
0x13b6   :  { %v1619_v30 = vmul.f32 %v2479_v42, %v1618_v46 }
0x13b8   :  { %v1620_v40 = vadd.f32 %v2479_v42, %v1619_v30 }
0x13ba   :  { %v1624_v5 = vsel %vm1623_vm2, %v2479_v42, %v1620_v40 }
0x13bb   :  { %v1629_v24 = vsel %vm1626_vm3, %v1628_v7, %v1624_v5 }
0x1425   :  { %v1636_v23 = vpop.permute.xlu1 %1635 }
0x1426   :  { %v3238_v53 = vadd.f32 %v1636_v23, %v1632_v50 }
0x1428   :  { %2480 = vtanh.f32 %v3238_v53 }
0x142e   :  { %v2481_v9 = vpop.eup %2480 }
0x142f   :  { %v1640_v12 = vmul.f32 %v2481_v9, %v1629_v24 }
0x1431   :  { %1642 = vrot.lane.b32.xlu2 %v1640_v12, %s2626_s11 }
0x148b   :  { %v1643_v10 = vpop.permute.xlu2 %1642 }
0x148c   :  { %1645 = vst.msk [vmem:[#allocation3 + $0x10] sm:$0xff] %vm232_vm9, %v1643_v10  ;;  %2286 = vmatmul.msk.f32.vlgmr.msra.gmra.mxu1 %vm232_vm9, %v1643_v10  ;;  %2287 = vmatmul.msk.f32.vlgmr.msra.gmra.mxu2 %vm232_vm9, %v1643_v10 }
0x148d   :  { %2044 = vmatpush.msra.mxu1 %v3013_v31  ;;  %2064 = vmatpush.msra.mxu2 %v3026_v45 }
0x148f   :  { %2045 = vmatpush.msra.mxu1 %v3016_v27  ;;  %2065 = vmatpush.msra.mxu2 %v3032_v49 }
0x1491   :  { %2046 = vmatpush.msra.mxu1 %v3018_v37  ;;  %2066 = vmatpush.msra.mxu2 %v3036_v58 }
0x1493   :  { %2047 = vmatpush.msra.mxu1 %v3021_v16  ;;  %2067 = vmatpush.msra.mxu2 %v3040_v52 }
0x1495   :  { %2048 = vmatpush.msra.mxu1 %v3024_v44  ;;  %2068 = vmatpush.msra.mxu2 %v3067_v26 }
0x1497   :  { %2049 = vmatpush.msra.mxu1 %v3030_v48  ;;  %2069 = vmatpush.msra.mxu2 %v3070_v35 }
0x1499   :  { %2050 = vmatpush.msra.mxu1 %v3038_v51  ;;  %2070 = vmatpush.msra.mxu2 %v3072_v41 }
0x149b   :  { %2051 = vmatpush.msra.mxu1 %v3044_v2  ;;  %2071 = vmatpush.msra.mxu2 %v3076_v47 }
0x1509   :  { %v1665_v31 = vpop.f32.mrf.mxu1 }
0x150a   :  { %v1666_v27 = vadd.f32 %v1665_v31, %v3137_v56 }
0x150c   :  { %v1688_v37 = vadd.f32 %v1666_v27, %v3140_v19 }
0x150e   :  { %v2288_v16 = vmul.f32 -1.442695, %v1688_v37 }
0x150f   :  { %v1685_v48 = vpop.f32.mrf.mxu2 }
0x1510   :  { %2482 = vpow2.f32 %v2288_v16  ;;  %v1686_v49 = vadd.f32 %v1685_v48, %v3143_v63 }
0x1512   :  { %v1689_v51 = vadd.f32 %v1686_v49, %v3146_v13 }
0x1514   :  { %v2289_v17 = vmul.f32 -1.442695, %v1689_v51 }
0x1516   :  { %v2483_v44 = vpop.eup %2482 }
0x1517   :  { %v1696_v45 = vadd.f32 1.0, %v2483_v44 }
0x1519   :  { %2484 = vrcp.f32 %v1696_v45  ;;  %v1709_v26 = vand.u32 2147483648, %v1696_v45  ;;  %v1707_v41 = vand.u32 2147483647, %v1696_v45  ;;  %vm1703_vm5 = vweird.f32 %v1696_v45 }
0x151a   :  { %2486 = vtanh.f32 %v1689_v51 }
0x151b   :  { %v1710_v29 = vor.u32 1.1754944e-38, %v1709_v26  ;;  %vm1708_vm7 = vcmp.eq.f32.partialorder %v1707_v41, 8.507059e+37  ;;  %2488 = vpow2.f32 %v2289_v17 }
0x151f   :  { %v2485_v58 = vpop.eup %2484 }
0x1520   :  { %v1699_v52 = vmul.f32 %v2485_v58, %v1696_v45  ;;  %vm1704_vm4 = vweird.f32 %v2485_v58  ;;  %v2487_v15 = vpop.eup %2486 }
0x1521   :  { %vm1705_vm6 = vmor %vm1703_vm5, %vm1704_vm4  ;;  %v2489_v32 = vpop.eup %2488 }
0x1522   :  { %v1700_v2 = vsub.f32 1.0, %v1699_v52  ;;  %v1697_v20 = vadd.f32 1.0, %v2489_v32 }
0x1524   :  { %v1701_v35 = vmul.f32 %v2485_v58, %v1700_v2  ;;  %2490 = vrcp.f32 %v1697_v20  ;;  %v1724_v60 = vand.u32 2147483648, %v1697_v20  ;;  %vm1718_vm11 = vweird.f32 %v1697_v20 }
0x1525   :  { %v1722_v1 = vand.u32 2147483647, %v1697_v20 }
0x1526   :  { %v1702_v47 = vadd.f32 %v2485_v58, %v1701_v35  ;;  %v1725_v8 = vor.u32 1.1754944e-38, %v1724_v60 }
0x1527   :  { %vm1723_vm12 = vcmp.eq.f32.partialorder %v1722_v1, 8.507059e+37 }
0x1528   :  { %v1706_v14 = vsel %vm1705_vm6, %v2485_v58, %v1702_v47 }
0x1529   :  { %v1711_v11 = vsel %vm1708_vm7, %v1710_v29, %v1706_v14 }
0x152a   :  { %v1730_v21 = vmul.f32 %v2487_v15, %v1711_v11  ;;  %v2491_v6 = vpop.eup %2490  ;;  %v1729_v57 = vmul.f32 %v1711_v11, %v3238_v53 }
0x152b   :  { %v1714_v54 = vmul.f32 %v2491_v6, %v1697_v20  ;;  %vm1719_vm10 = vweird.f32 %v2491_v6 }
0x152c   :  { %1732 = vrot.lane.b32.xlu0 %v1730_v21, %s2626_s11  ;;  %vm1720_vm8 = vmor %vm1718_vm11, %vm1719_vm10 }
0x152d   :  { %v1715_v55 = vsub.f32 1.0, %v1714_v54 }
0x152f   :  { %v1716_v3 = vmul.f32 %v2491_v6, %v1715_v55 }
0x1531   :  { %v1717_v62 = vadd.f32 %v2491_v6, %v1716_v3 }
0x1533   :  { %v1721_v36 = vsel %vm1720_vm8, %v2491_v6, %v1717_v62 }
0x1534   :  { %v1726_v0 = vsel %vm1723_vm12, %v1725_v8, %v1721_v36 }
0x159e   :  { %v1733_v59 = vpop.permute.xlu0 %1732 }
0x159f   :  { %v1735_v28 = vadd.f32 %v1733_v59, %v1729_v57 }
0x15a1   :  { %2492 = vtanh.f32 %v1735_v28 }
0x15a7   :  { %v2493_v18 = vpop.eup %2492 }
0x15a8   :  { %v1737_v25 = vmul.f32 %v2493_v18, %v1726_v0 }
0x15aa   :  { %1739 = vrot.lane.b32.xlu1 %v1737_v25, %s2626_s11 }
0x161c   :  { %v1740_v22 = vpop.permute.xlu1 %1739 }
0x161d   :  { %1742 = vst.msk [vmem:[#allocation3 + $0x18] sm:$0xff] %vm232_vm9, %v1740_v22  ;;  %2290 = vmatmul.msk.f32.vlgmr.msrb.gmra.mxu3 %vm232_vm9, %v1740_v22  ;;  %2291 = vmatmul.msk.f32.vlgmr.msra.gmra.mxu0 %vm232_vm9, %v1740_v22 }
0x169a   :  { %v1782_v46 = vpop.f32.mrf.mxu0 }
0x169b   :  { %v1783_v30 = vadd.f32 %v1782_v46, %v3143_v63  ;;  %v2145_v46 = vld [vmem:[#allocation8 + $0x68] sm:$0xff] }
0x169d   :  { %v1786_v23 = vadd.f32 %v1783_v30, %v3146_v13  ;;  %v2144_v30 = vld [vmem:[#allocation8 + $0x60] sm:$0xff] }
0x169f   :  { %v2293_v27 = vmul.f32 -1.442695, %v1786_v23 }
0x16a0   :  { %v1762_v33 = vpop.f32.mrf.mxu3 }
0x16a1   :  { %v1763_v34 = vadd.f32 %v1762_v33, %v3137_v56 }
0x16a3   :  { %v1785_v38 = vadd.f32 %v1763_v34, %v3140_v19 }
0x16a5   :  { %v2292_v39 = vmul.f32 -1.442695, %v1785_v38 }
0x16a7   :  { %2494 = vpow2.f32 %v2292_v39 }
0x16ad   :  { %v2495_v42 = vpop.eup %2494 }
0x16ae   :  { %v1793_v43 = vadd.f32 1.0, %v2495_v42  ;;  %v2147_v42 = vld [vmem:[#allocation8 + $0x78] sm:$0xff] }
0x16af   :  { %2185 = vmatpush.msrb.mxu3 %v2147_v42 }
0x16b0   :  { %2496 = vrcp.f32 %v1793_v43  ;;  %v1806_v4 = vand.u32 2147483648, %v1793_v43  ;;  %v1804_v5 = vand.u32 2147483647, %v1793_v43  ;;  %vm1800_vm14 = vweird.f32 %v1793_v43 }
0x16b1   :  { %2498 = vtanh.f32 %v1786_v23 }
0x16b2   :  { %v1807_v9 = vor.u32 1.1754944e-38, %v1806_v4  ;;  %vm1805_vm0 = vcmp.eq.f32.partialorder %v1804_v5, 8.507059e+37  ;;  %2500 = vpow2.f32 %v2293_v27 }
0x16b6   :  { %v2497_v50 = vpop.eup %2496 }
0x16b7   :  { %v1796_v53 = vmul.f32 %v2497_v50, %v1793_v43  ;;  %vm1801_vm13 = vweird.f32 %v2497_v50  ;;  %v2499_v12 = vpop.eup %2498  ;;  %v2146_v43 = vld [vmem:[#allocation8 + $0x70] sm:$0xff] }
0x16b8   :  { %vm1802_vm15 = vmor %vm1800_vm14, %vm1801_vm13  ;;  %v2501_v37 = vpop.eup %2500  ;;  %2186 = vmatpush.msrb.mxu3 %v2146_v43 }
0x16b9   :  { %v1797_v40 = vsub.f32 1.0, %v1796_v53  ;;  %v1794_v16 = vadd.f32 1.0, %v2501_v37 }
0x16ba   :  { %2187 = vmatpush.msrb.mxu3 %v2145_v46 }
0x16bb   :  { %v1798_v61 = vmul.f32 %v2497_v50, %v1797_v40  ;;  %2502 = vrcp.f32 %v1794_v16  ;;  %v1821_v26 = vand.u32 2147483648, %v1794_v16  ;;  %vm1815_vm2 = vweird.f32 %v1794_v16 }
0x16bc   :  { %v1819_v35 = vand.u32 2147483647, %v1794_v16  ;;  %2188 = vmatpush.msrb.mxu3 %v2144_v30 }
0x16bd   :  { %v1799_v7 = vadd.f32 %v2497_v50, %v1798_v61  ;;  %v1822_v47 = vor.u32 1.1754944e-38, %v1821_v26 }
0x16be   :  { %vm1820_vm4 = vcmp.eq.f32.partialorder %v1819_v35, 8.507059e+37 }
0x16bf   :  { %v1803_v24 = vsel %vm1802_vm15, %v2497_v50, %v1799_v7 }
0x16c0   :  { %v1808_v10 = vsel %vm1805_vm0, %v1807_v9, %v1803_v24 }
0x16c1   :  { %v1827_v31 = vmul.f32 %v2499_v12, %v1808_v10  ;;  %v2503_v44 = vpop.eup %2502  ;;  %v1826_v58 = vmul.f32 %v1808_v10, %v1735_v28 }
0x16c2   :  { %v1811_v45 = vmul.f32 %v2503_v44, %v1794_v16  ;;  %vm1816_vm1 = vweird.f32 %v2503_v44  ;;  %v2143_v16 = vld [vmem:[#allocation8 + $0x58] sm:$0xff] }
0x16c3   :  { %1829 = vrot.lane.b32.xlu2 %v1827_v31, %s2626_s11  ;;  %vm1817_vm3 = vmor %vm1815_vm2, %vm1816_vm1  ;;  %2189 = vmatpush.msrb.mxu3 %v2143_v16 }
0x16c4   :  { %v1812_v48 = vsub.f32 1.0, %v1811_v45  ;;  %v2141_v45 = vld [vmem:[#allocation8 + $0x48] sm:$0xff] }
0x16c6   :  { %v1813_v49 = vmul.f32 %v2503_v44, %v1812_v48  ;;  %v2140_v48 = vld [vmem:[#allocation8 + $0x40] sm:$0xff] }
0x16c8   :  { %v1814_v2 = vadd.f32 %v2503_v44, %v1813_v49 }
0x16ca   :  { %v1818_v41 = vsel %vm1817_vm3, %v2503_v44, %v1814_v2  ;;  %v2142_v44 = vld [vmem:[#allocation8 + $0x50] sm:$0xff]  ;;  %v2134_v2 = vld [vmem:[#allocation3 + $0x18] sm:$0xff] }
0x16cb   :  { %v1823_v14 = vsel %vm1820_vm4, %v1822_v47, %v1818_v41  ;;  %2190 = vmatpush.msrb.mxu3 %v2142_v44 }
0x16cd   :  { %2191 = vmatpush.msrb.mxu3 %v2141_v45 }
0x16cf   :  { %2192 = vmatpush.msrb.mxu3 %v2140_v48 }
0x171d   :  { %v1830_v51 = vpop.permute.xlu2 %1829 }
0x171e   :  { %v3276_v52 = vadd.f32 %v1830_v51, %v1826_v58  ;;  %v2131_v58 = vld [vmem:[#allocation3] sm:$0xff]  ;;  %v2132_v51 = vld [vmem:[#allocation3 + $0x8] sm:$0xff] }
0x1720   :  { %2504 = vtanh.f32 %v3276_v52 }
0x1726   :  { %v2505_v29 = vpop.eup %2504 }
0x1727   :  { %v1834_v15 = vmul.f32 %v2505_v29, %v1823_v14 }
0x1729   :  { %1836 = vrot.lane.b32.xlu0 %v1834_v15, %s2626_s11  ;;  %v3307_v15 = vld [vmem:[%s3363_s5 + $0x1] ss:$0 sm:$0xff] }
0x179b   :  { %v1837_v11 = vpop.permute.xlu0 %1836 }
0x179c   :  { %1839 = vst.msk [vmem:[#allocation3 + $0x20] sm:$0xff] %vm232_vm9, %v1837_v11  ;;  %2294 = vmatmul.msk.f32.vlgmr.msrb.gmra.mxu1 %vm232_vm9, %v1837_v11  ;;  %2295 = vmatmul.msk.f32.vlgmr.msrb.gmra.mxu2 %vm232_vm9, %v1837_v11 }
0x17a3   :  { %v2135_v26 = vld [vmem:[#allocation3 + $0x20] sm:$0xff] }
0x1819   :  { %v1859_v21 = vpop.f32.mrf.mxu1 }
0x181a   :  { %v1860_v17 = vadd.f32 %v1859_v21, %v3137_v56 }
0x181c   :  { %v1882_v32 = vadd.f32 %v1860_v17, %v3140_v19 }
0x181e   :  { %v2296_v20 = vmul.f32 -1.442695, %v1882_v32 }
0x181f   :  { %v1879_v55 = vpop.f32.mrf.mxu2 }
0x1820   :  { %2506 = vpow2.f32 %v2296_v20  ;;  %v1880_v3 = vadd.f32 %v1879_v55, %v3143_v63 }
0x1822   :  { %v1883_v59 = vadd.f32 %v1880_v3, %v3146_v13 }
0x1824   :  { %v2297_v34 = vmul.f32 -1.442695, %v1883_v59 }
0x1826   :  { %v2507_v6 = vpop.eup %2506 }
0x1827   :  { %v1890_v54 = vadd.f32 1.0, %v2507_v6 }
0x1829   :  { %2508 = vrcp.f32 %v1890_v54  ;;  %v1903_v60 = vand.u32 2147483648, %v1890_v54  ;;  %v1901_v36 = vand.u32 2147483647, %v1890_v54  ;;  %vm1897_vm6 = vweird.f32 %v1890_v54 }
0x182a   :  { %2510 = vtanh.f32 %v1883_v59 }
0x182b   :  { %v1904_v18 = vor.u32 1.1754944e-38, %v1903_v60  ;;  %vm1902_vm10 = vcmp.eq.f32.partialorder %v1901_v36, 8.507059e+37  ;;  %2512 = vpow2.f32 %v2297_v34 }
0x182f   :  { %v2509_v57 = vpop.eup %2508 }
0x1830   :  { %v1893_v28 = vmul.f32 %v2509_v57, %v1890_v54  ;;  %vm1898_vm5 = vweird.f32 %v2509_v57  ;;  %v2511_v25 = vpop.eup %2510 }
0x1831   :  { %vm1899_vm7 = vmor %vm1897_vm6, %vm1898_vm5  ;;  %v2513_v38 = vpop.eup %2512 }
0x1832   :  { %v1894_v62 = vsub.f32 1.0, %v1893_v28  ;;  %v1891_v39 = vadd.f32 1.0, %v2513_v38 }
0x1834   :  { %v1895_v1 = vmul.f32 %v2509_v57, %v1894_v62  ;;  %2514 = vrcp.f32 %v1891_v39  ;;  %v1918_v9 = vand.u32 2147483648, %v1891_v39  ;;  %vm1912_vm8 = vweird.f32 %v1891_v39 }
0x1835   :  { %v1916_v24 = vand.u32 2147483647, %v1891_v39 }
0x1836   :  { %v1896_v8 = vadd.f32 %v2509_v57, %v1895_v1  ;;  %v1919_v10 = vor.u32 1.1754944e-38, %v1918_v9 }
0x1837   :  { %vm1917_vm13 = vcmp.eq.f32.partialorder %v1916_v24, 8.507059e+37 }
0x1838   :  { %v1900_v0 = vsel %vm1899_vm7, %v2509_v57, %v1896_v8 }
0x1839   :  { %v1905_v22 = vsel %vm1902_vm10, %v1904_v18, %v1900_v0 }
0x183a   :  { %v1924_v33 = vmul.f32 %v2511_v25, %v1905_v22  ;;  %v2515_v50 = vpop.eup %2514  ;;  %v1923_v4 = vmul.f32 %v1905_v22, %v3276_v52  ;;  %v2133_v52 = vld [vmem:[#allocation3 + $0x10] sm:$0xff] }
0x183b   :  { %v1908_v23 = vmul.f32 %v2515_v50, %v1891_v39  ;;  %vm1913_vm11 = vweird.f32 %v2515_v50 }
0x183c   :  { %1926 = vrot.lane.b32.xlu1 %v1924_v33, %s2626_s11  ;;  %vm1914_vm12 = vmor %vm1912_vm8, %vm1913_vm11 }
0x183d   :  { %v1909_v53 = vsub.f32 1.0, %v1908_v23 }
0x183f   :  { %v1910_v40 = vmul.f32 %v2515_v50, %v1909_v53 }
0x1841   :  { %v1911_v7 = vadd.f32 %v2515_v50, %v1910_v40 }
0x1843   :  { %v1915_v12 = vsel %vm1914_vm12, %v2515_v50, %v1911_v7 }
0x1844   :  { %v1920_v27 = vsel %vm1917_vm13, %v1919_v10, %v1915_v12 }
0x18ae   :  { %v1927_v61 = vpop.permute.xlu1 %1926 }
0x18af   :  { %v3289_v5 = vadd.f32 %v1927_v61, %v1923_v4 }
0x18b1   :  { %2516 = vtanh.f32 %v3289_v5 }
0x18b7   :  { %v2517_v31 = vpop.eup %2516 }
0x18b8   :  { %v1931_v37 = vmul.f32 %v2517_v31, %v1920_v27 }
0x18ba   :  { %1933 = vrot.lane.b32.xlu2 %v1931_v37, %s2626_s11 }
0x1914   :  { %v1934_v49 = vpop.permute.xlu2 %1933 }
0x1915   :  { %1936 = vst.msk [vmem:[#allocation3 + $0x28] sm:$0xff] %vm232_vm9, %v1934_v49  ;;  %2298 = vmatmul.msk.f32.vlgmr.msra.gmra.mxu3 %vm232_vm9, %v1934_v49  ;;  %2299 = vmatmul.msk.f32.vlgmr.msrb.gmra.mxu0 %vm232_vm9, %v1934_v49 }
0x191c   :  { %v2136_v35 = vld [vmem:[#allocation3 + $0x28] sm:$0xff] }
0x191d   :  { %2307 = vmatmul.msk.f32.vlgmr.msrb.gmra.mxu3 %vm232_vm9, %v2131_v58 }
0x1925   :  { %2308 = vmatmul.msk.f32.gmra.mxu3 %vm232_vm9, %v2132_v51 }
0x192d   :  { %2309 = vmatmul.msk.f32.gmra.mxu3 %vm232_vm9, %v2133_v52 }
0x1935   :  { %2310 = vmatmul.msk.f32.gmra.mxu3 %vm232_vm9, %v2134_v2 }
0x193d   :  { %2311 = vmatmul.msk.f32.gmra.mxu3 %vm232_vm9, %v2135_v26 }
0x1945   :  { %2312 = vmatmul.msk.f32.gmra.mxu3 %vm232_vm9, %v2136_v35 }
0x1992   :  { %v1976_v20 = vpop.f32.mrf.mxu0 }
0x1993   :  { %v1977_v55 = vadd.f32 %v1976_v20, %v3143_v63 }
0x1995   :  { %v1980_v57 = vadd.f32 %v1977_v55, %v3146_v13 }
0x1997   :  { %v2301_v50 = vmul.f32 -1.442695, %v1980_v57 }
0x1998   :  { %v1956_v41 = vpop.f32.mrf.mxu3 }
0x1999   :  { %v1957_v47 = vadd.f32 %v1956_v41, %v3137_v56 }
0x199b   :  { %v1979_v29 = vadd.f32 %v1957_v47, %v3140_v19 }
0x199d   :  { %v2300_v14 = vmul.f32 -1.442695, %v1979_v29 }
0x199f   :  { %2518 = vpow2.f32 %v2300_v14 }
0x19a0   :  { %v2194_v11 = vpop.f32.mrf.mxu3 }
0x19a1   :  { %v2195_v21 = vadd.f32 %v3307_v15, %v2194_v11 }
0x19a3   :  { %2218 = vst [vmem:[%s3364_s6] sm:$0xff] %v2195_v21 }
0x19a5   :  { %v2519_v17 = vpop.eup %2518 }
0x19a6   :  { %v1987_v32 = vadd.f32 1.0, %v2519_v17 }
0x19a8   :  { %2520 = vrcp.f32 %v1987_v32  ;;  %v2197_v6 = vpop.f32.mrf.mxu3  ;;  %v2000_v1 = vand.u32 2147483648, %v1987_v32  ;;  %v1998_v8 = vand.u32 2147483647, %v1987_v32  ;;  %vm1994_vm15 = vweird.f32 %v1987_v32 }
0x19a9   :  { %v2198_v54 = vadd.f32 %v3307_v15, %v2197_v6  ;;  %2522 = vtanh.f32 %v1980_v57 }
0x19aa   :  { %v2001_v0 = vor.u32 1.1754944e-38, %v2000_v1  ;;  %vm1999_vm1 = vcmp.eq.f32.partialorder %v1998_v8, 8.507059e+37  ;;  %2524 = vpow2.f32 %v2301_v50 }
0x19ab   :  { %2219 = vst [vmem:[%s3364_s6 + $0x8] sm:$0xff] %v2198_v54 }
0x19ae   :  { %v2521_v3 = vpop.eup %2520 }
0x19af   :  { %v1990_v59 = vmul.f32 %v2521_v3, %v1987_v32  ;;  %vm1995_vm14 = vweird.f32 %v2521_v3  ;;  %v2523_v22 = vpop.eup %2522 }
0x19b0   :  { %v2200_v28 = vpop.f32.mrf.mxu3  ;;  %vm1996_vm0 = vmor %vm1994_vm15, %vm1995_vm14  ;;  %v2525_v23 = vpop.eup %2524 }
0x19b1   :  { %v2201_v62 = vadd.f32 %v3307_v15, %v2200_v28  ;;  %v1991_v60 = vsub.f32 1.0, %v1990_v59  ;;  %v1988_v53 = vadd.f32 1.0, %v2525_v23 }
0x19b3   :  { %2220 = vst [vmem:[%s3364_s6 + $0x10] sm:$0xff] %v2201_v62  ;;  %v1992_v36 = vmul.f32 %v2521_v3, %v1991_v60  ;;  %2526 = vrcp.f32 %v1988_v53  ;;  %v2015_v31 = vand.u32 2147483648, %v1988_v53  ;;  %vm2009_vm3 = vweird.f32 %v1988_v53 }
0x19b4   :  { %v2013_v27 = vand.u32 2147483647, %v1988_v53 }
0x19b5   :  { %v1993_v18 = vadd.f32 %v2521_v3, %v1992_v36  ;;  %v2016_v16 = vor.u32 1.1754944e-38, %v2015_v31 }
0x19b6   :  { %vm2014_vm5 = vcmp.eq.f32.partialorder %v2013_v27, 8.507059e+37 }
0x19b7   :  { %v1997_v25 = vsel %vm1996_vm0, %v2521_v3, %v1993_v18 }
0x19b8   :  { %v2203_v33 = vpop.f32.mrf.mxu3  ;;  %v2002_v34 = vsel %vm1999_vm1, %v2001_v0, %v1997_v25 }
0x19b9   :  { %v2204_v38 = vadd.f32 %v3307_v15, %v2203_v33  ;;  %v2021_v39 = vmul.f32 %v2523_v22, %v2002_v34  ;;  %v2527_v40 = vpop.eup %2526  ;;  %v2020_v9 = vmul.f32 %v2002_v34, %v3289_v5 }
0x19ba   :  { %v2005_v4 = vmul.f32 %v2527_v40, %v1988_v53  ;;  %vm2010_vm2 = vweird.f32 %v2527_v40 }
0x19bb   :  { %2221 = vst [vmem:[%s3364_s6 + $0x18] sm:$0xff] %v2204_v38  ;;  %2023 = vrot.lane.b32.xlu0 %v2021_v39, %s2626_s11  ;;  %vm2011_vm4 = vmor %vm2009_vm3, %vm2010_vm2 }
0x19bc   :  { %v2006_v61 = vsub.f32 1.0, %v2005_v4 }
0x19be   :  { %v2007_v7 = vmul.f32 %v2527_v40, %v2006_v61 }
0x19c0   :  { %v2206_v42 = vpop.f32.mrf.mxu3  ;;  %v2008_v10 = vadd.f32 %v2527_v40, %v2007_v7 }
0x19c1   :  { %v2207_v43 = vadd.f32 %v3307_v15, %v2206_v42 }
0x19c2   :  { %v2012_v37 = vsel %vm2011_vm4, %v2527_v40, %v2008_v10 }
0x19c3   :  { %2222 = vst [vmem:[%s3364_s6 + $0x20] sm:$0xff] %v2207_v43  ;;  %v2017_v45 = vsel %vm2014_vm5, %v2016_v16, %v2012_v37 }
0x19c8   :  { %v2209_v46 = vpop.f32.mrf.mxu3 }
0x19c9   :  { %v2210_v30 = vadd.f32 %v3307_v15, %v2209_v46 }
0x19cb   :  { %2223 = vst [vmem:[%s3364_s6 + $0x28] sm:$0xff] %v2210_v30 }
0x1a2d   :  { %v2024_v24 = vpop.permute.xlu0 %2023 }
0x1a2e   :  { %v2026_v12 = vadd.f32 %v2024_v24, %v2020_v9 }
0x1a30   :  { %2528 = vtanh.f32 %v2026_v12 }
0x1a36   :  { %v2529_v44 = vpop.eup %2528 }
0x1a37   :  { %v2028_v48 = vmul.f32 %v2529_v44, %v2017_v45 }
0x1a39   :  { %2030 = vrot.lane.b32.xlu1 %v2028_v48, %s2626_s11 }
0x1aab   :  { %v2031_v49 = vpop.permute.xlu1 %2030 }
0x1aac   :  { %2033 = vst.msk [vmem:[#allocation3 + $0x30] sm:$0xff] %vm232_vm9, %v2031_v49  ;;  %2302 = vmatmul.msk.f32.vlgmr.msra.gmra.mxu1 %vm232_vm9, %v2031_v49  ;;  %2303 = vmatmul.msk.f32.vlgmr.msra.gmra.mxu2 %vm232_vm9, %v2031_v49 }
0x1ab3   :  { %v2137_v5 = vld [vmem:[#allocation3 + $0x30] sm:$0xff] }
0x1ab4   :  { %2313 = vmatmul.msk.f32.gmra.mxu3 %vm232_vm9, %v2137_v5 }
0x1b29   :  { %v2053_v58 = vpop.f32.mrf.mxu1 }
0x1b2a   :  { %v2054_v51 = vadd.f32 %v2053_v58, %v3137_v56 }
0x1b2c   :  { %v2076_v52 = vadd.f32 %v2054_v51, %v3140_v19 }
0x1b2e   :  { %v2304_v2 = vmul.f32 -1.442695, %v2076_v52 }
0x1b2f   :  { %v2073_v47 = vpop.f32.mrf.mxu2 }
0x1b30   :  { %2530 = vpow2.f32 %v2304_v2  ;;  %v2074_v14 = vadd.f32 %v2073_v47, %v3143_v63 }
0x1b32   :  { %v2077_v56 = vadd.f32 %v2074_v14, %v3146_v13 }
0x1b34   :  { %v2305_v63 = vmul.f32 -1.442695, %v2077_v56 }
0x1b36   :  { %v2531_v26 = vpop.eup %2530 }
0x1b37   :  { %v2084_v35 = vadd.f32 1.0, %v2531_v26  ;;  %v2212_v41 = vpop.f32.mrf.mxu3 }
0x1b38   :  { %v2213_v29 = vadd.f32 %v3307_v15, %v2212_v41 }
0x1b39   :  { %2532 = vrcp.f32 %v2084_v35  ;;  %v2097_v17 = vand.u32 2147483648, %v2084_v35  ;;  %v2095_v20 = vand.u32 2147483647, %v2084_v35  ;;  %vm2091_vm7 = vweird.f32 %v2084_v35 }
0x1b3a   :  { %2224 = vst [vmem:[%s3364_s6 + $0x30] sm:$0xff] %v2213_v29  ;;  %2534 = vtanh.f32 %v2077_v56 }
0x1b3b   :  { %v2098_v54 = vor.u32 1.1754944e-38, %v2097_v17  ;;  %vm2096_vm11 = vcmp.eq.f32.partialorder %v2095_v20, 8.507059e+37  ;;  %2536 = vpow2.f32 %v2305_v63 }
0x1b3f   :  { %v2533_v11 = vpop.eup %2532 }
0x1b40   :  { %v2087_v21 = vmul.f32 %v2533_v11, %v2084_v35  ;;  %vm2092_vm6 = vweird.f32 %v2533_v11  ;;  %v2535_v3 = vpop.eup %2534 }
0x1b41   :  { %vm2093_vm10 = vmor %vm2091_vm7, %vm2092_vm6  ;;  %v2537_v13 = vpop.eup %2536 }
0x1b42   :  { %v2088_v19 = vsub.f32 1.0, %v2087_v21  ;;  %v2085_v28 = vadd.f32 1.0, %v2537_v13 }
0x1b44   :  { %v2089_v32 = vmul.f32 %v2533_v11, %v2088_v19  ;;  %2538 = vrcp.f32 %v2085_v28  ;;  %v2112_v22 = vand.u32 2147483648, %v2085_v28  ;;  %vm2106_vm12 = vweird.f32 %v2085_v28 }
0x1b45   :  { %v2110_v33 = vand.u32 2147483647, %v2085_v28 }
0x1b46   :  { %v2090_v6 = vadd.f32 %v2533_v11, %v2089_v32  ;;  %v2113_v38 = vor.u32 1.1754944e-38, %v2112_v22 }
0x1b47   :  { %vm2111_vm14 = vcmp.eq.f32.partialorder %v2110_v33, 8.507059e+37 }
0x1b48   :  { %v2094_v55 = vsel %vm2093_vm10, %v2533_v11, %v2090_v6 }
0x1b49   :  { %v2099_v57 = vsel %vm2096_vm11, %v2098_v54, %v2094_v55 }
0x1b4a   :  { %v2118_v59 = vmul.f32 %v2535_v3, %v2099_v57  ;;  %v2539_v62 = vpop.eup %2538  ;;  %v2117_v8 = vmul.f32 %v2099_v57, %v2026_v12 }
0x1b4b   :  { %v2102_v60 = vmul.f32 %v2539_v62, %v2085_v28  ;;  %vm2107_vm8 = vweird.f32 %v2539_v62 }
0x1b4c   :  { %2120 = vrot.lane.b32.xlu2 %v2118_v59, %s2626_s11  ;;  %vm2108_vm13 = vmor %vm2106_vm12, %vm2107_vm8 }
0x1b4d   :  { %v2103_v1 = vsub.f32 1.0, %v2102_v60 }
0x1b4f   :  { %v2104_v36 = vmul.f32 %v2539_v62, %v2103_v1 }
0x1b51   :  { %v2105_v25 = vadd.f32 %v2539_v62, %v2104_v36 }
0x1b53   :  { %v2109_v34 = vsel %vm2108_vm13, %v2539_v62, %v2105_v25 }
0x1b54   :  { %v2114_v42 = vsel %vm2111_vm14, %v2113_v38, %v2109_v34 }
0x1ba6   :  { %v2121_v18 = vpop.permute.xlu2 %2120 }
0x1ba7   :  { %v2123_v0 = vadd.f32 %v2121_v18, %v2117_v8 }
0x1ba9   :  { %2540 = vtanh.f32 %v2123_v0 }
0x1baf   :  { %v2541_v39 = vpop.eup %2540 }
0x1bb0   :  { %v2125_v43 = vmul.f32 %v2541_v39, %v2114_v42 }
0x1bb2   :  { %2127 = vrot.lane.b32.xlu0 %v2125_v43, %s2626_s11 }
0x1c24   :  { %v2128_v46 = vpop.permute.xlu0 %2127 }
0x1c25   :  { %2130 = vst.msk [vmem:[#allocation3 + $0x38] sm:$0xff] %vm232_vm9, %v2128_v46 }
0x1c2c   :  { %v2138_v30 = vld [vmem:[#allocation3 + $0x38] sm:$0xff] }
0x1c2d   :  { %2314 = vmatmul.msk.f32.gmra.mxu3 %vm232_vm9, %v2138_v30 }
0x1cb0   :  { %v2215_v50 = vpop.f32.mrf.mxu3 }
0x1cb1   :  { %v2216_v23 = vadd.f32 %v3307_v15, %v2215_v50 }
0x1cb3   :  { %2225 = vst [vmem:[%s3364_s6 + $0x38] sm:$0xff] %v2216_v23 }
0x1cb4   :  { %2234 = vsyncpa [#allocation5], 1 }
0x1cb5   :  { %2235 = vsyncpa [#allocation7], 1 }

</bundles_post_ra>
